<compile_context>
chip_gen: v5e
topology: v5e:2x2
jax: 0.10.0
libtpu: 0.0.40
codegen_flags: <defaults>
</compile_context>

<pallas_src>
import functools

import jax
import jax.numpy as jnp
from jax.experimental import pallas as pl
from jax.experimental.pallas import tpu as pltpu


# ---------------------------------------------------------------------------
# Fused kernel: conv1+bn1+relu -> conv2+bn2+residual+relu, all in VMEM
# ---------------------------------------------------------------------------
def basic_block_kernel(x_ref, band1_ref, band2_ref, s1_ref, b1_ref, s2_ref,
                       b2_ref, out_ref, xpad_ref, y1pad_ref, *, D, H, WC, TD):
    """One (batch, D-tile) step of the fused BasicBlock forward.

    Layouts (all lane-dense, last dim = W*C):
      x_ref     : (1, D, H, W*C)      full volume of this batch (VMEM resident)
      band*_ref : (9, W*Cin, W*Cout)  block-banded weights, one per (kd, kh)
      s*/b*_ref : (1, W*C)            folded BN scale / bias, tiled over W
      out_ref   : (1, TD, H, W*C)     output D-tile
      xpad_ref  : (TD+4, H+2, W*C)    zero-padded input slab (D & H halos)
      y1pad_ref : (TD+2, H+2, W*C)    zero-padded conv1 activation slab
    """
    t = pl.program_id(1)
    nt = pl.num_programs(1)
    d_start = t * TD - 2          # first input row needed by this output tile

    # ---- zero-padded input slab built in VMEM (replaces host jnp.pad) ------
    xpad_ref[...] = jnp.zeros_like(xpad_ref)
    # interior rows of the slab are always inside the volume
    xpad_ref[2:TD + 2, 1:H + 1, :] = x_ref[0, pl.ds(t * TD, TD)]
    # two D-halo rows on each side, guarded against the volume boundary
    for r in (0, 1, TD + 2, TD + 3):
        d = d_start + r

        @pl.when((d >= 0) & (d < D))
        def _(r=r, d=d):
            xpad_ref[r:r + 1, 1:H + 1, :] = x_ref[0, pl.ds(d, 1)]

    # ---- conv1 + bn1 + relu : 9 fat matmuls (K = N = W*C) ------------------
    m1 = (TD + 2) * H             # conv1 computed with a 1-row D halo for conv2
    acc1 = jnp.zeros((m1, WC), jnp.float32)
    for kd in range(3):
        for kh in range(3):
            patch = xpad_ref[kd:kd + TD + 2, kh:kh + H, :].reshape(m1, WC)
            acc1 = acc1 + jnp.dot(patch, band1_ref[kd * 3 + kh],
                                  preferred_element_type=jnp.float32)
    y1 = jnp.maximum(acc1 * s1_ref[...] + b1_ref[...], 0.0)

    # ---- conv1 activation stays in VMEM; re-pad it for conv2 ---------------
    y1pad_ref[...] = jnp.zeros_like(y1pad_ref)
    y1pad_ref[:, 1:H + 1, :] = y1.reshape(TD + 2, H, WC)

    # conv2's D padding at the volume boundary must be zeros, not conv1(-1/D)
    @pl.when(t == 0)
    def _():
        y1pad_ref[0:1] = jnp.zeros((1, H + 2, WC), jnp.float32)

    @pl.when(t == nt - 1)
    def _():
        y1pad_ref[TD + 1:TD + 2] = jnp.zeros((1, H + 2, WC), jnp.float32)

    # ---- conv2 + bn2 + residual + relu --------------------------------------
    m2 = TD * H
    acc2 = jnp.zeros((m2, WC), jnp.float32)
    for kd in range(3):
        for kh in range(3):
            patch = y1pad_ref[kd:kd + TD, kh:kh + H, :].reshape(m2, WC)
            acc2 = acc2 + jnp.dot(patch, band2_ref[kd * 3 + kh],
                                  preferred_element_type=jnp.float32)
    res = x_ref[0, pl.ds(t * TD, TD)].reshape(m2, WC).astype(jnp.float32)
    y2 = jnp.maximum(acc2 * s2_ref[...] + b2_ref[...] + res, 0.0)
    out_ref[0] = y2.reshape(TD, H, WC).astype(out_ref.dtype)


# ---------------------------------------------------------------------------
# Weight preprocessing + wrapper around pallas_call
# ---------------------------------------------------------------------------
def _make_banded_weights(w, W):
    """(3,3,3,Cin,Cout) conv weights -> (9, W*Cin, W*Cout) block-banded mats.

    For each (kd, kh), the kw tap and the W-axis zero padding are folded into
    one banded matrix so a whole W row becomes a single MXU matmul:
      band[w_in*Cin + ci, w_out*Cout + co] =
          sum_kw [w_in == w_out + kw - 1] * w[kd, kh, kw, ci, co]
    (rows that would read the zero W-halo simply do not exist).
    """
    Cin, Cout = w.shape[3], w.shape[4]
    bands = []
    for kd in range(3):
        for kh in range(3):
            b = jnp.zeros((W * Cin, W * Cout), w.dtype)
            for kw in range(3):
                shift_eye = jnp.eye(W, k=1 - kw, dtype=w.dtype)
                b = b + jnp.einsum("pq,io->piqo", shift_eye,
                                   w[kd, kh, kw]).reshape(W * Cin, W * Cout)
            bands.append(b)
    return jnp.stack(bands, axis=0)


def basic_block_forward(x, params, *, d_tile=4):
    """Full BasicBlock forward (stride=1, downsample=None).  x: (N,D,H,W,C)."""
    # TODO(synk): stride>1 / downsample path of BasicBlock is not implemented
    # (module defaults: stride=1, downsample=None, so inplanes == planes).
    N, D, H, W, C = x.shape
    WC = W * C
    TD = max(1, min(d_tile, D))
    while D % TD:                 # pick a D-tile that divides D
        TD -= 1
    nt = D // TD

    x2 = x.reshape(N, D, H, WC)                       # lane axis = W*C
    band1 = _make_banded_weights(params["w1"], W)     # (9, W*C, W*C)
    band2 = _make_banded_weights(params["w2"], W)
    s1 = jnp.tile(params["scale1"], W).reshape(1, WC)
    b1 = jnp.tile(params["bias1"], W).reshape(1, WC)
    s2 = jnp.tile(params["scale2"], W).reshape(1, WC)
    b2 = jnp.tile(params["bias2"], W).reshape(1, WC)

    kernel = functools.partial(basic_block_kernel, D=D, H=H, WC=WC, TD=TD)

    out = pl.pallas_call(
        kernel,
        out_shape=jax.ShapeDtypeStruct((N, D, H, WC), x.dtype),
        grid_spec=pltpu.PrefetchScalarGridSpec(
            num_scalar_prefetch=0,
            grid=(N, nt),
            in_specs=[
                # full per-batch volume, resident across the D-tile axis
                pl.BlockSpec((1, D, H, WC), lambda n, t: (n, 0, 0, 0)),
                # weights / folded BN stay resident for the whole call
                pl.BlockSpec((9, WC, WC), lambda n, t: (0, 0, 0)),
                pl.BlockSpec((9, WC, WC), lambda n, t: (0, 0, 0)),
                pl.BlockSpec((1, WC), lambda n, t: (0, 0)),
                pl.BlockSpec((1, WC), lambda n, t: (0, 0)),
                pl.BlockSpec((1, WC), lambda n, t: (0, 0)),
                pl.BlockSpec((1, WC), lambda n, t: (0, 0)),
            ],
            out_specs=pl.BlockSpec((1, TD, H, WC), lambda n, t: (n, t, 0, 0)),
            scratch_shapes=[
                pltpu.VMEM((TD + 4, H + 2, WC), jnp.float32),  # padded x slab
                pltpu.VMEM((TD + 2, H + 2, WC), jnp.float32),  # padded conv1 act
            ],
        ),
        compiler_params=pltpu.CompilerParams(
            dimension_semantics=("parallel", "parallel")),
    )(x2, band1, band2, s1, b1, s2, b2)
    return out.reshape(N, D, H, W, C)


# ---------------------------------------------------------------------------
# Deterministic parameter init + pure-JAX reference
# ---------------------------------------------------------------------------
def make_params(key, planes):
    ks = jax.random.split(key, 10)
    eps = 1e-5

    def bn_fold(kg, kb, km, kv):
        gamma = jax.random.normal(kg, (planes,), jnp.float32) * 0.1 + 1.0
        beta = jax.random.normal(kb, (planes,), jnp.float32) * 0.1
        mean = jax.random.normal(km, (planes,), jnp.float32) * 0.1
        var = jnp.abs(jax.random.normal(kv, (planes,), jnp.float32)) * 0.1 + 0.5
        scale = gamma / jnp.sqrt(var + eps)
        bias = beta - mean * scale
        return scale, bias

    w1 = jax.random.normal(ks[0], (3, 3, 3, planes, planes), jnp.float32) * 0.1
    w2 = jax.random.normal(ks[1], (3, 3, 3, planes, planes), jnp.float32) * 0.1
    s1, b1 = bn_fold(ks[2], ks[3], ks[4], ks[5])
    s2, b2 = bn_fold(ks[6], ks[7], ks[8], ks[9])
    return {"w1": w1, "scale1": s1, "bias1": b1,
            "w2": w2, "scale2": s2, "bias2": b2}


def reference_forward(x, params):
    dn = ("NDHWC", "DHWIO", "NDHWC")

    def conv(a, w):
        return jax.lax.conv_general_dilated(
            a, w, window_strides=(1, 1, 1), padding=((1, 1), (1, 1), (1, 1)),
            dimension_numbers=dn)

    out = conv(x, params["w1"]) * params["scale1"] + params["bias1"]
    out = jnp.maximum(out, 0.0)
    out = conv(out, params["w2"]) * params["scale2"] + params["bias2"]
    out = out + x
    return jnp.maximum(out, 0.0)


if __name__ == "__main__":
    # inplanes == planes == 8, stride=1;  W*C = 128 -> lane-dense blocks
    N, D, H, W, C = 2, 16, 16, 16, 8
    key = jax.random.PRNGKey(0)
    kx, kp = jax.random.split(key)
    x = jax.random.normal(kx, (N, D, H, W, C), jnp.float32)  # layout: NDHWC
    params = make_params(kp, C)

    out = jax.block_until_ready(basic_block_forward(x, params))
    ref = jax.block_until_ready(reference_forward(x, params))
    assert out.shape == (N, D, H, W, C)
    assert jnp.allclose(out, ref, atol=1e-4, rtol=1e-4), (
        "mismatch vs reference: max abs err = "
        f"{jnp.max(jnp.abs(out - ref)):.3e}")
    print("KERNEL_OK")
</pallas_src>

<mosaic_0001>
module attributes {stable_mosaic.version = 11 : i64} {
  func.func @basic_block_kernel(%arg0: i32, %arg1: i32, %arg2: memref<1x16x16x128xf32, #tpu.memory_space<vmem>>, %arg3: memref<9x128x128xf32, #tpu.memory_space<vmem>>, %arg4: memref<9x128x128xf32, #tpu.memory_space<vmem>>, %arg5: memref<1x128xf32, #tpu.memory_space<vmem>>, %arg6: memref<1x128xf32, #tpu.memory_space<vmem>>, %arg7: memref<1x128xf32, #tpu.memory_space<vmem>>, %arg8: memref<1x128xf32, #tpu.memory_space<vmem>>, %arg9: memref<1x4x16x128xf32, #tpu.memory_space<vmem>>, %arg10: memref<8x18x128xf32, #tpu.memory_space<vmem>>, %arg11: memref<6x18x128xf32, #tpu.memory_space<vmem>>) attributes {dimension_semantics = [#tpu.dimension_semantics<parallel>, #tpu.dimension_semantics<parallel>], iteration_bounds = array<i64: 2, 4>, scalar_prefetch = 0 : i64, scratch_operands = 2 : i64, tpu.core_type = #tpu.core_type<tc>, window_params = [{transform_indices = @transform_0, window_bounds = array<i64: 1, 16, 16, 128>}, {pipeline_mode = #tpu.pipeline_mode<synchronous>, transform_indices = @transform_1, window_bounds = array<i64: 9, 128, 128>}, {pipeline_mode = #tpu.pipeline_mode<synchronous>, transform_indices = @transform_2, window_bounds = array<i64: 9, 128, 128>}, {pipeline_mode = #tpu.pipeline_mode<synchronous>, transform_indices = @transform_3, window_bounds = array<i64: 1, 128>}, {pipeline_mode = #tpu.pipeline_mode<synchronous>, transform_indices = @transform_4, window_bounds = array<i64: 1, 128>}, {pipeline_mode = #tpu.pipeline_mode<synchronous>, transform_indices = @transform_5, window_bounds = array<i64: 1, 128>}, {pipeline_mode = #tpu.pipeline_mode<synchronous>, transform_indices = @transform_6, window_bounds = array<i64: 1, 128>}, {transform_indices = @transform_7, window_bounds = array<i64: 1, 4, 16, 128>}]} {
    %c4_i32 = arith.constant 4 : i32
    %0 = arith.muli %arg1, %c4_i32 : i32
    %c2_i32 = arith.constant 2 : i32
    %1 = arith.subi %0, %c2_i32 : i32
    %cst = arith.constant 0.000000e+00 : f32
    %2 = vector.broadcast %cst : f32 to vector<8x18x128xf32>
    %c0 = arith.constant 0 : index
    %c0_0 = arith.constant 0 : index
    %c0_1 = arith.constant 0 : index
    %3 = vector.load %arg10[%c0, %c0_0, %c0_1] : memref<8x18x128xf32, #tpu.memory_space<vmem>>, vector<8x18x128xf32>
    tpu.vector_store %arg10[%c0, %c0_0, %c0_1], %2 {strides = array<i32>} : memref<8x18x128xf32, #tpu.memory_space<vmem>>, vector<8x18x128xf32>,
    %c4_i32_2 = arith.constant 4 : i32
    %4 = arith.muli %arg1, %c4_i32_2 : i32
    %c0_3 = arith.constant 0 : index
    %5 = arith.index_cast %4 : i32 to index
    %c0_4 = arith.constant 0 : index
    %c0_5 = arith.constant 0 : index
    %6 = vector.load %arg2[%c0_3, %5, %c0_4, %c0_5] : memref<1x16x16x128xf32, #tpu.memory_space<vmem>>, vector<1x4x16x128xf32>
    %7 = vector.shape_cast %6 : vector<1x4x16x128xf32> to vector<4x16x128xf32>
    %c2 = arith.constant 2 : index
    %c1 = arith.constant 1 : index
    %c0_6 = arith.constant 0 : index
    %8 = vector.load %arg10[%c2, %c1, %c0_6] : memref<8x18x128xf32, #tpu.memory_space<vmem>>, vector<4x16x128xf32>
    tpu.vector_store %arg10[%c2, %c1, %c0_6], %7 {strides = array<i32>} : memref<8x18x128xf32, #tpu.memory_space<vmem>>, vector<4x16x128xf32>,
    %c0_i32 = arith.constant 0 : i32
    %9 = arith.addi %1, %c0_i32 : i32
    %c0_i32_7 = arith.constant 0 : i32
    %10 = arith.cmpi sge, %9, %c0_i32_7 : i32
    %c16_i32 = arith.constant 16 : i32
    %11 = arith.cmpi slt, %9, %c16_i32 : i32
    %12 = arith.andi %10, %11 : i1
    %13 = arith.extui %12 : i1 to i32
    %c0_i32_8 = arith.constant 0 : i32
    %14 = arith.cmpi ne, %13, %c0_i32_8 : i32
    scf.if %14 {
      %c0_168 = arith.constant 0 : index
      %179 = arith.index_cast %9 : i32 to index
      %c0_169 = arith.constant 0 : index
      %c0_170 = arith.constant 0 : index
      %180 = vector.load %arg2[%c0_168, %179, %c0_169, %c0_170] : memref<1x16x16x128xf32, #tpu.memory_space<vmem>>, vector<1x1x16x128xf32>
      %181 = vector.shape_cast %180 : vector<1x1x16x128xf32> to vector<1x16x128xf32>
      %c0_171 = arith.constant 0 : index
      %c1_172 = arith.constant 1 : index
      %c0_173 = arith.constant 0 : index
      %182 = vector.load %arg10[%c0_171, %c1_172, %c0_173] : memref<8x18x128xf32, #tpu.memory_space<vmem>>, vector<1x16x128xf32>
      tpu.vector_store %arg10[%c0_171, %c1_172, %c0_173], %181 {strides = array<i32>} : memref<8x18x128xf32, #tpu.memory_space<vmem>>, vector<1x16x128xf32>,
    } else {
    }
    %c1_i32 = arith.constant 1 : i32
    %15 = arith.addi %1, %c1_i32 : i32
    %c0_i32_9 = arith.constant 0 : i32
    %16 = arith.cmpi sge, %15, %c0_i32_9 : i32
    %c16_i32_10 = arith.constant 16 : i32
    %17 = arith.cmpi slt, %15, %c16_i32_10 : i32
    %18 = arith.andi %16, %17 : i1
    %19 = arith.extui %18 : i1 to i32
    %c0_i32_11 = arith.constant 0 : i32
    %20 = arith.cmpi ne, %19, %c0_i32_11 : i32
    scf.if %20 {
      %c0_168 = arith.constant 0 : index
      %179 = arith.index_cast %15 : i32 to index
      %c0_169 = arith.constant 0 : index
      %c0_170 = arith.constant 0 : index
      %180 = vector.load %arg2[%c0_168, %179, %c0_169, %c0_170] : memref<1x16x16x128xf32, #tpu.memory_space<vmem>>, vector<1x1x16x128xf32>
      %181 = vector.shape_cast %180 : vector<1x1x16x128xf32> to vector<1x16x128xf32>
      %c1_171 = arith.constant 1 : index
      %c1_172 = arith.constant 1 : index
      %c0_173 = arith.constant 0 : index
      %182 = vector.load %arg10[%c1_171, %c1_172, %c0_173] : memref<8x18x128xf32, #tpu.memory_space<vmem>>, vector<1x16x128xf32>
      tpu.vector_store %arg10[%c1_171, %c1_172, %c0_173], %181 {strides = array<i32>} : memref<8x18x128xf32, #tpu.memory_space<vmem>>, vector<1x16x128xf32>,
    } else {
    }
    %c6_i32 = arith.constant 6 : i32
    %21 = arith.addi %1, %c6_i32 : i32
    %c0_i32_12 = arith.constant 0 : i32
    %22 = arith.cmpi sge, %21, %c0_i32_12 : i32
    %c16_i32_13 = arith.constant 16 : i32
    %23 = arith.cmpi slt, %21, %c16_i32_13 : i32
    %24 = arith.andi %22, %23 : i1
    %25 = arith.extui %24 : i1 to i32
    %c0_i32_14 = arith.constant 0 : i32
    %26 = arith.cmpi ne, %25, %c0_i32_14 : i32
    scf.if %26 {
      %c0_168 = arith.constant 0 : index
      %179 = arith.index_cast %21 : i32 to index
      %c0_169 = arith.constant 0 : index
      %c0_170 = arith.constant 0 : index
      %180 = vector.load %arg2[%c0_168, %179, %c0_169, %c0_170] : memref<1x16x16x128xf32, #tpu.memory_space<vmem>>, vector<1x1x16x128xf32>
      %181 = vector.shape_cast %180 : vector<1x1x16x128xf32> to vector<1x16x128xf32>
      %c6_171 = arith.constant 6 : index
      %c1_172 = arith.constant 1 : index
      %c0_173 = arith.constant 0 : index
      %182 = vector.load %arg10[%c6_171, %c1_172, %c0_173] : memref<8x18x128xf32, #tpu.memory_space<vmem>>, vector<1x16x128xf32>
      tpu.vector_store %arg10[%c6_171, %c1_172, %c0_173], %181 {strides = array<i32>} : memref<8x18x128xf32, #tpu.memory_space<vmem>>, vector<1x16x128xf32>,
    } else {
    }
    %c7_i32 = arith.constant 7 : i32
    %27 = arith.addi %1, %c7_i32 : i32
    %c0_i32_15 = arith.constant 0 : i32
    %28 = arith.cmpi sge, %27, %c0_i32_15 : i32
    %c16_i32_16 = arith.constant 16 : i32
    %29 = arith.cmpi slt, %27, %c16_i32_16 : i32
    %30 = arith.andi %28, %29 : i1
    %31 = arith.extui %30 : i1 to i32
    %c0_i32_17 = arith.constant 0 : i32
    %32 = arith.cmpi ne, %31, %c0_i32_17 : i32
    scf.if %32 {
      %c0_168 = arith.constant 0 : index
      %179 = arith.index_cast %27 : i32 to index
      %c0_169 = arith.constant 0 : index
      %c0_170 = arith.constant 0 : index
      %180 = vector.load %arg2[%c0_168, %179, %c0_169, %c0_170] : memref<1x16x16x128xf32, #tpu.memory_space<vmem>>, vector<1x1x16x128xf32>
      %181 = vector.shape_cast %180 : vector<1x1x16x128xf32> to vector<1x16x128xf32>
      %c7_171 = arith.constant 7 : index
      %c1_172 = arith.constant 1 : index
      %c0_173 = arith.constant 0 : index
      %182 = vector.load %arg10[%c7_171, %c1_172, %c0_173] : memref<8x18x128xf32, #tpu.memory_space<vmem>>, vector<1x16x128xf32>
      tpu.vector_store %arg10[%c7_171, %c1_172, %c0_173], %181 {strides = array<i32>} : memref<8x18x128xf32, #tpu.memory_space<vmem>>, vector<1x16x128xf32>,
    } else {
    }
    %cst_18 = arith.constant 0.000000e+00 : f32
    %33 = vector.broadcast %cst_18 : f32 to vector<96x128xf32>
    %c0_19 = arith.constant 0 : index
    %c0_20 = arith.constant 0 : index
    %c0_21 = arith.constant 0 : index
    %34 = vector.load %arg10[%c0_19, %c0_20, %c0_21] : memref<8x18x128xf32, #tpu.memory_space<vmem>>, vector<6x16x128xf32>
    %35 = vector.shape_cast %34 : vector<6x16x128xf32> to vector<96x128xf32>
    %c0_22 = arith.constant 0 : index
    %c0_23 = arith.constant 0 : index
    %c0_24 = arith.constant 0 : index
    %36 = vector.load %arg3[%c0_22, %c0_23, %c0_24] : memref<9x128x128xf32, #tpu.memory_space<vmem>>, vector<1x128x128xf32>
    %37 = vector.shape_cast %36 : vector<1x128x128xf32> to vector<128x128xf32>
    %cst_25 = arith.constant dense<0.000000e+00> : vector<96x128xf32>
    %38 = tpu.matmul %35, %37, %cst_25 {dimension_numbers = #tpu.dot_dimension_numbers<[1], [0], [0], [1], [0, 0, 1, 1], [], []>} : vector<96x128xf32>, vector<128x128xf32>, vector<96x128xf32> -> vector<96x128xf32>
    %39 = arith.addf %33, %38 : vector<96x128xf32>
    %c0_26 = arith.constant 0 : index
    %c1_27 = arith.constant 1 : index
    %c0_28 = arith.constant 0 : index
    %40 = vector.load %arg10[%c0_26, %c1_27, %c0_28] : memref<8x18x128xf32, #tpu.memory_space<vmem>>, vector<6x16x128xf32>
    %41 = vector.shape_cast %40 : vector<6x16x128xf32> to vector<96x128xf32>
    %c1_29 = arith.constant 1 : index
    %c0_30 = arith.constant 0 : index
    %c0_31 = arith.constant 0 : index
    %42 = vector.load %arg3[%c1_29, %c0_30, %c0_31] : memref<9x128x128xf32, #tpu.memory_space<vmem>>, vector<1x128x128xf32>
    %43 = vector.shape_cast %42 : vector<1x128x128xf32> to vector<128x128xf32>
    %cst_32 = arith.constant dense<0.000000e+00> : vector<96x128xf32>
    %44 = tpu.matmul %41, %43, %cst_32 {dimension_numbers = #tpu.dot_dimension_numbers<[1], [0], [0], [1], [0, 0, 1, 1], [], []>} : vector<96x128xf32>, vector<128x128xf32>, vector<96x128xf32> -> vector<96x128xf32>
    %45 = arith.addf %39, %44 : vector<96x128xf32>
    %c0_33 = arith.constant 0 : index
    %c2_34 = arith.constant 2 : index
    %c0_35 = arith.constant 0 : index
    %46 = vector.load %arg10[%c0_33, %c2_34, %c0_35] : memref<8x18x128xf32, #tpu.memory_space<vmem>>, vector<6x16x128xf32>
    %47 = vector.shape_cast %46 : vector<6x16x128xf32> to vector<96x128xf32>
    %c2_36 = arith.constant 2 : index
    %c0_37 = arith.constant 0 : index
    %c0_38 = arith.constant 0 : index
    %48 = vector.load %arg3[%c2_36, %c0_37, %c0_38] : memref<9x128x128xf32, #tpu.memory_space<vmem>>, vector<1x128x128xf32>
    %49 = vector.shape_cast %48 : vector<1x128x128xf32> to vector<128x128xf32>
    %cst_39 = arith.constant dense<0.000000e+00> : vector<96x128xf32>
    %50 = tpu.matmul %47, %49, %cst_39 {dimension_numbers = #tpu.dot_dimension_numbers<[1], [0], [0], [1], [0, 0, 1, 1], [], []>} : vector<96x128xf32>, vector<128x128xf32>, vector<96x128xf32> -> vector<96x128xf32>
    %51 = arith.addf %45, %50 : vector<96x128xf32>
    %c1_40 = arith.constant 1 : index
    %c0_41 = arith.constant 0 : index
    %c0_42 = arith.constant 0 : index
    %52 = vector.load %arg10[%c1_40, %c0_41, %c0_42] : memref<8x18x128xf32, #tpu.memory_space<vmem>>, vector<6x16x128xf32>
    %53 = vector.shape_cast %52 : vector<6x16x128xf32> to vector<96x128xf32>
    %c3 = arith.constant 3 : index
    %c0_43 = arith.constant 0 : index
    %c0_44 = arith.constant 0 : index
    %54 = vector.load %arg3[%c3, %c0_43, %c0_44] : memref<9x128x128xf32, #tpu.memory_space<vmem>>, vector<1x128x128xf32>
    %55 = vector.shape_cast %54 : vector<1x128x128xf32> to vector<128x128xf32>
    %cst_45 = arith.constant dense<0.000000e+00> : vector<96x128xf32>
    %56 = tpu.matmul %53, %55, %cst_45 {dimension_numbers = #tpu.dot_dimension_numbers<[1], [0], [0], [1], [0, 0, 1, 1], [], []>} : vector<96x128xf32>, vector<128x128xf32>, vector<96x128xf32> -> vector<96x128xf32>
    %57 = arith.addf %51, %56 : vector<96x128xf32>
    %c1_46 = arith.constant 1 : index
    %c1_47 = arith.constant 1 : index
    %c0_48 = arith.constant 0 : index
    %58 = vector.load %arg10[%c1_46, %c1_47, %c0_48] : memref<8x18x128xf32, #tpu.memory_space<vmem>>, vector<6x16x128xf32>
    %59 = vector.shape_cast %58 : vector<6x16x128xf32> to vector<96x128xf32>
    %c4 = arith.constant 4 : index
    %c0_49 = arith.constant 0 : index
    %c0_50 = arith.constant 0 : index
    %60 = vector.load %arg3[%c4, %c0_49, %c0_50] : memref<9x128x128xf32, #tpu.memory_space<vmem>>, vector<1x128x128xf32>
    %61 = vector.shape_cast %60 : vector<1x128x128xf32> to vector<128x128xf32>
    %cst_51 = arith.constant dense<0.000000e+00> : vector<96x128xf32>
    %62 = tpu.matmul %59, %61, %cst_51 {dimension_numbers = #tpu.dot_dimension_numbers<[1], [0], [0], [1], [0, 0, 1, 1], [], []>} : vector<96x128xf32>, vector<128x128xf32>, vector<96x128xf32> -> vector<96x128xf32>
    %63 = arith.addf %57, %62 : vector<96x128xf32>
    %c1_52 = arith.constant 1 : index
    %c2_53 = arith.constant 2 : index
    %c0_54 = arith.constant 0 : index
    %64 = vector.load %arg10[%c1_52, %c2_53, %c0_54] : memref<8x18x128xf32, #tpu.memory_space<vmem>>, vector<6x16x128xf32>
    %65 = vector.shape_cast %64 : vector<6x16x128xf32> to vector<96x128xf32>
    %c5 = arith.constant 5 : index
    %c0_55 = arith.constant 0 : index
    %c0_56 = arith.constant 0 : index
    %66 = vector.load %arg3[%c5, %c0_55, %c0_56] : memref<9x128x128xf32, #tpu.memory_space<vmem>>, vector<1x128x128xf32>
    %67 = vector.shape_cast %66 : vector<1x128x128xf32> to vector<128x128xf32>
    %cst_57 = arith.constant dense<0.000000e+00> : vector<96x128xf32>
    %68 = tpu.matmul %65, %67, %cst_57 {dimension_numbers = #tpu.dot_dimension_numbers<[1], [0], [0], [1], [0, 0, 1, 1], [], []>} : vector<96x128xf32>, vector<128x128xf32>, vector<96x128xf32> -> vector<96x128xf32>
    %69 = arith.addf %63, %68 : vector<96x128xf32>
    %c2_58 = arith.constant 2 : index
    %c0_59 = arith.constant 0 : index
    %c0_60 = arith.constant 0 : index
    %70 = vector.load %arg10[%c2_58, %c0_59, %c0_60] : memref<8x18x128xf32, #tpu.memory_space<vmem>>, vector<6x16x128xf32>
    %71 = vector.shape_cast %70 : vector<6x16x128xf32> to vector<96x128xf32>
    %c6 = arith.constant 6 : index
    %c0_61 = arith.constant 0 : index
    %c0_62 = arith.constant 0 : index
    %72 = vector.load %arg3[%c6, %c0_61, %c0_62] : memref<9x128x128xf32, #tpu.memory_space<vmem>>, vector<1x128x128xf32>
    %73 = vector.shape_cast %72 : vector<1x128x128xf32> to vector<128x128xf32>
    %cst_63 = arith.constant dense<0.000000e+00> : vector<96x128xf32>
    %74 = tpu.matmul %71, %73, %cst_63 {dimension_numbers = #tpu.dot_dimension_numbers<[1], [0], [0], [1], [0, 0, 1, 1], [], []>} : vector<96x128xf32>, vector<128x128xf32>, vector<96x128xf32> -> vector<96x128xf32>
    %75 = arith.addf %69, %74 : vector<96x128xf32>
    %c2_64 = arith.constant 2 : index
    %c1_65 = arith.constant 1 : index
    %c0_66 = arith.constant 0 : index
    %76 = vector.load %arg10[%c2_64, %c1_65, %c0_66] : memref<8x18x128xf32, #tpu.memory_space<vmem>>, vector<6x16x128xf32>
    %77 = vector.shape_cast %76 : vector<6x16x128xf32> to vector<96x128xf32>
    %c7 = arith.constant 7 : index
    %c0_67 = arith.constant 0 : index
    %c0_68 = arith.constant 0 : index
    %78 = vector.load %arg3[%c7, %c0_67, %c0_68] : memref<9x128x128xf32, #tpu.memory_space<vmem>>, vector<1x128x128xf32>
    %79 = vector.shape_cast %78 : vector<1x128x128xf32> to vector<128x128xf32>
    %cst_69 = arith.constant dense<0.000000e+00> : vector<96x128xf32>
    %80 = tpu.matmul %77, %79, %cst_69 {dimension_numbers = #tpu.dot_dimension_numbers<[1], [0], [0], [1], [0, 0, 1, 1], [], []>} : vector<96x128xf32>, vector<128x128xf32>, vector<96x128xf32> -> vector<96x128xf32>
    %81 = arith.addf %75, %80 : vector<96x128xf32>
    %c2_70 = arith.constant 2 : index
    %c2_71 = arith.constant 2 : index
    %c0_72 = arith.constant 0 : index
    %82 = vector.load %arg10[%c2_70, %c2_71, %c0_72] : memref<8x18x128xf32, #tpu.memory_space<vmem>>, vector<6x16x128xf32>
    %83 = vector.shape_cast %82 : vector<6x16x128xf32> to vector<96x128xf32>
    %c8 = arith.constant 8 : index
    %c0_73 = arith.constant 0 : index
    %c0_74 = arith.constant 0 : index
    %84 = vector.load %arg3[%c8, %c0_73, %c0_74] : memref<9x128x128xf32, #tpu.memory_space<vmem>>, vector<1x128x128xf32>
    %85 = vector.shape_cast %84 : vector<1x128x128xf32> to vector<128x128xf32>
    %cst_75 = arith.constant dense<0.000000e+00> : vector<96x128xf32>
    %86 = tpu.matmul %83, %85, %cst_75 {dimension_numbers = #tpu.dot_dimension_numbers<[1], [0], [0], [1], [0, 0, 1, 1], [], []>} : vector<96x128xf32>, vector<128x128xf32>, vector<96x128xf32> -> vector<96x128xf32>
    %87 = arith.addf %81, %86 : vector<96x128xf32>
    %c0_76 = arith.constant 0 : index
    %c0_77 = arith.constant 0 : index
    %88 = vector.load %arg5[%c0_76, %c0_77] : memref<1x128xf32, #tpu.memory_space<vmem>>, vector<1x128xf32>
    %89 = vector.broadcast %88 : vector<1x128xf32> to vector<96x128xf32>
    %90 = arith.mulf %87, %89 : vector<96x128xf32>
    %c0_78 = arith.constant 0 : index
    %c0_79 = arith.constant 0 : index
    %91 = vector.load %arg6[%c0_78, %c0_79] : memref<1x128xf32, #tpu.memory_space<vmem>>, vector<1x128xf32>
    %92 = vector.broadcast %91 : vector<1x128xf32> to vector<96x128xf32>
    %93 = arith.addf %90, %92 : vector<96x128xf32>
    %cst_80 = arith.constant 0.000000e+00 : f32
    %94 = vector.broadcast %cst_80 : f32 to vector<96x128xf32>
    %95 = arith.maximumf %93, %94 : vector<96x128xf32>
    %cst_81 = arith.constant 0.000000e+00 : f32
    %96 = vector.broadcast %cst_81 : f32 to vector<6x18x128xf32>
    %c0_82 = arith.constant 0 : index
    %c0_83 = arith.constant 0 : index
    %c0_84 = arith.constant 0 : index
    %97 = vector.load %arg11[%c0_82, %c0_83, %c0_84] : memref<6x18x128xf32, #tpu.memory_space<vmem>>, vector<6x18x128xf32>
    tpu.vector_store %arg11[%c0_82, %c0_83, %c0_84], %96 {strides = array<i32>} : memref<6x18x128xf32, #tpu.memory_space<vmem>>, vector<6x18x128xf32>,
    %98 = vector.shape_cast %95 : vector<96x128xf32> to vector<6x16x128xf32>
    %c0_85 = arith.constant 0 : index
    %c1_86 = arith.constant 1 : index
    %c0_87 = arith.constant 0 : index
    %99 = vector.load %arg11[%c0_85, %c1_86, %c0_87] : memref<6x18x128xf32, #tpu.memory_space<vmem>>, vector<6x16x128xf32>
    tpu.vector_store %arg11[%c0_85, %c1_86, %c0_87], %98 {strides = array<i32>} : memref<6x18x128xf32, #tpu.memory_space<vmem>>, vector<6x16x128xf32>,
    %c0_i32_88 = arith.constant 0 : i32
    %100 = arith.cmpi eq, %arg1, %c0_i32_88 : i32
    %101 = arith.extui %100 : i1 to i32
    %c0_i32_89 = arith.constant 0 : i32
    %102 = arith.cmpi ne, %101, %c0_i32_89 : i32
    scf.if %102 {
      %cst_168 = arith.constant 0.000000e+00 : f32
      %179 = vector.broadcast %cst_168 : f32 to vector<1x18x128xf32>
      %c0_169 = arith.constant 0 : index
      %c0_170 = arith.constant 0 : index
      %c0_171 = arith.constant 0 : index
      %180 = vector.load %arg11[%c0_169, %c0_170, %c0_171] : memref<6x18x128xf32, #tpu.memory_space<vmem>>, vector<1x18x128xf32>
      tpu.vector_store %arg11[%c0_169, %c0_170, %c0_171], %179 {strides = array<i32>} : memref<6x18x128xf32, #tpu.memory_space<vmem>>, vector<1x18x128xf32>,
    } else {
    }
    %c3_i32 = arith.constant 3 : i32
    %103 = arith.cmpi eq, %arg1, %c3_i32 : i32
    %104 = arith.extui %103 : i1 to i32
    %c0_i32_90 = arith.constant 0 : i32
    %105 = arith.cmpi ne, %104, %c0_i32_90 : i32
    scf.if %105 {
      %cst_168 = arith.constant 0.000000e+00 : f32
      %179 = vector.broadcast %cst_168 : f32 to vector<1x18x128xf32>
      %c5_169 = arith.constant 5 : index
      %c0_170 = arith.constant 0 : index
      %c0_171 = arith.constant 0 : index
      %180 = vector.load %arg11[%c5_169, %c0_170, %c0_171] : memref<6x18x128xf32, #tpu.memory_space<vmem>>, vector<1x18x128xf32>
      tpu.vector_store %arg11[%c5_169, %c0_170, %c0_171], %179 {strides = array<i32>} : memref<6x18x128xf32, #tpu.memory_space<vmem>>, vector<1x18x128xf32>,
    } else {
    }
    %cst_91 = arith.constant 0.000000e+00 : f32
    %106 = vector.broadcast %cst_91 : f32 to vector<64x128xf32>
    %c0_92 = arith.constant 0 : index
    %c0_93 = arith.constant 0 : index
    %c0_94 = arith.constant 0 : index
    %107 = vector.load %arg11[%c0_92, %c0_93, %c0_94] : memref<6x18x128xf32, #tpu.memory_space<vmem>>, vector<4x16x128xf32>
    %108 = vector.shape_cast %107 : vector<4x16x128xf32> to vector<64x128xf32>
    %c0_95 = arith.constant 0 : index
    %c0_96 = arith.constant 0 : index
    %c0_97 = arith.constant 0 : index
    %109 = vector.load %arg4[%c0_95, %c0_96, %c0_97] : memref<9x128x128xf32, #tpu.memory_space<vmem>>, vector<1x128x128xf32>
    %110 = vector.shape_cast %109 : vector<1x128x128xf32> to vector<128x128xf32>
    %cst_98 = arith.constant dense<0.000000e+00> : vector<64x128xf32>
    %111 = tpu.matmul %108, %110, %cst_98 {dimension_numbers = #tpu.dot_dimension_numbers<[1], [0], [0], [1], [0, 0, 1, 1], [], []>} : vector<64x128xf32>, vector<128x128xf32>, vector<64x128xf32> -> vector<64x128xf32>
    %112 = arith.addf %106, %111 : vector<64x128xf32>
    %c0_99 = arith.constant 0 : index
    %c1_100 = arith.constant 1 : index
    %c0_101 = arith.constant 0 : index
    %113 = vector.load %arg11[%c0_99, %c1_100, %c0_101] : memref<6x18x128xf32, #tpu.memory_space<vmem>>, vector<4x16x128xf32>
    %114 = vector.shape_cast %113 : vector<4x16x128xf32> to vector<64x128xf32>
    %c1_102 = arith.constant 1 : index
    %c0_103 = arith.constant 0 : index
    %c0_104 = arith.constant 0 : index
    %115 = vector.load %arg4[%c1_102, %c0_103, %c0_104] : memref<9x128x128xf32, #tpu.memory_space<vmem>>, vector<1x128x128xf32>
    %116 = vector.shape_cast %115 : vector<1x128x128xf32> to vector<128x128xf32>
    %cst_105 = arith.constant dense<0.000000e+00> : vector<64x128xf32>
    %117 = tpu.matmul %114, %116, %cst_105 {dimension_numbers = #tpu.dot_dimension_numbers<[1], [0], [0], [1], [0, 0, 1, 1], [], []>} : vector<64x128xf32>, vector<128x128xf32>, vector<64x128xf32> -> vector<64x128xf32>
    %118 = arith.addf %112, %117 : vector<64x128xf32>
    %c0_106 = arith.constant 0 : index
    %c2_107 = arith.constant 2 : index
    %c0_108 = arith.constant 0 : index
    %119 = vector.load %arg11[%c0_106, %c2_107, %c0_108] : memref<6x18x128xf32, #tpu.memory_space<vmem>>, vector<4x16x128xf32>
    %120 = vector.shape_cast %119 : vector<4x16x128xf32> to vector<64x128xf32>
    %c2_109 = arith.constant 2 : index
    %c0_110 = arith.constant 0 : index
    %c0_111 = arith.constant 0 : index
    %121 = vector.load %arg4[%c2_109, %c0_110, %c0_111] : memref<9x128x128xf32, #tpu.memory_space<vmem>>, vector<1x128x128xf32>
    %122 = vector.shape_cast %121 : vector<1x128x128xf32> to vector<128x128xf32>
    %cst_112 = arith.constant dense<0.000000e+00> : vector<64x128xf32>
    %123 = tpu.matmul %120, %122, %cst_112 {dimension_numbers = #tpu.dot_dimension_numbers<[1], [0], [0], [1], [0, 0, 1, 1], [], []>} : vector<64x128xf32>, vector<128x128xf32>, vector<64x128xf32> -> vector<64x128xf32>
    %124 = arith.addf %118, %123 : vector<64x128xf32>
    %c1_113 = arith.constant 1 : index
    %c0_114 = arith.constant 0 : index
    %c0_115 = arith.constant 0 : index
    %125 = vector.load %arg11[%c1_113, %c0_114, %c0_115] : memref<6x18x128xf32, #tpu.memory_space<vmem>>, vector<4x16x128xf32>
    %126 = vector.shape_cast %125 : vector<4x16x128xf32> to vector<64x128xf32>
    %c3_116 = arith.constant 3 : index
    %c0_117 = arith.constant 0 : index
    %c0_118 = arith.constant 0 : index
    %127 = vector.load %arg4[%c3_116, %c0_117, %c0_118] : memref<9x128x128xf32, #tpu.memory_space<vmem>>, vector<1x128x128xf32>
    %128 = vector.shape_cast %127 : vector<1x128x128xf32> to vector<128x128xf32>
    %cst_119 = arith.constant dense<0.000000e+00> : vector<64x128xf32>
    %129 = tpu.matmul %126, %128, %cst_119 {dimension_numbers = #tpu.dot_dimension_numbers<[1], [0], [0], [1], [0, 0, 1, 1], [], []>} : vector<64x128xf32>, vector<128x128xf32>, vector<64x128xf32> -> vector<64x128xf32>
    %130 = arith.addf %124, %129 : vector<64x128xf32>
    %c1_120 = arith.constant 1 : index
    %c1_121 = arith.constant 1 : index
    %c0_122 = arith.constant 0 : index
    %131 = vector.load %arg11[%c1_120, %c1_121, %c0_122] : memref<6x18x128xf32, #tpu.memory_space<vmem>>, vector<4x16x128xf32>
    %132 = vector.shape_cast %131 : vector<4x16x128xf32> to vector<64x128xf32>
    %c4_123 = arith.constant 4 : index
    %c0_124 = arith.constant 0 : index
    %c0_125 = arith.constant 0 : index
    %133 = vector.load %arg4[%c4_123, %c0_124, %c0_125] : memref<9x128x128xf32, #tpu.memory_space<vmem>>, vector<1x128x128xf32>
    %134 = vector.shape_cast %133 : vector<1x128x128xf32> to vector<128x128xf32>
    %cst_126 = arith.constant dense<0.000000e+00> : vector<64x128xf32>
    %135 = tpu.matmul %132, %134, %cst_126 {dimension_numbers = #tpu.dot_dimension_numbers<[1], [0], [0], [1], [0, 0, 1, 1], [], []>} : vector<64x128xf32>, vector<128x128xf32>, vector<64x128xf32> -> vector<64x128xf32>
    %136 = arith.addf %130, %135 : vector<64x128xf32>
    %c1_127 = arith.constant 1 : index
    %c2_128 = arith.constant 2 : index
    %c0_129 = arith.constant 0 : index
    %137 = vector.load %arg11[%c1_127, %c2_128, %c0_129] : memref<6x18x128xf32, #tpu.memory_space<vmem>>, vector<4x16x128xf32>
    %138 = vector.shape_cast %137 : vector<4x16x128xf32> to vector<64x128xf32>
    %c5_130 = arith.constant 5 : index
    %c0_131 = arith.constant 0 : index
    %c0_132 = arith.constant 0 : index
    %139 = vector.load %arg4[%c5_130, %c0_131, %c0_132] : memref<9x128x128xf32, #tpu.memory_space<vmem>>, vector<1x128x128xf32>
    %140 = vector.shape_cast %139 : vector<1x128x128xf32> to vector<128x128xf32>
    %cst_133 = arith.constant dense<0.000000e+00> : vector<64x128xf32>
    %141 = tpu.matmul %138, %140, %cst_133 {dimension_numbers = #tpu.dot_dimension_numbers<[1], [0], [0], [1], [0, 0, 1, 1], [], []>} : vector<64x128xf32>, vector<128x128xf32>, vector<64x128xf32> -> vector<64x128xf32>
    %142 = arith.addf %136, %141 : vector<64x128xf32>
    %c2_134 = arith.constant 2 : index
    %c0_135 = arith.constant 0 : index
    %c0_136 = arith.constant 0 : index
    %143 = vector.load %arg11[%c2_134, %c0_135, %c0_136] : memref<6x18x128xf32, #tpu.memory_space<vmem>>, vector<4x16x128xf32>
    %144 = vector.shape_cast %143 : vector<4x16x128xf32> to vector<64x128xf32>
    %c6_137 = arith.constant 6 : index
    %c0_138 = arith.constant 0 : index
    %c0_139 = arith.constant 0 : index
    %145 = vector.load %arg4[%c6_137, %c0_138, %c0_139] : memref<9x128x128xf32, #tpu.memory_space<vmem>>, vector<1x128x128xf32>
    %146 = vector.shape_cast %145 : vector<1x128x128xf32> to vector<128x128xf32>
    %cst_140 = arith.constant dense<0.000000e+00> : vector<64x128xf32>
    %147 = tpu.matmul %144, %146, %cst_140 {dimension_numbers = #tpu.dot_dimension_numbers<[1], [0], [0], [1], [0, 0, 1, 1], [], []>} : vector<64x128xf32>, vector<128x128xf32>, vector<64x128xf32> -> vector<64x128xf32>
    %148 = arith.addf %142, %147 : vector<64x128xf32>
    %c2_141 = arith.constant 2 : index
    %c1_142 = arith.constant 1 : index
    %c0_143 = arith.constant 0 : index
    %149 = vector.load %arg11[%c2_141, %c1_142, %c0_143] : memref<6x18x128xf32, #tpu.memory_space<vmem>>, vector<4x16x128xf32>
    %150 = vector.shape_cast %149 : vector<4x16x128xf32> to vector<64x128xf32>
    %c7_144 = arith.constant 7 : index
    %c0_145 = arith.constant 0 : index
    %c0_146 = arith.constant 0 : index
    %151 = vector.load %arg4[%c7_144, %c0_145, %c0_146] : memref<9x128x128xf32, #tpu.memory_space<vmem>>, vector<1x128x128xf32>
    %152 = vector.shape_cast %151 : vector<1x128x128xf32> to vector<128x128xf32>
    %cst_147 = arith.constant dense<0.000000e+00> : vector<64x128xf32>
    %153 = tpu.matmul %150, %152, %cst_147 {dimension_numbers = #tpu.dot_dimension_numbers<[1], [0], [0], [1], [0, 0, 1, 1], [], []>} : vector<64x128xf32>, vector<128x128xf32>, vector<64x128xf32> -> vector<64x128xf32>
    %154 = arith.addf %148, %153 : vector<64x128xf32>
    %c2_148 = arith.constant 2 : index
    %c2_149 = arith.constant 2 : index
    %c0_150 = arith.constant 0 : index
    %155 = vector.load %arg11[%c2_148, %c2_149, %c0_150] : memref<6x18x128xf32, #tpu.memory_space<vmem>>, vector<4x16x128xf32>
    %156 = vector.shape_cast %155 : vector<4x16x128xf32> to vector<64x128xf32>
    %c8_151 = arith.constant 8 : index
    %c0_152 = arith.constant 0 : index
    %c0_153 = arith.constant 0 : index
    %157 = vector.load %arg4[%c8_151, %c0_152, %c0_153] : memref<9x128x128xf32, #tpu.memory_space<vmem>>, vector<1x128x128xf32>
    %158 = vector.shape_cast %157 : vector<1x128x128xf32> to vector<128x128xf32>
    %cst_154 = arith.constant dense<0.000000e+00> : vector<64x128xf32>
    %159 = tpu.matmul %156, %158, %cst_154 {dimension_numbers = #tpu.dot_dimension_numbers<[1], [0], [0], [1], [0, 0, 1, 1], [], []>} : vector<64x128xf32>, vector<128x128xf32>, vector<64x128xf32> -> vector<64x128xf32>
    %160 = arith.addf %154, %159 : vector<64x128xf32>
    %c4_i32_155 = arith.constant 4 : i32
    %161 = arith.muli %arg1, %c4_i32_155 : i32
    %c0_156 = arith.constant 0 : index
    %162 = arith.index_cast %161 : i32 to index
    %c0_157 = arith.constant 0 : index
    %c0_158 = arith.constant 0 : index
    %163 = vector.load %arg2[%c0_156, %162, %c0_157, %c0_158] : memref<1x16x16x128xf32, #tpu.memory_space<vmem>>, vector<1x4x16x128xf32>
    %164 = vector.shape_cast %163 : vector<1x4x16x128xf32> to vector<4x16x128xf32>
    %165 = vector.shape_cast %164 : vector<4x16x128xf32> to vector<64x128xf32>
    %c0_159 = arith.constant 0 : index
    %c0_160 = arith.constant 0 : index
    %166 = vector.load %arg7[%c0_159, %c0_160] : memref<1x128xf32, #tpu.memory_space<vmem>>, vector<1x128xf32>
    %167 = vector.broadcast %166 : vector<1x128xf32> to vector<64x128xf32>
    %168 = arith.mulf %160, %167 : vector<64x128xf32>
    %c0_161 = arith.constant 0 : index
    %c0_162 = arith.constant 0 : index
    %169 = vector.load %arg8[%c0_161, %c0_162] : memref<1x128xf32, #tpu.memory_space<vmem>>, vector<1x128xf32>
    %170 = vector.broadcast %169 : vector<1x128xf32> to vector<64x128xf32>
    %171 = arith.addf %168, %170 : vector<64x128xf32>
    %172 = arith.addf %171, %165 : vector<64x128xf32>
    %cst_163 = arith.constant 0.000000e+00 : f32
    %173 = vector.broadcast %cst_163 : f32 to vector<64x128xf32>
    %174 = arith.maximumf %172, %173 : vector<64x128xf32>
    %175 = vector.shape_cast %174 : vector<64x128xf32> to vector<4x16x128xf32>
    %c0_164 = arith.constant 0 : index
    %c0_165 = arith.constant 0 : index
    %c0_166 = arith.constant 0 : index
    %c0_167 = arith.constant 0 : index
    %176 = vector.load %arg9[%c0_164, %c0_165, %c0_166, %c0_167] : memref<1x4x16x128xf32, #tpu.memory_space<vmem>>, vector<1x4x16x128xf32>
    %177 = vector.shape_cast %176 : vector<1x4x16x128xf32> to vector<4x16x128xf32>
    %178 = vector.shape_cast %175 : vector<4x16x128xf32> to vector<1x4x16x128xf32>
    tpu.vector_store %arg9[%c0_164, %c0_165, %c0_166, %c0_167], %178 {strides = array<i32>} : memref<1x4x16x128xf32, #tpu.memory_space<vmem>>, vector<1x4x16x128xf32>,
    return
  }
  func.func @transform_0(%arg0: i32, %arg1: i32) -> (i32, i32, i32, i32) {
    %c0_i32 = arith.constant 0 : i32
    %c0_i32_0 = arith.constant 0 : i32
    %c0_i32_1 = arith.constant 0 : i32
    %c0_i32_2 = arith.constant 0 : i32
    return %arg0, %c0_i32, %c0_i32_0, %c0_i32_1 : i32, i32, i32, i32
  }
  func.func @transform_1(%arg0: i32, %arg1: i32) -> (i32, i32, i32) {
    %c0_i32 = arith.constant 0 : i32
    %c0_i32_0 = arith.constant 0 : i32
    %c0_i32_1 = arith.constant 0 : i32
    %c0_i32_2 = arith.constant 0 : i32
    return %c0_i32, %c0_i32_0, %c0_i32_1 : i32, i32, i32
  }
  func.func @transform_2(%arg0: i32, %arg1: i32) -> (i32, i32, i32) {
    %c0_i32 = arith.constant 0 : i32
    %c0_i32_0 = arith.constant 0 : i32
    %c0_i32_1 = arith.constant 0 : i32
    %c0_i32_2 = arith.constant 0 : i32
    return %c0_i32, %c0_i32_0, %c0_i32_1 : i32, i32, i32
  }
  func.func @transform_3(%arg0: i32, %arg1: i32) -> (i32, i32) {
    %c0_i32 = arith.constant 0 : i32
    %c0_i32_0 = arith.constant 0 : i32
    %c0_i32_1 = arith.constant 0 : i32
    return %c0_i32, %c0_i32_0 : i32, i32
  }
  func.func @transform_4(%arg0: i32, %arg1: i32) -> (i32, i32) {
    %c0_i32 = arith.constant 0 : i32
    %c0_i32_0 = arith.constant 0 : i32
    %c0_i32_1 = arith.constant 0 : i32
    return %c0_i32, %c0_i32_0 : i32, i32
  }
  func.func @transform_5(%arg0: i32, %arg1: i32) -> (i32, i32) {
    %c0_i32 = arith.constant 0 : i32
    %c0_i32_0 = arith.constant 0 : i32
    %c0_i32_1 = arith.constant 0 : i32
    return %c0_i32, %c0_i32_0 : i32, i32
  }
  func.func @transform_6(%arg0: i32, %arg1: i32) -> (i32, i32) {
    %c0_i32 = arith.constant 0 : i32
    %c0_i32_0 = arith.constant 0 : i32
    %c0_i32_1 = arith.constant 0 : i32
    return %c0_i32, %c0_i32_0 : i32, i32
  }
  func.func @transform_7(%arg0: i32, %arg1: i32) -> (i32, i32, i32, i32) {
    %c0_i32 = arith.constant 0 : i32
    %c0_i32_0 = arith.constant 0 : i32
    %c0_i32_1 = arith.constant 0 : i32
    return %arg0, %arg1, %c0_i32, %c0_i32_0 : i32, i32, i32, i32
  }
}

</mosaic_0001>

<bundles_post_ra>
// kernel: tpu_custom_call.1
= control target key start
LH: loop header
LB: loop body
LE: loop exit
PB: predicated region body
PF: predicated region fallthrough
CT: control target
= control target key end

     0   :  { %s3517_s0 = inlined_call_operand.hbm [shape: f32[2,16,16,128], index: 0, kind: input, shape index: {}]   ;;  %s3518_s1 = inlined_call_operand.hbm [shape: f32[9,128,128], index: 1, kind: input, shape index: {}]   ;;  %s3519_s2 = inlined_call_operand.hbm [shape: f32[9,128,128], index: 2, kind: input, shape index: {}]   ;;  %s3520_s3 = inlined_call_operand.vmem [shape: f32[1,128], index: 3, kind: input, shape index: {}]   ;;  %s3521_s4 = inlined_call_operand.vmem [shape: f32[1,128], index: 4, kind: input, shape index: {}]   ;;  %s3522_s5 = inlined_call_operand.vmem [shape: f32[1,128], index: 5, kind: input, shape index: {}]   ;;  %s3523_s6 = inlined_call_operand.vmem [shape: f32[1,128], index: 6, kind: input, shape index: {}]   ;;  %s3524_s7 = inlined_call_operand.hbm [shape: f32[2,16,16,128], index: 7, kind: output, shape index: {}]  }
   0x1   :  { %3535 = sst [smem:[#allocation21_spill]] %s3518_s1 }
   0x2   :  { %3536 = sst [smem:[#allocation22_spill]] %s3519_s2 }
   0x3   :  { %3537 = sst [smem:[#allocation23_spill]] %s3522_s5 }
   0x4   :  { %3538 = sst [smem:[#allocation24_spill]] %s3523_s6 }
   0x5   :  { %3539 = sst [smem:[#allocation25_spill]] %s3524_s7 }
   0x6   :  { %12 = vsyncpa [#allocation5], 0 }
   0x7   :  { %14 = vsyncpa [#allocation5 + $0x1], 0 }
   0x8   :  { %15 = vsyncpa [#allocation8], 0 }
   0x9   :  { %16 = vsyncpa [#allocation6], 0 }
   0xa   :  { %18 = vsyncpa [#allocation6 + $0x1], 0  ;;  %s2715_s24 = smov 0   ;;  %s2717_s25 = smov 0  }
   0xb   :  { %s2719_s26 = smov 0   ;;  %s2721_s27 = smov 0  }
   0xc   :  { %s2723_s28 = smov 0   ;;  %s2725_s29 = smov 0  }
   0xd   :  { %s2727_s30 = smov 0   ;;  %s2729_s8 = smov 0  }
   0xe   :  { %s2731_s9 = smov 0   ;;  %s2733_s10 = smov 0  }
   0xf   :  { %s2735_s11 = smov 0  }
  0x10 LB: > { %3540 = sst [smem:[#allocation14_spill]] %s2624_s24  ;;  %s2205_s12 = sadd.s32 4294967295, %s2664_s11   ;;  %s2664_s11 = sphi %s2735_s11, %s24_s11   ;;  %s2660_s10 = sphi %s2733_s10, %s3576_s10   ;;  %s2656_s9 = sphi %s2731_s9, %s3567_s9   ;;  %s2652_s8 = sphi %s2729_s8, %s3575_s8   ;;  %s2648_s30 = sphi %s2727_s30, %s3566_s30   ;;  %s2644_s29 = sphi %s2725_s29, %s3574_s29   ;;  %s2640_s28 = sphi %s2723_s28, %s3573_s28   ;;  %s2636_s27 = sphi %s2721_s27, %s3572_s27   ;;  %s2632_s26 = sphi %s2719_s26, %s3571_s26   ;;  %s2628_s25 = sphi %s2717_s25, %s3570_s25   ;;  %s2624_s24 = sphi %s2715_s24, %s3569_s24  }
  0x11   : > { %3541 = sst [smem:[#allocation15_spill]] %s2652_s8  ;;  %s2206_s13 = sadd.s32 4294967294, %s2664_s11  }
  0x12   : > { %3542 = sst [smem:[#allocation16_spill]] %s2656_s9  ;;  %p56_p0 = scmp.ne.s32.totalorder %s2640_s28, %s2636_s27 }
  0x13   : > { %p2771_p1 = scmp.eq.s32.totalorder %s2205_s12, 0  ;;  %p207_p2 = scmp.ne.s32.totalorder %s2632_s26, %s2628_s25 }
  0x14   : > { %p208_p3 = scmp.eq.s32.totalorder %s2205_s12, 7  ;;  %p213_p5 = scmp.ne.s32.totalorder %s2628_s25, %s2624_s24 }
  0x15   : > { %p2779_p4 = por %p2771_p1, %p56_p0  ;;  %p214_p7 = scmp.eq.s32.totalorder %s2206_s13, 7 }
  0x16   : > { %p2785_p6 = por %p208_p3, %p207_p2  ;;  %p2207_p8 = scmp.ge.s32.totalorder %s2664_s11, 1 }
  0x17   : > { %p221_p9 = scmp.lt.s32.totalorder %s2664_s11, 9  ;;  %p2791_p10 = por %p214_p7, %p213_p5 }
  0x18   : > { %s3545_s16 = scalar_select %p2785_p6, 1, 0 }
  0x19   : > { %s3547_s17 = scalar_select %p2791_p10, 1, 0 }
  0x1a   : > { %3546 = sst [smem:[#allocation17_spill]] %s3545_s16  ;;  %p2795_p11 = pnand %p2207_p8, %p221_p9 }
  0x1b   : > { %3548 = sst [smem:[#allocation18_spill]] %s3547_s17  ;;  %s2666_s22 = smov [#allocation7]  }
  0x1c   : > { %s3550_s1 = sld [smem:[#allocation21_spill]]  ;;  %p2326_p12 = pneg %p2795_p11 }
  0x1d   : > { %s234_s23 = sshll.u32 %s2666_s22, 4  ;;  %s3551_s2 = sld [smem:[#allocation22_spill]]  ;;  %s235_s23 = int_to_ptr.vmem [resolvable:$true] %s234_s23 }
  0x1e   : > { %p2327_p13 = pnand %p2326_p12, %p2771_p1  ;;  %s3525_s19 = smov 128  }
  0x1f   : > { %s3526_s20 = smov 8   ;;  %s2669_s22 = smov [#allocation9]  }
  0x20   : > { %s33_s27 = sadd.s32 1, %s2656_s9  ;;  %s36_s12 = sadd.s32 1, %s2660_s10 }
  0x21   : > { %p34_p0 = scmp.ge.s32.totalorder %s33_s27, 4  ;;  %p50_p2 = scmp.ne.s32.totalorder %s2644_s29, %s2640_s28 }
  0x22   : > { %s232_s21 = sshll.u32 %s3550_s1, 4  ;;  %s248_s1 = sshll.u32 %s2669_s22, 4  ;;  %s233_s21 = int_to_ptr.hbm [resolvable:$true] %s232_s21  ;;  %s249_s1 = int_to_ptr.vmem [resolvable:$true] %s248_s1 }
  0x23   : > { %s246_s13 = sshll.u32 %s3551_s2, 4  ;;  %s3578_s27 = smov (%p34_p0, %s33_s27), 0  ;;  %s247_s13 = int_to_ptr.hbm [resolvable:$true] %s246_s13 }
  0x24   : > { %2329 = dma.hbm_to_vmem [thread:$0]  (!%p2327_p13), %s233_s21, 18432, %s235_s23, [#allocation8], %s3525_s19, %s3525_s19, %s3526_s20  }
  0x25   : > { %2332 = dma.hbm_to_vmem [thread:$0]  (!%p2327_p13), %s247_s13, 18432, %s249_s1, [#allocation8], %s3525_s19, %s3525_s19, %s3526_s20  }
  0x26   : > { %3552 = sst [smem:[#allocation19_spill]] %s3578_s27  ;;  %s3580_s12 = smov (!%p34_p0, %s36_s12), %s2660_s10 }
  0x27   : > { %s43_s21 = sadd.s32 1, %s2644_s29  ;;  %p51_p3 = scmp.eq.s32.totalorder %s2664_s11, 0 }
  0x28   : > { %p38_p5 = scmp.ge.s32.totalorder %s3580_s12, 2  ;;  %s193_s23 = ssub.s32 %s2656_s9, %s3578_s27 }
  0x29   : > { %p2826_p7 = por %p51_p3, %p50_p2  ;;  %s197_s1 = sadd.s32 1, %s2632_s26 }
  0x2a   : > { %s3582_s12 = smov (%p38_p5, %s3580_s12), 0  ;;  %p2343_p8 = scmp.lt.s32.totalorder %s2664_s11, 8 }
  0x2b   : > { %3554 = sst [smem:[#allocation20_spill]] %s3582_s12  ;;  %s274_s13 = sand.u32 1, %s2644_s29  }
  0x2c   : > { %s40_s19 = ssub.s32 %s2660_s10, %s3582_s12  ;;  %s2244_s20 = sshll.u32 %s2660_s10, 8 }
  0x2d   : > { %p41_p9 = scmp.eq.s32.totalorder %s40_s19, 0  ;;  %s194_s2 = sor.u32 %s193_s23, %s40_s19 }
  0x2e   : > { %p195_p12 = scmp.eq.s32.totalorder %s194_s2, 0  ;;  %s2211_s17 = sshll.u32 %s274_s13, 8 }
  0x2f   : > { %s2839_s24 = scalar_select %p41_p9, %s2644_s29, %s43_s21  }
  0x30   : > { %s2842_s27 = scalar_select %p195_p12, %s2632_s26, %s197_s1  }
  0x31   : > { %s283_s7 = scalar_lea.hbm %s3517_s0, %s2244_s20  ;;  %s278_s6 = scalar_lea.vmem [#allocation4], %s2211_s17 }
  0x32   : > { %s284_s8 = sshll.u32 %s283_s7, 4  ;;  %s286_s5 = sshll.u32 %s278_s6, 4  ;;  %s285_s8 = int_to_ptr.hbm [resolvable:$true] %s284_s8  ;;  %s287_s5 = int_to_ptr.vmem [resolvable:$true] %s286_s5 }
  0x33   : > { %p2334_p13 = pnand %p2343_p8, %p2826_p7  ;;  %s275_s12 = scalar_lea.sflag [#allocation5], %s274_s13 }
  0x34   : > { %s3555_s19 = smov 8   ;;  %s3556_s2 = smov 128  }
  0x35   : > { %2336 = dma.hbm_to_vmem [thread:$0]  (!%p2334_p13), %s285_s8, 4096, %s287_s5, %s275_s12, %s3556_s2, %s3556_s2, %s3555_s19  }
  0x36   : > { %298 = sbr.rel (%p2795_p11) target bundleno = 944 (0x3b0), region = 48  ;;  %s300_s9 = sand.u32 (!%p2795_p11), 1, %s2640_s28  }
  0x37   : > { %s2857_s16 = sshll.u32 (!%p2795_p11), %s300_s9, 8  ;;  %s301_s6 = scalar_lea.sflag (!%p2795_p11), [#allocation5], %s300_s9 }
  0x38   : > { %s304_s7 = scalar_lea.vmem (!%p2795_p11), [#allocation4], %s2857_s16 }
  0x3b   : > { %2611 = dma.done.wait (%p2779_p4), %s301_s6, 4096  }
  0x3c   : > { %2613 = vsyncadd (%p2779_p4), %s301_s6, 4294963200 }
  0x3d   : > { %2615 = dma.done.wait (%p2771_p1), [#allocation8], 36864  }
  0x3e   : > { %2617 = vsyncadd (%p2771_p1), [#allocation8], 4294930432  ;;  %s343_s5 = sand.u32 1, %s2628_s25   ;;  %s2870_s8 = sshll.u32 %s2648_s30, 2  ;;  %v2670_v0 = vmov 0.0  }
  0x3f   : > { %355 = vst [vmem:[#allocation2 + $0x30] sm:$0xff] %v2670_v0  ;;  %s2875_s17 = sshll.u32 %s343_s5, 6  ;;  %s2878_s15 = sadd.s32 4294967294, %s2870_s8 }
  0x40   : > { %349 = vst [vmem:[#allocation2] sm:$0xff] %v2670_v0  ;;  %p392_p1 = scmp.ge.s32.totalorder %s2878_s15, 0  ;;  %p393_p4 = scmp.lt.s32.totalorder %s2878_s15, 16 }
  0x41   : > { %350 = vst [vmem:[#allocation2 + $0x8] sm:$0xff] %v2670_v0  ;;  %s2245_s18 = sshll.u32 %s2648_s30, 6  ;;  %s2923_s12 = scalar_lea.vmem [#allocation10], %s2875_s17 }
  0x42   : > { %351 = vst [vmem:[#allocation2 + $0x10] sm:$0x3] %v2670_v0  ;;  %p2886_p11 = pnand %p393_p4, %p392_p1  ;;  %s2907_s20 = scalar_lea.vmem %s304_s7, %s2245_s18 [#allocation4] }
  0x43   : > { %352 = vst [vmem:[#allocation2 + $0x18] sm:$0xff] %v2670_v0  ;;  %v375_v1 = vld [vmem:[%s2907_s20] sm:$0xff]  ;;  %v376_v2 = vld [vmem:[%s2907_s20 + $0x8] sm:$0xff]  ;;  %v377_v3 = vld [vmem:[%s2907_s20 + $0x10] sm:$0xff]  ;;  %s2222_s21 = sshll.u32 (!%p2886_p11), %s2878_s15, 4 }
  0x44   : > { %353 = vst [vmem:[#allocation2 + $0x20] sm:$0xff] %v2670_v0  ;;  %v378_v4 = vld [vmem:[%s2907_s20 + $0x18] sm:$0xff]  ;;  %v379_v5 = vld [vmem:[%s2907_s20 + $0x20] sm:$0xff]  ;;  %v380_v6 = vld [vmem:[%s2907_s20 + $0x28] sm:$0xff]  ;;  %s399_s23 = scalar_lea.vmem (!%p2886_p11), %s304_s7, %s2222_s21 [#allocation4] }
  0x45   : > { %354 = vst [vmem:[#allocation2 + $0x28] sm:$0x3] %v2670_v0  ;;  %v381_v7 = vld [vmem:[%s2907_s20 + $0x30] sm:$0xff]  ;;  %v382_v8 = vld [vmem:[%s2907_s20 + $0x38] sm:$0xff] }
  0x46   : > { %356 = vst [vmem:[#allocation2 + $0x38] sm:$0xff] %v2670_v0 }
  0x47   : > { %357 = vst [vmem:[#allocation2 + $0x40] sm:$0x3] %v2670_v0 }
  0x48   : > { %358 = vst [vmem:[#allocation2 + $0x48] sm:$0xff] %v2670_v0 }
  0x49   : > { %359 = vst [vmem:[#allocation2 + $0x50] sm:$0xff] %v2670_v0 }
  0x4a   : > { %360 = vst [vmem:[#allocation2 + $0x58] sm:$0x3] %v2670_v0 }
  0x4b   : > { %361 = vst [vmem:[#allocation2 + $0x60] sm:$0xff] %v2670_v0 }
  0x4c   : > { %362 = vst [vmem:[#allocation2 + $0x68] sm:$0xff] %v2670_v0 }
  0x4d   : > { %363 = vst [vmem:[#allocation2 + $0x70] sm:$0x3] %v2670_v0 }
  0x4e   : > { %364 = vst [vmem:[#allocation2 + $0x78] sm:$0xff] %v2670_v0 }
  0x4f   : > { %365 = vst [vmem:[#allocation2 + $0x80] sm:$0xff] %v2670_v0 }
  0x50   : > { %366 = vst [vmem:[#allocation2 + $0x88] sm:$0x3] %v2670_v0 }
  0x51   : > { %367 = vst [vmem:[#allocation2 + $0x90] sm:$0xff] %v2670_v0 }
  0x52   : > { %368 = vst [vmem:[#allocation2 + $0x98] sm:$0xff] %v2670_v0 }
  0x53   : > { %369 = vst [vmem:[#allocation2 + $0xa0] sm:$0x3] %v2670_v0 }
  0x54   : > { %370 = vst [vmem:[#allocation2 + $0xa8] sm:$0xff] %v2670_v0 }
  0x55   : > { %371 = vst [vmem:[#allocation2 + $0xb0] sm:$0xff] %v2670_v0 }
  0x56   : > { %372 = vst [vmem:[#allocation2 + $0xb8] sm:$0x3] %v2670_v0 }
  0x57   : > { %384 = vst [vmem:[#allocation2 + $0x31] sm:$0xff] %v375_v1 }
  0x58   : > { %385 = vst [vmem:[#allocation2 + $0x39] sm:$0xff] %v376_v2 }
  0x59   : > { %386 = vst [vmem:[#allocation2 + $0x49] sm:$0xff] %v377_v3 }
  0x5a   : > { %387 = vst [vmem:[#allocation2 + $0x51] sm:$0xff] %v378_v4  ;;  %397 = sbr.rel (%p2886_p11) target bundleno = 98 (0x62), region = 64 }
  0x5b   : > { %388 = vst [vmem:[#allocation2 + $0x61] sm:$0xff] %v379_v5 }
  0x5c   : > { %389 = vst [vmem:[#allocation2 + $0x69] sm:$0xff] %v380_v6 }
  0x5d   : > { %390 = vst [vmem:[#allocation2 + $0x79] sm:$0xff] %v381_v7 }
  0x5e   : > { %391 = vst [vmem:[#allocation2 + $0x81] sm:$0xff] %v382_v8 }
  0x5f   : > { %v400_v9 = vld [vmem:[%s399_s23] sm:$0xff]  ;;  %v401_v10 = vld [vmem:[%s399_s23 + $0x8] sm:$0xff] }
  0x60   : > { %402 = vst [vmem:[#allocation2 + $0x1] sm:$0xff] %v400_v9 }
  0x61   : > { %403 = vst [vmem:[#allocation2 + $0x9] sm:$0xff] %v401_v10 }
  0x62 PF: > { %s404_s22 = sadd.s32 4294967295, %s2870_s8 }
  0x63   : > { %p405_p0 = scmp.ge.s32.totalorder %s404_s22, 0  ;;  %p406_p2 = scmp.lt.s32.totalorder %s404_s22, 16 }
  0x65   : > { %p407_p3 = pnand %p406_p2, %p405_p0 }
  0x67   : > { %410 = sbr.rel (%p407_p3) target bundleno = 111 (0x6f), region = 68 }
  0x6c   : > { %v2225_v11 = vld [vmem:[%s2907_s20 - $0x10] sm:$0xff]  ;;  %v2226_v12 = vld [vmem:[%s2907_s20 - $0x8] sm:$0xff] }
  0x6d   : > { %416 = vst [vmem:[#allocation2 + $0x19] sm:$0xff] %v2225_v11 }
  0x6e   : > { %417 = vst [vmem:[#allocation2 + $0x21] sm:$0xff] %v2226_v12 }
  0x6f PF: > { %s418_s1 = sadd.s32 4, %s2870_s8 }
  0x70   : > { %p419_p5 = scmp.ge.s32.totalorder %s418_s1, 0  ;;  %p420_p7 = scmp.lt.s32.totalorder %s418_s1, 16 }
  0x72   : > { %p421_p8 = pnand %p420_p7, %p419_p5 }
  0x74   : > { %424 = sbr.rel (%p421_p8) target bundleno = 124 (0x7c), region = 72 }
  0x79   : > { %v2229_v13 = vld [vmem:[%s2907_s20 + $0x40] sm:$0xff]  ;;  %v2230_v14 = vld [vmem:[%s2907_s20 + $0x48] sm:$0xff] }
  0x7a   : > { %430 = vst [vmem:[#allocation2 + $0x91] sm:$0xff] %v2229_v13 }
  0x7b   : > { %431 = vst [vmem:[#allocation2 + $0x99] sm:$0xff] %v2230_v14 }
  0x7c PF: > { %s432_s13 = sadd.s32 5, %s2870_s8 }
  0x7d   : > { %p433_p9 = scmp.ge.s32.totalorder %s432_s13, 0  ;;  %p434_p12 = scmp.lt.s32.totalorder %s432_s13, 16 }
  0x7f   : > { %p435_p13 = pnand %p434_p12, %p433_p9 }
  0x81   : > { %438 = sbr.rel (%p435_p13) target bundleno = 137 (0x89), region = 76 }
  0x86   : > { %v2233_v15 = vld [vmem:[%s2907_s20 + $0x50] sm:$0xff]  ;;  %v2234_v16 = vld [vmem:[%s2907_s20 + $0x58] sm:$0xff] }
  0x87   : > { %444 = vst [vmem:[#allocation2 + $0xa9] sm:$0xff] %v2233_v15 }
  0x88   : > { %445 = vst [vmem:[#allocation2 + $0xb1] sm:$0xff] %v2234_v16 }
  0x89 PF: > { %v502_v17 = vld [vmem:[#allocation7 + $0xf8] sm:$0xff]  ;;  %1312 = vst [vmem:[#allocation3] sm:$0xff] %v2670_v0  ;;  %v501_v20 = vld [vmem:[#allocation7 + $0xf0] sm:$0xff]  ;;  %v500_v24 = vld [vmem:[#allocation7 + $0xe8] sm:$0xff]  ;;  %p2235_p1 = scmp.ne.s32.totalorder %s2648_s30, 0 }
  0x8a   : > { %v473_v18 = vld [vmem:[#allocation7 + $0x78] sm:$0xff]  ;;  %503 = vmatpush.msra.mxu0 %v502_v17  ;;  %v472_v21 = vld [vmem:[#allocation7 + $0x70] sm:$0xff]  ;;  %1313 = vst [vmem:[#allocation3 + $0x8] sm:$0xff] %v2670_v0  ;;  %v471_v25 = vld [vmem:[#allocation7 + $0x68] sm:$0xff] }
  0x8b   : > { %v637_v19 = vld [vmem:[#allocation7 + $0x178] sm:$0xff]  ;;  %556 = vmatpush.msra.mxu1 %v473_v18  ;;  %v636_v22 = vld [vmem:[#allocation7 + $0x170] sm:$0xff]  ;;  %1314 = vst [vmem:[#allocation3 + $0x10] sm:$0x3] %v2670_v0  ;;  %v635_v26 = vld [vmem:[#allocation7 + $0x168] sm:$0xff] }
  0x8c   : > { %638 = vmatpush.msra.mxu2 %v637_v19  ;;  %v732_v23 = vld [vmem:[#allocation7 + $0x1f8] sm:$0xff]  ;;  %504 = vmatpush.msra.mxu0 %v501_v20  ;;  %v731_v27 = vld [vmem:[#allocation7 + $0x1f0] sm:$0xff]  ;;  %1315 = vst [vmem:[#allocation3 + $0x18] sm:$0xff] %v2670_v0  ;;  %v499_v28 = vld [vmem:[#allocation7 + $0xe0] sm:$0xff] }
  0x8d   : > { %557 = vmatpush.msra.mxu1 %v472_v21  ;;  %733 = vmatpush.msra.mxu3 %v732_v23  ;;  %v470_v29 = vld [vmem:[#allocation7 + $0x60] sm:$0xff]  ;;  %1316 = vst [vmem:[#allocation3 + $0x20] sm:$0xff] %v2670_v0  ;;  %v730_v31 = vld [vmem:[#allocation7 + $0x1e8] sm:$0xff]  ;;  %v498_v32 = vld [vmem:[#allocation7 + $0xd8] sm:$0xff] }
  0x8e   : > { %639 = vmatpush.msra.mxu2 %v636_v22  ;;  %505 = vmatpush.msra.mxu0 %v500_v24  ;;  %v634_v30 = vld [vmem:[#allocation7 + $0x160] sm:$0xff]  ;;  %1317 = vst [vmem:[#allocation3 + $0x28] sm:$0x3] %v2670_v0  ;;  %v469_v33 = vld [vmem:[#allocation7 + $0x58] sm:$0xff]  ;;  %v497_v36 = vld [vmem:[#allocation7 + $0xd0] sm:$0xff] }
  0x8f   : > { %558 = vmatpush.msra.mxu1 %v471_v25  ;;  %734 = vmatpush.msra.mxu3 %v731_v27  ;;  %1318 = vst [vmem:[#allocation3 + $0x30] sm:$0xff] %v2670_v0  ;;  %v633_v34 = vld [vmem:[#allocation7 + $0x158] sm:$0xff]  ;;  %v729_v35 = vld [vmem:[#allocation7 + $0x1e0] sm:$0xff]  ;;  %v468_v37 = vld [vmem:[#allocation7 + $0x50] sm:$0xff] }
  0x90   : > { %640 = vmatpush.msra.mxu2 %v635_v26  ;;  %506 = vmatpush.msra.mxu0 %v499_v28  ;;  %1319 = vst [vmem:[#allocation3 + $0x38] sm:$0xff] %v2670_v0  ;;  %v632_v38 = vld [vmem:[#allocation7 + $0x150] sm:$0xff]  ;;  %v728_v39 = vld [vmem:[#allocation7 + $0x1d8] sm:$0xff]  ;;  %v496_v40 = vld [vmem:[#allocation7 + $0xc8] sm:$0xff] }
  0x91   : > { %559 = vmatpush.msra.mxu1 %v470_v29  ;;  %735 = vmatpush.msra.mxu3 %v730_v31  ;;  %1320 = vst [vmem:[#allocation3 + $0x40] sm:$0x3] %v2670_v0  ;;  %v467_v41 = vld [vmem:[#allocation7 + $0x48] sm:$0xff]  ;;  %v727_v43 = vld [vmem:[#allocation7 + $0x1d0] sm:$0xff]  ;;  %v495_v44 = vld [vmem:[#allocation7 + $0xc0] sm:$0xff] }
  0x92   : > { %641 = vmatpush.msra.mxu2 %v634_v30  ;;  %507 = vmatpush.msra.mxu0 %v498_v32  ;;  %1321 = vst [vmem:[#allocation3 + $0x48] sm:$0xff] %v2670_v0  ;;  %v631_v42 = vld [vmem:[#allocation7 + $0x148] sm:$0xff]  ;;  %v466_v45 = vld [vmem:[#allocation7 + $0x40] sm:$0xff]  ;;  %v494_v48 = vld [vmem:[#allocation7 + $0xb8] sm:$0xff] }
  0x93   : > { %560 = vmatpush.msra.mxu1 %v469_v33  ;;  %736 = vmatpush.msra.mxu3 %v729_v35  ;;  %1322 = vst [vmem:[#allocation3 + $0x50] sm:$0xff] %v2670_v0  ;;  %v630_v46 = vld [vmem:[#allocation7 + $0x140] sm:$0xff]  ;;  %v726_v47 = vld [vmem:[#allocation7 + $0x1c8] sm:$0xff]  ;;  %v465_v49 = vld [vmem:[#allocation7 + $0x38] sm:$0xff] }
  0x94   : > { %642 = vmatpush.msra.mxu2 %v633_v34  ;;  %508 = vmatpush.msra.mxu0 %v497_v36  ;;  %1323 = vst [vmem:[#allocation3 + $0x58] sm:$0x3] %v2670_v0  ;;  %v629_v50 = vld [vmem:[#allocation7 + $0x138] sm:$0xff]  ;;  %v725_v51 = vld [vmem:[#allocation7 + $0x1c0] sm:$0xff]  ;;  %v493_v52 = vld [vmem:[#allocation7 + $0xb0] sm:$0xff] }
  0x95   : > { %561 = vmatpush.msra.mxu1 %v468_v37  ;;  %737 = vmatpush.msra.mxu3 %v728_v39  ;;  %1324 = vst [vmem:[#allocation3 + $0x60] sm:$0xff] %v2670_v0  ;;  %v464_v53 = vld [vmem:[#allocation7 + $0x30] sm:$0xff]  ;;  %v724_v55 = vld [vmem:[#allocation7 + $0x1b8] sm:$0xff]  ;;  %v492_v56 = vld [vmem:[#allocation7 + $0xa8] sm:$0xff] }
  0x96   : > { %643 = vmatpush.msra.mxu2 %v632_v38  ;;  %509 = vmatpush.msra.mxu0 %v496_v40  ;;  %1325 = vst [vmem:[#allocation3 + $0x68] sm:$0xff] %v2670_v0  ;;  %v628_v54 = vld [vmem:[#allocation7 + $0x130] sm:$0xff]  ;;  %v463_v57 = vld [vmem:[#allocation7 + $0x28] sm:$0xff]  ;;  %v491_v60 = vld [vmem:[#allocation7 + $0xa0] sm:$0xff] }
  0x97   : > { %562 = vmatpush.msra.mxu1 %v467_v41  ;;  %738 = vmatpush.msra.mxu3 %v727_v43  ;;  %1326 = vst [vmem:[#allocation3 + $0x70] sm:$0x3] %v2670_v0  ;;  %v627_v58 = vld [vmem:[#allocation7 + $0x128] sm:$0xff]  ;;  %v723_v59 = vld [vmem:[#allocation7 + $0x1b0] sm:$0xff]  ;;  %v462_v61 = vld [vmem:[#allocation7 + $0x20] sm:$0xff] }
  0x98   : > { %644 = vmatpush.msra.mxu2 %v631_v42  ;;  %510 = vmatpush.msra.mxu0 %v495_v44  ;;  %1327 = vst [vmem:[#allocation3 + $0x78] sm:$0xff] %v2670_v0  ;;  %v626_v62 = vld [vmem:[#allocation7 + $0x120] sm:$0xff]  ;;  %v722_v63 = vld [vmem:[#allocation7 + $0x1a8] sm:$0xff]  ;;  %v490_v1 = vld [vmem:[#allocation7 + $0x98] sm:$0xff] }
  0x99   : > { %563 = vmatpush.msra.mxu1 %v466_v45  ;;  %739 = vmatpush.msra.mxu3 %v726_v47  ;;  %1328 = vst [vmem:[#allocation3 + $0x80] sm:$0xff] %v2670_v0  ;;  %v625_v2 = vld [vmem:[#allocation7 + $0x118] sm:$0xff]  ;;  %v721_v3 = vld [vmem:[#allocation7 + $0x1a0] sm:$0xff]  ;;  %v489_v4 = vld [vmem:[#allocation7 + $0x90] sm:$0xff] }
  0x9a   : > { %645 = vmatpush.msra.mxu2 %v630_v46  ;;  %511 = vmatpush.msra.mxu0 %v494_v48  ;;  %1329 = vst [vmem:[#allocation3 + $0x88] sm:$0x3] %v2670_v0  ;;  %v461_v0 = vld [vmem:[#allocation7 + $0x18] sm:$0xff]  ;;  %v460_v5 = vld [vmem:[#allocation7 + $0x10] sm:$0xff]  ;;  %v488_v8 = vld [vmem:[#allocation7 + $0x88] sm:$0xff] }
  0x9b   : > { %564 = vmatpush.msra.mxu1 %v465_v49  ;;  %740 = vmatpush.msra.mxu3 %v725_v51  ;;  %v624_v6 = vld [vmem:[#allocation7 + $0x110] sm:$0xff]  ;;  %v720_v7 = vld [vmem:[#allocation7 + $0x198] sm:$0xff]  ;;  %v459_v9 = vld [vmem:[#allocation7 + $0x8] sm:$0xff] }
  0x9c   : > { %646 = vmatpush.msra.mxu2 %v629_v50  ;;  %512 = vmatpush.msra.mxu0 %v493_v52  ;;  %v623_v10 = vld [vmem:[#allocation7 + $0x108] sm:$0xff]  ;;  %v719_v11 = vld [vmem:[#allocation7 + $0x190] sm:$0xff]  ;;  %v487_v12 = vld [vmem:[#allocation7 + $0x80] sm:$0xff] }
  0x9d   : > { %565 = vmatpush.msra.mxu1 %v464_v53  ;;  %741 = vmatpush.msra.mxu3 %v724_v55  ;;  %v458_v13 = vld [vmem:[#allocation7] sm:$0xff]  ;;  %v718_v15 = vld [vmem:[#allocation7 + $0x188] sm:$0xff]  ;;  %v474_v16 = vld [vmem:[#allocation2 + $0x1] sm:$0xff] }
  0x9e   : > { %647 = vmatpush.msra.mxu2 %v628_v54  ;;  %513 = vmatpush.msra.mxu0 %v492_v56  ;;  %v622_v14 = vld [vmem:[#allocation7 + $0x100] sm:$0xff]  ;;  %v446_v17 = vld [vmem:[#allocation2] sm:$0xff]  ;;  %v826_v19 = vld [vmem:[#allocation7 + $0x278] sm:$0xff] }
  0x9f   : > { %566 = vmatpush.msra.mxu1 %v463_v57  ;;  %742 = vmatpush.msra.mxu3 %v723_v59  ;;  %v609_v18 = vld [vmem:[#allocation2 + $0x2] sm:$0xff]  ;;  %v717_v20 = vld [vmem:[#allocation7 + $0x180] sm:$0xff]  ;;  %v704_v21 = vld [vmem:[#allocation2 + $0x18] sm:$0xff] }
  0xa0   : > { %648 = vmatpush.msra.mxu2 %v627_v58  ;;  %514 = vmatpush.msra.mxu0 %v491_v60  ;;  %v825_v22 = vld [vmem:[#allocation7 + $0x270] sm:$0xff]  ;;  %v824_v23 = vld [vmem:[#allocation7 + $0x268] sm:$0xff]  ;;  %v823_v24 = vld [vmem:[#allocation7 + $0x260] sm:$0xff] }
  0xa1   : > { %567 = vmatpush.msra.mxu1 %v462_v61  ;;  %743 = vmatpush.msra.mxu3 %v722_v63  ;;  %v475_v25 = vld [vmem:[#allocation2 + $0x9] sm:$0xff]  ;;  %v705_v29 = vld [vmem:[#allocation2 + $0x20] sm:$0xff]  ;;  %v820_v31 = vld [vmem:[#allocation7 + $0x248] sm:$0xff] }
  0xa2   : > { %649 = vmatpush.msra.mxu2 %v626_v62  ;;  %515 = vmatpush.msra.mxu0 %v490_v1  ;;  %v447_v26 = vld [vmem:[#allocation2 + $0x8] sm:$0xff]  ;;  %v821_v30 = vld [vmem:[#allocation7 + $0x250] sm:$0xff]  ;;  %v819_v32 = vld [vmem:[#allocation7 + $0x240] sm:$0xff] }
  0xa3   : > { %568 = vmatpush.msra.mxu1 %v461_v0  ;;  %744 = vmatpush.msra.mxu3 %v721_v3  ;;  %v610_v27 = vld [vmem:[#allocation2 + $0xa] sm:$0xff]  ;;  %v2957_v33 = vld [vmem:[#allocation2 + $0x19] sm:$0xff]  ;;  %v2966_v38 = vld [vmem:[#allocation2 + $0x21] sm:$0xff] }
  0xa4   : > { %650 = vmatpush.msra.mxu2 %v625_v2  ;;  %516 = vmatpush.msra.mxu0 %v489_v4  ;;  %v822_v28 = vld [vmem:[#allocation7 + $0x258] sm:$0xff]  ;;  %v2959_v34 = vld [vmem:[#allocation2 + $0x1a] sm:$0xff]  ;;  %v2962_v35 = vld [vmem:[#allocation2 + $0x30] sm:$0xff] }
  0xa5   : > { %569 = vmatpush.msra.mxu1 %v460_v5  ;;  %745 = vmatpush.msra.mxu3 %v720_v7  ;;  %v818_v36 = vld [vmem:[#allocation7 + $0x238] sm:$0xff]  ;;  %v817_v37 = vld [vmem:[#allocation7 + $0x230] sm:$0xff]  ;;  %v2971_v40 = vld [vmem:[#allocation2 + $0x38] sm:$0xff] }
  0xa6   : > { %651 = vmatpush.msra.mxu2 %v624_v6  ;;  %517 = vmatpush.msra.mxu0 %v488_v8  ;;  %v2968_v39 = vld [vmem:[#allocation2 + $0x22] sm:$0xff]  ;;  %v816_v41 = vld [vmem:[#allocation7 + $0x228] sm:$0xff]  ;;  %v815_v46 = vld [vmem:[#allocation7 + $0x220] sm:$0xff] }
  0xa7   : > { %570 = vmatpush.msra.mxu1 %v459_v9  ;;  %746 = vmatpush.msra.mxu3 %v719_v11  ;;  %v2975_v42 = vld [vmem:[#allocation2 + $0x31] sm:$0xff]  ;;  %v2981_v44 = vld [vmem:[#allocation2 + $0x48] sm:$0xff]  ;;  %v1013_v48 = vld [vmem:[#allocation7 + $0x370] sm:$0xff] }
  0xa8   : > { %652 = vmatpush.msra.mxu2 %v623_v10  ;;  %518 = vmatpush.msra.mxu0 %v487_v12  ;;  %v2977_v43 = vld [vmem:[#allocation2 + $0x32] sm:$0xff]  ;;  %v1014_v45 = vld [vmem:[#allocation7 + $0x378] sm:$0xff]  ;;  %v919_v50 = vld [vmem:[#allocation7 + $0x2f0] sm:$0xff] }
  0xa9   : > { %571 = vmatpush.msra.mxu1 %v458_v13  ;;  %747 = vmatpush.msra.mxu3 %v718_v15  ;;  %v920_v47 = vld [vmem:[#allocation7 + $0x2f8] sm:$0xff]  ;;  %v1012_v51 = vld [vmem:[#allocation7 + $0x368] sm:$0xff]  ;;  %v1107_v53 = vld [vmem:[#allocation7 + $0x3f0] sm:$0xff] }
  0xaa   : > { %653 = vmatpush.msra.mxu2 %v622_v14  ;;  %519 = vmatmul.f32.vlgmr.msra.gmra.mxu0 %v474_v16  ;;  %v1108_v49 = vld [vmem:[#allocation7 + $0x3f8] sm:$0xff]  ;;  %v2985_v52 = vld [vmem:[#allocation2 + $0x39] sm:$0xff]  ;;  %v1011_v56 = vld [vmem:[#allocation7 + $0x360] sm:$0xff] }
  0xab   : > { %572 = vmatmul.f32.vlgmr.msra.gmra.mxu1 %v446_v17  ;;  %654 = vmatmul.f32.vlgmr.msra.gmra.mxu2 %v609_v18  ;;  %v2987_v54 = vld [vmem:[#allocation2 + $0x3a] sm:$0xff]  ;;  %v2991_v58 = vld [vmem:[#allocation2 + $0x50] sm:$0xff]  ;;  %v814_v59 = vld [vmem:[#allocation7 + $0x218] sm:$0xff] }
  0xac   : > { %827 = vmatpush.msrb.mxu0 %v826_v19  ;;  %748 = vmatpush.msra.mxu3 %v717_v20  ;;  %v918_v55 = vld [vmem:[#allocation7 + $0x2e8] sm:$0xff]  ;;  %v917_v60 = vld [vmem:[#allocation7 + $0x2e0] sm:$0xff]  ;;  %v1010_v61 = vld [vmem:[#allocation7 + $0x358] sm:$0xff] }
  0xad   : > { %749 = vmatmul.f32.vlgmr.msra.gmra.mxu3 %v704_v21  ;;  %1015 = vmatpush.msrb.mxu2 %v1014_v45  ;;  %v1106_v57 = vld [vmem:[#allocation7 + $0x3e8] sm:$0xff]  ;;  %v1105_v62 = vld [vmem:[#allocation7 + $0x3e0] sm:$0xff]  ;;  %v916_v63 = vld [vmem:[#allocation7 + $0x2d8] sm:$0xff] }
  0xae   : > { %828 = vmatpush.msrb.mxu0 %v825_v22  ;;  %921 = vmatpush.msrb.mxu1 %v920_v47  ;;  %v1009_v1 = vld [vmem:[#allocation7 + $0x350] sm:$0xff]  ;;  %v1104_v0 = vld [vmem:[#allocation7 + $0x3d8] sm:$0xff]  ;;  %v1008_v6 = vld [vmem:[#allocation7 + $0x348] sm:$0xff] }
  0xaf   : > { %1016 = vmatpush.msrb.mxu2 %v1013_v48  ;;  %1109 = vmatpush.msrb.mxu3 %v1108_v49  ;;  %v2995_v2 = vld [vmem:[#allocation2 + $0x49] sm:$0xff]  ;;  %v813_v3 = vld [vmem:[#allocation7 + $0x210] sm:$0xff]  ;;  %v914_v9 = vld [vmem:[#allocation7 + $0x2c8] sm:$0xff] }
  0xb0   : > { %829 = vmatpush.msrb.mxu0 %v824_v23  ;;  %922 = vmatpush.msrb.mxu1 %v919_v50  ;;  %v2997_v4 = vld [vmem:[#allocation2 + $0x4a] sm:$0xff]  ;;  %v915_v5 = vld [vmem:[#allocation7 + $0x2d0] sm:$0xff]  ;;  %v1102_v11 = vld [vmem:[#allocation7 + $0x3c8] sm:$0xff] }
  0xb1   : > { %1017 = vmatpush.msrb.mxu2 %v1012_v51  ;;  %1110 = vmatpush.msrb.mxu3 %v1107_v53  ;;  %v1103_v7 = vld [vmem:[#allocation7 + $0x3d0] sm:$0xff]  ;;  %v1007_v10 = vld [vmem:[#allocation7 + $0x340] sm:$0xff]  ;;  %v1006_v13 = vld [vmem:[#allocation7 + $0x338] sm:$0xff] }
  0xb2   : > { %830 = vmatpush.msrb.mxu0 %v823_v24  ;;  %923 = vmatpush.msrb.mxu1 %v918_v55  ;;  %v3001_v8 = vld [vmem:[#allocation2 + $0x60] sm:$0xff]  ;;  %v913_v12 = vld [vmem:[#allocation7 + $0x2c0] sm:$0xff]  ;;  %v912_v15 = vld [vmem:[#allocation7 + $0x2b8] sm:$0xff] }
  0xb3   : > { %522 = vmatmul.f32.gmra.mxu0 %v475_v25  ;;  %575 = vmatmul.f32.gmra.mxu1 %v447_v26  ;;  %v1101_v14 = vld [vmem:[#allocation7 + $0x3c0] sm:$0xff]  ;;  %v812_v16 = vld [vmem:[#allocation7 + $0x208] sm:$0xff]  ;;  %v1100_v19 = vld [vmem:[#allocation7 + $0x3b8] sm:$0xff] }
  0xb4   : > { %657 = vmatmul.f32.gmra.mxu2 %v610_v27  ;;  %831 = vmatpush.msrb.mxu0 %v822_v28  ;;  %v3005_v17 = vld [vmem:[#allocation2 + $0x51] sm:$0xff]  ;;  %v1005_v20 = vld [vmem:[#allocation7 + $0x330] sm:$0xff]  ;;  %v3011_v22 = vld [vmem:[#allocation2 + $0x68] sm:$0xff] }
  0xb5   : > { %752 = vmatmul.f32.gmra.mxu3 %v705_v29  ;;  %1018 = vmatpush.msrb.mxu2 %v1011_v56  ;;  %v3007_v18 = vld [vmem:[#allocation2 + $0x52] sm:$0xff]  ;;  %v1099_v24 = vld [vmem:[#allocation7 + $0x3b0] sm:$0xff]  ;;  %v1202_v47 = vld [vmem:[#allocation7 + $0x478] sm:$0xff] }
  0xb6   : > { %832 = vmatpush.msrb.mxu0 %v821_v30  ;;  %1111 = vmatpush.msrb.mxu3 %v1106_v57  ;;  %v1004_v23 = vld [vmem:[#allocation7 + $0x328] sm:$0xff]  ;;  %v1003_v26 = vld [vmem:[#allocation7 + $0x320] sm:$0xff]  ;;  %v3015_v30 = vld [vmem:[#allocation2 + $0x61] sm:$0xff] }
  0xb7   : > { %924 = vmatpush.msrb.mxu1 %v917_v60  ;;  %1019 = vmatpush.msrb.mxu2 %v1010_v61  ;;  %v910_v25 = vld [vmem:[#allocation7 + $0x2a8] sm:$0xff]  ;;  %v811_v28 = vld [vmem:[#allocation7 + $0x200] sm:$0xff]  ;;  %v1001_v45 = vld [vmem:[#allocation7 + $0x310] sm:$0xff] }
  0xb8   : > { %833 = vmatpush.msrb.mxu0 %v820_v31  ;;  %1112 = vmatpush.msrb.mxu3 %v1105_v62  ;;  %v1098_v27 = vld [vmem:[#allocation7 + $0x3a8] sm:$0xff]  ;;  %v3017_v31 = vld [vmem:[#allocation2 + $0x62] sm:$0xff]  ;;  %v3027_v56 = vld [vmem:[#allocation2 + $0x6a] sm:$0xff] }
  0xb9   : > { %925 = vmatpush.msrb.mxu1 %v916_v63  ;;  %1020 = vmatpush.msrb.mxu2 %v1009_v1  ;;  %v907_v48 = vld [vmem:[#allocation7 + $0x290] sm:$0xff]  ;;  %v1000_v49 = vld [vmem:[#allocation7 + $0x308] sm:$0xff]  ;;  %v3025_v55 = vld [vmem:[#allocation2 + $0x69] sm:$0xff] }
  0xba   : > { %834 = vmatpush.msrb.mxu0 %v819_v32  ;;  %1113 = vmatpush.msrb.mxu3 %v1104_v0  ;;  %v1097_v32 = vld [vmem:[#allocation7 + $0x3a0] sm:$0xff]  ;;  %v1095_v50 = vld [vmem:[#allocation7 + $0x390] sm:$0xff]  ;;  %v906_v53 = vld [vmem:[#allocation7 + $0x288] sm:$0xff] }
  0xbb   : > { %525 = vmatmul.f32.gmra.mxu0 %v2957_v33  ;;  %578 = vmatmul.f32.gmra.mxu1 %v704_v21  ;;  %v911_v21 = vld [vmem:[#allocation7 + $0x2b0] sm:$0xff]  ;;  %v1094_v57 = vld [vmem:[#allocation7 + $0x388] sm:$0xff]  ;;  %v905_v60 = vld [vmem:[#allocation7 + $0x280] sm:$0xff] }
  0xbc   : > { %660 = vmatmul.f32.gmra.mxu2 %v2959_v34  ;;  %835 = vmatpush.msrb.mxu0 %v818_v36  ;;  %v1002_v36 = vld [vmem:[#allocation7 + $0x318] sm:$0xff]  ;;  %v1201_v51 = vld [vmem:[#allocation7 + $0x470] sm:$0xff]  ;;  %v1093_v62 = vld [vmem:[#allocation7 + $0x380] sm:$0xff] }
  0xbd   : > { %755 = vmatmul.f32.gmra.mxu3 %v2962_v35  ;;  %926 = vmatpush.msrb.mxu1 %v915_v5  ;;  %v3031_v61 = vld [vmem:[#allocation2 + $0x80] sm:$0xff]  ;;  %v1200_v63 = vld [vmem:[#allocation7 + $0x468] sm:$0xff]  ;;  %v1199_v5 = vld [vmem:[#allocation7 + $0x460] sm:$0xff] }
  0xbe   : > { %836 = vmatpush.msrb.mxu0 %v817_v37  ;;  %1021 = vmatpush.msrb.mxu2 %v1008_v6  ;;  %v908_v37 = vld [vmem:[#allocation7 + $0x298] sm:$0xff]  ;;  %v3035_v1 = vld [vmem:[#allocation2 + $0x79] sm:$0xff] }
  0xbf   : > { %1114 = vmatpush.msrb.mxu3 %v1103_v7  ;;  %927 = vmatpush.msrb.mxu1 %v914_v9  ;;  %v3037_v0 = vld [vmem:[#allocation2 + $0x7a] sm:$0xff]  ;;  %v3047_v7 = vld [vmem:[#allocation2 + $0x82] sm:$0xff] }
  0xc0   : > { %837 = vmatpush.msrb.mxu0 %v816_v41  ;;  %1022 = vmatpush.msrb.mxu2 %v1007_v10  ;;  %v3021_v41 = vld [vmem:[#allocation2 + $0x78] sm:$0xff]  ;;  %v3045_v6 = vld [vmem:[#allocation2 + $0x81] sm:$0xff] }
  0xc1   : > { %1115 = vmatpush.msrb.mxu3 %v1102_v11  ;;  %928 = vmatpush.msrb.mxu1 %v913_v12  ;;  %v3051_v9 = vld [vmem:[#allocation2 + $0x98] sm:$0xff]  ;;  %v1198_v10 = vld [vmem:[#allocation7 + $0x458] sm:$0xff]  ;;  %v1197_v11 = vld [vmem:[#allocation7 + $0x450] sm:$0xff] }
  0xc2   : > { %838 = vmatpush.msrb.mxu0 %v815_v46  ;;  %1023 = vmatpush.msrb.mxu2 %v1006_v13  ;;  %v1096_v46 = vld [vmem:[#allocation7 + $0x398] sm:$0xff]  ;;  %v1196_v12 = vld [vmem:[#allocation7 + $0x448] sm:$0xff]  ;;  %v1195_v13 = vld [vmem:[#allocation7 + $0x440] sm:$0xff] }
  0xc3   : > { %528 = vmatmul.f32.gmra.mxu0 %v2966_v38  ;;  %581 = vmatmul.f32.gmra.mxu1 %v705_v29  ;;  %v909_v29 = vld [vmem:[#allocation7 + $0x2a0] sm:$0xff] }
  0xc4   : > { %663 = vmatmul.f32.gmra.mxu2 %v2968_v39  ;;  %839 = vmatpush.msrb.mxu0 %v814_v59  ;;  %v999_v59 = vld [vmem:[#allocation7 + $0x300] sm:$0xff] }
  0xc5   : > { %758 = vmatmul.f32.gmra.mxu3 %v2971_v40  ;;  %929 = vmatpush.msrb.mxu1 %v912_v15 }
  0xc6   : > { %840 = vmatpush.msrb.mxu0 %v813_v3  ;;  %1116 = vmatpush.msrb.mxu3 %v1101_v14  ;;  %v3041_v3 = vld [vmem:[#allocation2 + $0x90] sm:$0xff] }
  0xc7   : > { %1024 = vmatpush.msrb.mxu2 %v1005_v20  ;;  %930 = vmatpush.msrb.mxu1 %v911_v21 }
  0xc8   : > { %841 = vmatpush.msrb.mxu0 %v812_v16  ;;  %1117 = vmatpush.msrb.mxu3 %v1100_v19 }
  0xc9   : > { %1025 = vmatpush.msrb.mxu2 %v1004_v23  ;;  %931 = vmatpush.msrb.mxu1 %v910_v25 }
  0xca   : > { %1118 = vmatpush.msrb.mxu3 %v1099_v24  ;;  %842 = vmatpush.msrb.mxu0 %v811_v28 }
  0xcb   : > { %531 = vmatmul.f32.gmra.mxu0 %v2975_v42  ;;  %584 = vmatmul.f32.gmra.mxu1 %v2962_v35 }
  0xcc   : > { %666 = vmatmul.f32.gmra.mxu2 %v2977_v43  ;;  %1119 = vmatpush.msrb.mxu3 %v1098_v27 }
  0xcd   : > { %761 = vmatmul.f32.gmra.mxu3 %v2981_v44  ;;  %1026 = vmatpush.msrb.mxu2 %v1003_v26  ;;  %v1189_v26 = vld [vmem:[#allocation7 + $0x410] sm:$0xff] }
  0xce   : > { %932 = vmatpush.msrb.mxu1 %v909_v29  ;;  %1120 = vmatpush.msrb.mxu3 %v1097_v32  ;;  %v1188_v32 = vld [vmem:[#allocation7 + $0x408] sm:$0xff] }
  0xcf   : > { %1027 = vmatpush.msrb.mxu2 %v1002_v36  ;;  %1203 = vmatpush.msra.mxu0 %v1202_v47 }
  0xd0   : > { %933 = vmatpush.msrb.mxu1 %v908_v37  ;;  %1121 = vmatpush.msrb.mxu3 %v1096_v46 }
  0xd1   : > { %1028 = vmatpush.msrb.mxu2 %v1001_v45  ;;  %1204 = vmatpush.msra.mxu0 %v1201_v51  ;;  %v1088_v51 = vld [vmem:[#allocation2 + $0x91] sm:$0xff] }
  0xd2   : > { %934 = vmatpush.msrb.mxu1 %v907_v48  ;;  %1122 = vmatpush.msrb.mxu3 %v1095_v50 }
  0xd3   : > { %534 = vmatmul.f32.gmra.mxu0 %v2985_v52  ;;  %587 = vmatmul.f32.gmra.mxu1 %v2971_v40 }
  0xd4   : > { %669 = vmatmul.f32.gmra.mxu2 %v2987_v54  ;;  %935 = vmatpush.msrb.mxu1 %v906_v53 }
  0xd5   : > { %764 = vmatmul.f32.gmra.mxu3 %v2991_v58  ;;  %1029 = vmatpush.msrb.mxu2 %v1000_v49 }
  0xd6   : > { %1123 = vmatpush.msrb.mxu3 %v1094_v57  ;;  %936 = vmatpush.msrb.mxu1 %v905_v60 }
  0xd7   : > { %1030 = vmatpush.msrb.mxu2 %v999_v59  ;;  %1205 = vmatpush.msra.mxu0 %v1200_v63  ;;  %v1089_v63 = vld [vmem:[#allocation2 + $0x99] sm:$0xff] }
  0xd8   : > { %1124 = vmatpush.msrb.mxu3 %v1093_v62 }
  0xd9   : > { %1206 = vmatpush.msra.mxu0 %v1199_v5 }
  0xdb   : > { %537 = vmatmul.f32.gmra.mxu0 %v2995_v2  ;;  %590 = vmatmul.f32.gmra.mxu1 %v2981_v44 }
  0xdc   : > { %672 = vmatmul.f32.gmra.mxu2 %v2997_v4  ;;  %1207 = vmatpush.msra.mxu0 %v1198_v10 }
  0xdd   : > { %767 = vmatmul.f32.gmra.mxu3 %v3001_v8 }
  0xde   : > { %1208 = vmatpush.msra.mxu0 %v1197_v11 }
  0xe0   : > { %1209 = vmatpush.msra.mxu0 %v1196_v12  ;;  %v3103_v12 = vld [vmem:[#allocation2 + $0x92] sm:$0xff] }
  0xe2   : > { %1210 = vmatpush.msra.mxu0 %v1195_v13 }
  0xe3   : > { %540 = vmatmul.f32.gmra.mxu0 %v3005_v17  ;;  %593 = vmatmul.f32.gmra.mxu1 %v2991_v58 }
  0xe4   : > { %675 = vmatmul.f32.gmra.mxu2 %v3007_v18 }
  0xe5   : > { %770 = vmatmul.f32.gmra.mxu3 %v3011_v22 }
  0xeb   : > { %543 = vmatmul.f32.gmra.mxu0 %v3015_v30  ;;  %596 = vmatmul.f32.gmra.mxu1 %v3001_v8 }
  0xec   : > { %678 = vmatmul.f32.gmra.mxu2 %v3017_v31 }
  0xed   : > { %773 = vmatmul.f32.gmra.mxu3 %v3021_v41 }
  0xf3   : > { %546 = vmatmul.f32.gmra.mxu0 %v3025_v55  ;;  %599 = vmatmul.f32.gmra.mxu1 %v3011_v22 }
  0xf4   : > { %681 = vmatmul.f32.gmra.mxu2 %v3027_v56 }
  0xf5   : > { %776 = vmatmul.f32.gmra.mxu3 %v3031_v61 }
  0xfb   : > { %549 = vmatmul.f32.gmra.mxu0 %v3035_v1  ;;  %602 = vmatmul.f32.gmra.mxu1 %v3021_v41 }
  0xfc   : > { %684 = vmatmul.f32.gmra.mxu2 %v3037_v0 }
  0xfd   : > { %779 = vmatmul.f32.gmra.mxu3 %v3041_v3 }
 0x103   : > { %552 = vmatmul.f32.gmra.mxu0 %v3045_v6  ;;  %605 = vmatmul.f32.gmra.mxu1 %v3031_v61 }
 0x104   : > { %687 = vmatmul.f32.gmra.mxu2 %v3047_v7 }
 0x105   : > { %782 = vmatmul.f32.gmra.mxu3 %v3051_v9 }
 0x10b   : > { %843 = vmatmul.f32.vlgmr.msrb.gmra.mxu0 %v2957_v33  ;;  %937 = vmatmul.f32.vlgmr.msrb.gmra.mxu1 %v2959_v34  ;;  %v1194_v33 = vld [vmem:[#allocation7 + $0x438] sm:$0xff]  ;;  %v1193_v34 = vld [vmem:[#allocation7 + $0x430] sm:$0xff] }
 0x10c   : > { %1031 = vmatmul.f32.vlgmr.msrb.gmra.mxu2 %v2962_v35  ;;  %1211 = vmatpush.msra.mxu0 %v1194_v33  ;;  %v996_v33 = vld [vmem:[#allocation2 + $0xa8] sm:$0xff] }
 0x10d   : > { %1125 = vmatmul.f32.vlgmr.msrb.gmra.mxu3 %v2975_v42 }
 0x10e   : > { %1212 = vmatpush.msra.mxu0 %v1193_v34 }
 0x113   : > { %846 = vmatmul.f32.gmra.mxu0 %v2966_v38  ;;  %940 = vmatmul.f32.gmra.mxu1 %v2968_v39  ;;  %v1192_v39 = vld [vmem:[#allocation7 + $0x428] sm:$0xff] }
 0x114   : > { %1034 = vmatmul.f32.gmra.mxu2 %v2971_v40  ;;  %1213 = vmatpush.msra.mxu0 %v1192_v39 }
 0x115   : > { %1128 = vmatmul.f32.gmra.mxu3 %v2985_v52 }
 0x11b   : > { %849 = vmatmul.f32.gmra.mxu0 %v2975_v42  ;;  %943 = vmatmul.f32.gmra.mxu1 %v2977_v43  ;;  %v1191_v42 = vld [vmem:[#allocation7 + $0x420] sm:$0xff] }
 0x11c   : > { %1037 = vmatmul.f32.gmra.mxu2 %v2981_v44  ;;  %1214 = vmatpush.msra.mxu0 %v1191_v42  ;;  %v3108_v42 = vld [vmem:[#allocation2 + $0x9a] sm:$0xff] }
 0x11d   : > { %1131 = vmatmul.f32.gmra.mxu3 %v2995_v2 }
 0x123   : > { %852 = vmatmul.f32.gmra.mxu0 %v2985_v52  ;;  %946 = vmatmul.f32.gmra.mxu1 %v2987_v54 }
 0x124   : > { %1040 = vmatmul.f32.gmra.mxu2 %v2991_v58 }
 0x125   : > { %1134 = vmatmul.f32.gmra.mxu3 %v3005_v17 }
 0x127   : > { %v520_v35 = vpop.f32.mrf.mxu0 }
 0x128   : > { %v573_v38 = vpop.f32.mrf.mxu1 }
 0x129   : > { %v574_v40 = vadd.f32 %v573_v38, %v520_v35 }
 0x12b   : > { %855 = vmatmul.f32.gmra.mxu0 %v2995_v2  ;;  %949 = vmatmul.f32.gmra.mxu1 %v2997_v4  ;;  %v1190_v2 = vld [vmem:[#allocation7 + $0x418] sm:$0xff] }
 0x12c   : > { %1043 = vmatmul.f32.gmra.mxu2 %v3001_v8  ;;  %1215 = vmatpush.msra.mxu0 %v1190_v2 }
 0x12d   : > { %1137 = vmatmul.f32.gmra.mxu3 %v3015_v30 }
 0x12e   : > { %v655_v44 = vpop.f32.mrf.mxu2  ;;  %1216 = vmatpush.msra.mxu0 %v1189_v26 }
 0x12f   : > { %v691_v52 = vadd.f32 %v655_v44, %v574_v40 }
 0x130   : > { %v523_v58 = vpop.f32.mrf.mxu0  ;;  %v576_v14 = vpop.f32.mrf.mxu1  ;;  %1217 = vmatpush.msra.mxu0 %v1188_v32 }
 0x131   : > { %v750_v15 = vpop.f32.mrf.mxu3  ;;  %v577_v8 = vadd.f32 %v576_v14, %v523_v58  ;;  %v1091_v14 = vld [vmem:[#allocation2 + $0xb1] sm:$0xff] }
 0x132   : > { %v3075_v16 = vadd.f32 %v750_v15, %v691_v52  ;;  %v997_v52 = vld [vmem:[#allocation2 + $0xb0] sm:$0xff] }
 0x133   : > { %858 = vmatmul.f32.gmra.mxu0 %v3005_v17  ;;  %952 = vmatmul.f32.gmra.mxu1 %v3007_v18 }
 0x134   : > { %1046 = vmatmul.f32.gmra.mxu2 %v3011_v22 }
 0x135   : > { %1140 = vmatmul.f32.gmra.mxu3 %v3025_v55 }
 0x137   : > { %v658_v19 = vpop.f32.mrf.mxu2 }
 0x138   : > { %v692_v20 = vadd.f32 %v658_v19, %v577_v8  ;;  %v526_v21 = vpop.f32.mrf.mxu0  ;;  %v579_v23 = vpop.f32.mrf.mxu1 }
 0x139   : > { %v753_v24 = vpop.f32.mrf.mxu3  ;;  %v580_v17 = vadd.f32 %v579_v23, %v526_v21 }
 0x13a   : > { %v3081_v25 = vadd.f32 %v753_v24, %v692_v20 }
 0x13b   : > { %861 = vmatmul.f32.gmra.mxu0 %v3015_v30  ;;  %955 = vmatmul.f32.gmra.mxu1 %v3017_v31 }
 0x13c   : > { %1049 = vmatmul.f32.gmra.mxu2 %v3021_v41  ;;  %v1187_v41 = vld [vmem:[#allocation7 + $0x400] sm:$0xff] }
 0x13d   : > { %1143 = vmatmul.f32.gmra.mxu3 %v3035_v1  ;;  %1218 = vmatpush.msra.mxu0 %v1187_v41 }
 0x13f   : > { %v661_v22 = vpop.f32.mrf.mxu2 }
 0x140   : > { %v693_v27 = vadd.f32 %v661_v22, %v580_v17  ;;  %v529_v28 = vpop.f32.mrf.mxu0  ;;  %v582_v29 = vpop.f32.mrf.mxu1 }
 0x141   : > { %v756_v36 = vpop.f32.mrf.mxu3  ;;  %v583_v30 = vadd.f32 %v582_v29, %v529_v28 }
 0x142   : > { %v3087_v37 = vadd.f32 %v756_v36, %v693_v27 }
 0x143   : > { %864 = vmatmul.f32.gmra.mxu0 %v3025_v55  ;;  %958 = vmatmul.f32.gmra.mxu1 %v3027_v56 }
 0x144   : > { %1052 = vmatmul.f32.gmra.mxu2 %v3031_v61 }
 0x145   : > { %1146 = vmatmul.f32.gmra.mxu3 %v3045_v6 }
 0x147   : > { %v664_v45 = vpop.f32.mrf.mxu2 }
 0x148   : > { %v694_v46 = vadd.f32 %v664_v45, %v583_v30  ;;  %v532_v47 = vpop.f32.mrf.mxu0  ;;  %v585_v48 = vpop.f32.mrf.mxu1 }
 0x149   : > { %v759_v49 = vpop.f32.mrf.mxu3  ;;  %v586_v53 = vadd.f32 %v585_v48, %v532_v47 }
 0x14a   : > { %v3093_v50 = vadd.f32 %v759_v49, %v694_v46 }
 0x14b   : > { %867 = vmatmul.f32.gmra.mxu0 %v3035_v1  ;;  %961 = vmatmul.f32.gmra.mxu1 %v3037_v0 }
 0x14c   : > { %1055 = vmatmul.f32.gmra.mxu2 %v3041_v3 }
 0x14d   : > { %1149 = vmatmul.f32.gmra.mxu3 %v1088_v51 }
 0x14f   : > { %v667_v55 = vpop.f32.mrf.mxu2 }
 0x150   : > { %v695_v57 = vadd.f32 %v667_v55, %v586_v53  ;;  %v535_v59 = vpop.f32.mrf.mxu0  ;;  %v588_v60 = vpop.f32.mrf.mxu1 }
 0x151   : > { %v762_v61 = vpop.f32.mrf.mxu3  ;;  %v589_v1 = vadd.f32 %v588_v60, %v535_v59 }
 0x152   : > { %v3098_v62 = vadd.f32 %v762_v61, %v695_v57 }
 0x153   : > { %870 = vmatmul.f32.gmra.mxu0 %v3045_v6  ;;  %964 = vmatmul.f32.gmra.mxu1 %v3047_v7  ;;  %v1090_v6 = vld [vmem:[#allocation2 + $0xa9] sm:$0xff] }
 0x154   : > { %1058 = vmatmul.f32.gmra.mxu2 %v3051_v9 }
 0x155   : > { %1152 = vmatmul.f32.gmra.mxu3 %v1089_v63 }
 0x157   : > { %v670_v5 = vpop.f32.mrf.mxu2 }
 0x158   : > { %v696_v3 = vadd.f32 %v670_v5, %v589_v1  ;;  %v538_v10 = vpop.f32.mrf.mxu0  ;;  %v591_v11 = vpop.f32.mrf.mxu1 }
 0x159   : > { %v765_v13 = vpop.f32.mrf.mxu3  ;;  %v592_v35 = vadd.f32 %v591_v11, %v538_v10 }
 0x15a   : > { %v3105_v34 = vadd.f32 %v765_v13, %v696_v3 }
 0x15b   : > { %873 = vmatmul.f32.gmra.mxu0 %v1088_v51  ;;  %967 = vmatmul.f32.gmra.mxu1 %v3103_v12 }
 0x15c   : > { %1061 = vmatmul.f32.gmra.mxu2 %v996_v33 }
 0x15d   : > { %1155 = vmatmul.f32.gmra.mxu3 %v1090_v6 }
 0x15f   : > { %v673_v9 = vpop.f32.mrf.mxu2 }
 0x160   : > { %v697_v38 = vadd.f32 %v673_v9, %v592_v35  ;;  %v541_v39 = vpop.f32.mrf.mxu0  ;;  %v594_v40 = vpop.f32.mrf.mxu1 }
 0x161   : > { %v768_v44 = vpop.f32.mrf.mxu3  ;;  %v595_v15 = vadd.f32 %v594_v40, %v541_v39 }
 0x162   : > { %v3110_v58 = vadd.f32 %v768_v44, %v697_v38 }
 0x163   : > { %876 = vmatmul.f32.gmra.mxu0 %v1089_v63  ;;  %970 = vmatmul.f32.gmra.mxu1 %v3108_v42 }
 0x164   : > { %1064 = vmatmul.f32.gmra.mxu2 %v997_v52 }
 0x165   : > { %1158 = vmatmul.f32.gmra.mxu3 %v1091_v14 }
 0x167   : > { %v676_v2 = vpop.f32.mrf.mxu2 }
 0x168   : > { %v698_v8 = vadd.f32 %v676_v2, %v595_v15  ;;  %v544_v19 = vpop.f32.mrf.mxu0  ;;  %v597_v20 = vpop.f32.mrf.mxu1 }
 0x169   : > { %v771_v21 = vpop.f32.mrf.mxu3  ;;  %v598_v24 = vadd.f32 %v597_v20, %v544_v19 }
 0x16a   : > { %v793_v23 = vadd.f32 %v771_v21, %v698_v8 }
 0x16b   : > { %1219 = vmatmul.f32.vlgmr.msra.gmra.mxu0 %v2977_v43 }
 0x16f   : > { %v679_v26 = vpop.f32.mrf.mxu2 }
 0x170   : > { %v699_v17 = vadd.f32 %v679_v26, %v598_v24  ;;  %v547_v22 = vpop.f32.mrf.mxu0  ;;  %v600_v27 = vpop.f32.mrf.mxu1  ;;  %v3149_v26 = vld [vmem:[%s3520_s3] ss:$0 sm:$0xff] }
 0x171   : > { %v774_v28 = vpop.f32.mrf.mxu3  ;;  %v601_v32 = vadd.f32 %v600_v27, %v547_v22 }
 0x172   : > { %v794_v29 = vadd.f32 %v774_v28, %v699_v17 }
 0x173   : > { %1222 = vmatmul.f32.gmra.mxu0 %v2987_v54 }
 0x177   : > { %v682_v36 = vpop.f32.mrf.mxu2 }
 0x178   : > { %v700_v30 = vadd.f32 %v682_v36, %v601_v32  ;;  %v550_v41 = vpop.f32.mrf.mxu0  ;;  %v603_v45 = vpop.f32.mrf.mxu1 }
 0x179   : > { %v777_v46 = vpop.f32.mrf.mxu3  ;;  %v604_v48 = vadd.f32 %v603_v45, %v550_v41 }
 0x17a   : > { %v795_v47 = vadd.f32 %v777_v46, %v700_v30 }
 0x17b   : > { %1225 = vmatmul.f32.gmra.mxu0 %v2997_v4 }
 0x17f   : > { %v685_v43 = vpop.f32.mrf.mxu2 }
 0x180   : > { %v701_v49 = vadd.f32 %v685_v43, %v604_v48  ;;  %v553_v51 = vpop.f32.mrf.mxu0  ;;  %v606_v57 = vpop.f32.mrf.mxu1 }
 0x181   : > { %v780_v53 = vpop.f32.mrf.mxu3  ;;  %v607_v59 = vadd.f32 %v606_v57, %v553_v51 }
 0x182   : > { %v796_v55 = vadd.f32 %v780_v53, %v701_v49 }
 0x183   : > { %1228 = vmatmul.f32.gmra.mxu0 %v3007_v18 }
 0x187   : > { %v688_v54 = vpop.f32.mrf.mxu2 }
 0x188   : > { %v702_v60 = vadd.f32 %v688_v54, %v607_v59  ;;  %v844_v61 = vpop.f32.mrf.mxu0 }
 0x189   : > { %v783_v63 = vpop.f32.mrf.mxu3  ;;  %v880_v1 = vadd.f32 %v844_v61, %v3075_v16 }
 0x18a   : > { %v797_v5 = vadd.f32 %v783_v63, %v702_v60 }
 0x18b   : > { %1231 = vmatmul.f32.gmra.mxu0 %v3017_v31 }
 0x18f   : > { %v1032_v9 = vpop.f32.mrf.mxu2 }
 0x190   : > { %v847_v4 = vpop.f32.mrf.mxu0 }
 0x191   : > { %v881_v3 = vadd.f32 %v847_v4, %v3081_v25 }
 0x193   : > { %1234 = vmatmul.f32.gmra.mxu0 %v3027_v56 }
 0x198   : > { %v850_v10 = vpop.f32.mrf.mxu0 }
 0x199   : > { %v882_v11 = vadd.f32 %v850_v10, %v3087_v37  ;;  %v1184_v37 = vld [vmem:[#allocation2 + $0xaa] sm:$0xff] }
 0x19b   : > { %1237 = vmatmul.f32.gmra.mxu0 %v3037_v0 }
 0x1a0   : > { %v853_v18 = vpop.f32.mrf.mxu0 }
 0x1a1   : > { %v883_v13 = vadd.f32 %v853_v18, %v3093_v50 }
 0x1a3   : > { %1240 = vmatmul.f32.gmra.mxu0 %v3047_v7  ;;  %v1185_v7 = vld [vmem:[#allocation2 + $0xb2] sm:$0xff] }
 0x1a8   : > { %v856_v33 = vpop.f32.mrf.mxu0 }
 0x1a9   : > { %v3126_v16 = vadd.f32 %v856_v33, %v3098_v62  ;;  %v938_v62 = vpop.f32.mrf.mxu1 }
 0x1aa   : > { %v974_v8 = vadd.f32 %v938_v62, %v880_v1 }
 0x1ab   : > { %1243 = vmatmul.f32.gmra.mxu0 %v3103_v12 }
 0x1ac   : > { %v1068_v21 = vadd.f32 %v1032_v9, %v974_v8 }
 0x1b0   : > { %v859_v31 = vpop.f32.mrf.mxu0 }
 0x1b1   : > { %v3130_v25 = vadd.f32 %v859_v31, %v3105_v34  ;;  %v1126_v34 = vpop.f32.mrf.mxu3  ;;  %v941_v40 = vpop.f32.mrf.mxu1 }
 0x1b2   : > { %v1162_v24 = vadd.f32 %v1126_v34, %v1068_v21  ;;  %v975_v27 = vadd.f32 %v941_v40, %v881_v3 }
 0x1b3   : > { %1246 = vmatmul.f32.gmra.mxu0 %v3108_v42  ;;  %v1035_v42 = vpop.f32.mrf.mxu2 }
 0x1b4   : > { %v1069_v32 = vadd.f32 %v1035_v42, %v975_v27 }
 0x1b8   : > { %v862_v56 = vpop.f32.mrf.mxu0 }
 0x1b9   : > { %v3134_v0 = vadd.f32 %v862_v56, %v3110_v58  ;;  %v1129_v44 = vpop.f32.mrf.mxu3  ;;  %v944_v14 = vpop.f32.mrf.mxu1 }
 0x1ba   : > { %v1163_v45 = vadd.f32 %v1129_v44, %v1069_v32  ;;  %v976_v43 = vadd.f32 %v944_v14, %v882_v11 }
 0x1bb   : > { %1249 = vmatmul.f32.gmra.mxu0 %v1184_v37  ;;  %v1038_v15 = vpop.f32.mrf.mxu2 }
 0x1bc   : > { %v1070_v53 = vadd.f32 %v1038_v15, %v976_v43 }
 0x1c0   : > { %v865_v50 = vpop.f32.mrf.mxu0 }
 0x1c1   : > { %v3136_v6 = vadd.f32 %v865_v50, %v793_v23  ;;  %v1132_v20 = vpop.f32.mrf.mxu3  ;;  %v947_v23 = vpop.f32.mrf.mxu1 }
 0x1c2   : > { %v1164_v54 = vadd.f32 %v1132_v20, %v1070_v53  ;;  %v977_v63 = vadd.f32 %v947_v23, %v883_v13 }
 0x1c3   : > { %1252 = vmatmul.f32.gmra.mxu0 %v1185_v7  ;;  %v1041_v17 = vpop.f32.mrf.mxu2 }
 0x1c4   : > { %v1071_v4 = vadd.f32 %v1041_v17, %v977_v63 }
 0x1c8   : > { %v868_v35 = vpop.f32.mrf.mxu0 }
 0x1c9   : > { %v3138_v12 = vadd.f32 %v868_v35, %v794_v29  ;;  %v3154_v29 = vld [vmem:[%s3521_s4] ss:$0 sm:$0xff]  ;;  %v1135_v30 = vpop.f32.mrf.mxu3 }
 0x1ca   : > { %v1165_v18 = vadd.f32 %v1135_v30, %v1071_v4 }
 0x1cb   : > { %v1044_v51 = vpop.f32.mrf.mxu2 }
 0x1d0   : > { %v871_v38 = vpop.f32.mrf.mxu0 }
 0x1d1   : > { %v3140_v39 = vadd.f32 %v871_v38, %v795_v47  ;;  %v950_v47 = vpop.f32.mrf.mxu1  ;;  %v1138_v59 = vpop.f32.mrf.mxu3 }
 0x1d2   : > { %v978_v37 = vadd.f32 %v950_v47, %v3126_v16 }
 0x1d3   : > { %v1047_v10 = vpop.f32.mrf.mxu2 }
 0x1d4   : > { %v1072_v7 = vadd.f32 %v1044_v51, %v978_v37 }
 0x1d6   : > { %v1166_v34 = vadd.f32 %v1138_v59, %v1072_v7 }
 0x1d8   : > { %v874_v52 = vpop.f32.mrf.mxu0 }
 0x1d9   : > { %v3142_v58 = vadd.f32 %v874_v52, %v796_v55  ;;  %v1141_v31 = vpop.f32.mrf.mxu3 }
 0x1db   : > { %v1050_v9 = vpop.f32.mrf.mxu2 }
 0x1e0   : > { %v877_v2 = vpop.f32.mrf.mxu0 }
 0x1e1   : > { %v3144_v19 = vadd.f32 %v877_v2, %v797_v5  ;;  %v953_v5 = vpop.f32.mrf.mxu1  ;;  %v1144_v52 = vpop.f32.mrf.mxu3 }
 0x1e2   : > { %v979_v42 = vadd.f32 %v953_v5, %v3130_v25 }
 0x1e3   : > { %v1053_v21 = vpop.f32.mrf.mxu2 }
 0x1e4   : > { %v1073_v14 = vadd.f32 %v1047_v10, %v979_v42 }
 0x1e6   : > { %v1167_v8 = vadd.f32 %v1141_v31, %v1073_v14 }
 0x1e8   : > { %v1220_v22 = vpop.f32.mrf.mxu0 }
 0x1e9   : > { %v1256_v28 = vadd.f32 %v1220_v22, %v1162_v24  ;;  %v956_v62 = vpop.f32.mrf.mxu1  ;;  %v1147_v27 = vpop.f32.mrf.mxu3 }
 0x1ea   : > { %v980_v24 = vadd.f32 %v956_v62, %v3134_v0 }
 0x1eb   : > { %v1272_v36 = vmul.f32 %v3149_v26, %v1256_v28  ;;  %v1056_v47 = vpop.f32.mrf.mxu2 }
 0x1ec   : > { %v1074_v22 = vadd.f32 %v1050_v9, %v980_v24 }
 0x1ed   : > { %v1288_v41 = vadd.f32 %v3154_v29, %v1272_v36 }
 0x1ee   : > { %v1168_v32 = vadd.f32 %v1144_v52, %v1074_v22 }
 0x1ef   : > { %v1300_v46 = vmax.f32 %v1288_v41, 0.0 }
 0x1f0   : > { %v1223_v48 = vpop.f32.mrf.mxu0 }
 0x1f1   : > { %1330 = vst [vmem:[#allocation3 + $0x1] sm:$0xff] %v1300_v46  ;;  %v1257_v49 = vadd.f32 %v1223_v48, %v1163_v45  ;;  %v959_v2 = vpop.f32.mrf.mxu1 }
 0x1f2   : > { %v981_v45 = vadd.f32 %v959_v2, %v3136_v6 }
 0x1f3   : > { %v1273_v55 = vmul.f32 %v3149_v26, %v1257_v49  ;;  %v1150_v49 = vpop.f32.mrf.mxu3 }
 0x1f4   : > { %v1075_v48 = vadd.f32 %v1053_v21, %v981_v45 }
 0x1f5   : > { %v1289_v57 = vadd.f32 %v3154_v29, %v1273_v55 }
 0x1f6   : > { %v1169_v51 = vadd.f32 %v1147_v27, %v1075_v48 }
 0x1f7   : > { %v1301_v60 = vmax.f32 %v1289_v57, 0.0 }
 0x1f8   : > { %v1226_v61 = vpop.f32.mrf.mxu0 }
 0x1f9   : > { %1331 = vst [vmem:[#allocation3 + $0x9] sm:$0xff] %v1301_v60  ;;  %v1258_v1 = vadd.f32 %v1226_v61, %v1164_v54  ;;  %v962_v30 = vpop.f32.mrf.mxu1  ;;  %v1059_v61 = vpop.f32.mrf.mxu2 }
 0x1fa   : > { %v982_v57 = vadd.f32 %v962_v30, %v3138_v12 }
 0x1fb   : > { %v1274_v3 = vmul.f32 %v3149_v26, %v1258_v1  ;;  %v1153_v4 = vpop.f32.mrf.mxu3 }
 0x1fc   : > { %v1076_v60 = vadd.f32 %v1056_v47, %v982_v57 }
 0x1fd   : > { %v1290_v11 = vadd.f32 %v3154_v29, %v1274_v3 }
 0x1fe   : > { %v1170_v1 = vadd.f32 %v1150_v49, %v1076_v60 }
 0x1ff   : > { %v1302_v33 = vmax.f32 %v1290_v11, 0.0 }
 0x200   : > { %v1229_v56 = vpop.f32.mrf.mxu0 }
 0x201   : > { %1332 = vst [vmem:[#allocation3 + $0x19] sm:$0xff] %v1302_v33  ;;  %v1259_v50 = vadd.f32 %v1229_v56, %v1165_v18  ;;  %v965_v54 = vpop.f32.mrf.mxu1  ;;  %v1062_v56 = vpop.f32.mrf.mxu2 }
 0x202   : > { %v983_v10 = vadd.f32 %v965_v54, %v3140_v39 }
 0x203   : > { %v1275_v13 = vmul.f32 %v3149_v26, %v1259_v50 }
 0x204   : > { %v1077_v18 = vadd.f32 %v1059_v61, %v983_v10 }
 0x205   : > { %v1291_v35 = vadd.f32 %v3154_v29, %v1275_v13 }
 0x206   : > { %v1171_v37 = vadd.f32 %v1153_v4, %v1077_v18 }
 0x207   : > { %v1303_v38 = vmax.f32 %v1291_v35, 0.0  ;;  %v1156_v35 = vpop.f32.mrf.mxu3 }
 0x208   : > { %v1232_v40 = vpop.f32.mrf.mxu0 }
 0x209   : > { %1333 = vst [vmem:[#allocation3 + $0x21] sm:$0xff] %v1303_v38  ;;  %v1260_v44 = vadd.f32 %v1232_v40, %v1166_v34  ;;  %v968_v33 = vpop.f32.mrf.mxu1 }
 0x20a   : > { %v984_v13 = vadd.f32 %v968_v33, %v3142_v58 }
 0x20b   : > { %v1276_v16 = vmul.f32 %v3149_v26, %v1260_v44  ;;  %v1065_v44 = vpop.f32.mrf.mxu2 }
 0x20c   : > { %v1078_v9 = vadd.f32 %v1062_v56, %v984_v13 }
 0x20d   : > { %v1292_v15 = vadd.f32 %v3154_v29, %v1276_v16 }
 0x20e   : > { %v1172_v40 = vadd.f32 %v1156_v35, %v1078_v9 }
 0x20f   : > { %v1304_v20 = vmax.f32 %v1292_v15, 0.0  ;;  %v1159_v2 = vpop.f32.mrf.mxu3 }
 0x210   : > { %v1235_v23 = vpop.f32.mrf.mxu0 }
 0x211   : > { %1334 = vst [vmem:[#allocation3 + $0x31] sm:$0xff] %v1304_v20  ;;  %v1261_v17 = vadd.f32 %v1235_v23, %v1167_v8  ;;  %v971_v38 = vpop.f32.mrf.mxu1 }
 0x212   : > { %v985_v14 = vadd.f32 %v971_v38, %v3144_v19 }
 0x213   : > { %v1277_v25 = vmul.f32 %v3149_v26, %v1261_v17 }
 0x214   : > { %v1079_v15 = vadd.f32 %v1065_v44, %v985_v14 }
 0x215   : > { %v1293_v28 = vadd.f32 %v3154_v29, %v1277_v25 }
 0x216   : > { %v1173_v20 = vadd.f32 %v1159_v2, %v1079_v15 }
 0x217   : > { %v1305_v36 = vmax.f32 %v1293_v28, 0.0 }
 0x218   : > { %v1238_v41 = vpop.f32.mrf.mxu0 }
 0x219   : > { %1335 = vst [vmem:[#allocation3 + $0x39] sm:$0xff] %v1305_v36  ;;  %v1262_v46 = vadd.f32 %v1238_v41, %v1168_v32 }
 0x21b   : > { %v1278_v0 = vmul.f32 %v3149_v26, %v1262_v46 }
 0x21d   : > { %v1294_v43 = vadd.f32 %v3154_v29, %v1278_v0 }
 0x21f   : > { %v1306_v53 = vmax.f32 %v1294_v43, 0.0 }
 0x220   : > { %v1241_v55 = vpop.f32.mrf.mxu0 }
 0x221   : > { %1336 = vst [vmem:[#allocation3 + $0x49] sm:$0xff] %v1306_v53  ;;  %v1263_v59 = vadd.f32 %v1241_v55, %v1169_v51 }
 0x223   : > { %v1279_v6 = vmul.f32 %v3149_v26, %v1263_v59 }
 0x225   : > { %v1295_v63 = vadd.f32 %v3154_v29, %v1279_v6 }
 0x227   : > { %v1307_v5 = vmax.f32 %v1295_v63, 0.0 }
 0x228   : > { %v1244_v3 = vpop.f32.mrf.mxu0 }
 0x229   : > { %1337 = vst [vmem:[#allocation3 + $0x51] sm:$0xff] %v1307_v5  ;;  %v1264_v11 = vadd.f32 %v1244_v3, %v1170_v1 }
 0x22b   : > { %v1280_v12 = vmul.f32 %v3149_v26, %v1264_v11 }
 0x22d   : > { %v1296_v31 = vadd.f32 %v3154_v29, %v1280_v12 }
 0x22f   : > { %v1308_v50 = vmax.f32 %v1296_v31, 0.0 }
 0x230   : > { %v1247_v7 = vpop.f32.mrf.mxu0 }
 0x231   : > { %1338 = vst [vmem:[#allocation3 + $0x61] sm:$0xff] %v1308_v50  ;;  %v1265_v62 = vadd.f32 %v1247_v7, %v1171_v37 }
 0x233   : > { %v1281_v39 = vmul.f32 %v3149_v26, %v1265_v62 }
 0x235   : > { %v1297_v34 = vadd.f32 %v3154_v29, %v1281_v39 }
 0x237   : > { %v1309_v42 = vmax.f32 %v1297_v34, 0.0 }
 0x238   : > { %v1250_v52 = vpop.f32.mrf.mxu0 }
 0x239   : > { %1339 = vst [vmem:[#allocation3 + $0x69] sm:$0xff] %v1309_v42  ;;  %v1266_v16 = vadd.f32 %v1250_v52, %v1172_v40 }
 0x23b   : > { %v1282_v58 = vmul.f32 %v3149_v26, %v1266_v16 }
 0x23d   : > { %v1298_v8 = vadd.f32 %v3154_v29, %v1282_v58 }
 0x23f   : > { %v1310_v21 = vmax.f32 %v1298_v8, 0.0 }
 0x240   : > { %v1253_v23 = vpop.f32.mrf.mxu0 }
 0x241   : > { %1340 = vst [vmem:[#allocation3 + $0x79] sm:$0xff] %v1310_v21  ;;  %v1267_v24 = vadd.f32 %v1253_v23, %v1173_v20 }
 0x243   : > { %v1283_v17 = vmul.f32 %v3149_v26, %v1267_v24 }
 0x245   : > { %v1299_v22 = vadd.f32 %v3154_v29, %v1283_v17  ;;  %1345 = sbr.rel (%p2235_p1) target bundleno = 590 (0x24e), region = 80 }
 0x247   : > { %v1311_v25 = vmax.f32 %v1299_v22, 0.0 }
 0x249   : > { %1341 = vst [vmem:[#allocation3 + $0x81] sm:$0xff] %v1311_v25 }
 0x24a   : > { %v2671_v19 = vmov 0.0  }
 0x24b   : > { %1346 = vst [vmem:[#allocation3] sm:$0xff] %v2671_v19 }
 0x24c   : > { %1347 = vst [vmem:[#allocation3 + $0x8] sm:$0xff] %v2671_v19 }
 0x24d   : > { %1348 = vst [vmem:[#allocation3 + $0x10] sm:$0x3] %v2671_v19 }
 0x24e PF: > { %p2236_p4 = scmp.ne.s32.totalorder %s2648_s30, 3 }
 0x250   : > { %1352 = sbr.rel (%p2236_p4) target bundleno = 601 (0x259), region = 84 }
 0x255   : > { %v2672_v27 = vmov 0.0  }
 0x256   : > { %1354 = vst [vmem:[#allocation3 + $0x78] sm:$0xff] %v2672_v27 }
 0x257   : > { %1355 = vst [vmem:[#allocation3 + $0x80] sm:$0xff] %v2672_v27 }
 0x258   : > { %1356 = vst [vmem:[#allocation3 + $0x88] sm:$0x3] %v2672_v27 }
 0x259 PF: > { %v1405_v26 = vld [vmem:[#allocation9 + $0xf8] sm:$0xff]  ;;  %v1404_v28 = vld [vmem:[#allocation9 + $0xf0] sm:$0xff]  ;;  %v1403_v36 = vld [vmem:[#allocation9 + $0xe8] sm:$0xff]  ;;  %s3558_s8 = sld [smem:[#allocation23_spill]]  ;;  %s2249_s21 = sshll.u32 %s2648_s30, 3 }
 0x25a   : > { %v1380_v29 = vld [vmem:[#allocation9 + $0x78] sm:$0xff]  ;;  %1406 = vmatpush.msra.mxu1 %v1405_v26  ;;  %2250 = vmatpush.msra.mxu3 %v1405_v26  ;;  %v1379_v32 = vld [vmem:[#allocation9 + $0x70] sm:$0xff]  ;;  %v1378_v30 = vld [vmem:[#allocation9 + $0x68] sm:$0xff]  ;;  %s3559_s14 = sld [smem:[#allocation24_spill]]  ;;  %s2080_s16 = sshll.u32 %s2923_s12, 4  ;;  %s2081_s16 = int_to_ptr.vmem [resolvable:$true] %s2080_s16 }
 0x25b   : > { %1447 = vmatpush.msra.mxu2 %v1380_v29  ;;  %v1402_v41 = vld [vmem:[#allocation9 + $0xe0] sm:$0xff]  ;;  %v1401_v46 = vld [vmem:[#allocation9 + $0xd8] sm:$0xff]  ;;  %v1400_v48 = vld [vmem:[#allocation9 + $0xd0] sm:$0xff]  ;;  %s3560_s18 = sld [smem:[#allocation15_spill]]  ;;  %s2065_s7 = scalar_lea.sflag [#allocation6], %s343_s5 }
 0x25c   : > { %1407 = vmatpush.msra.mxu1 %v1404_v28  ;;  %2251 = vmatpush.msra.mxu3 %v1404_v28  ;;  %v1377_v45 = vld [vmem:[#allocation9 + $0x60] sm:$0xff]  ;;  %v1376_v47 = vld [vmem:[#allocation9 + $0x58] sm:$0xff]  ;;  %v1375_v0 = vld [vmem:[#allocation9 + $0x50] sm:$0xff]  ;;  %s3561_s19 = sld [smem:[#allocation25_spill]] }
 0x25d   : > { %1448 = vmatpush.msra.mxu2 %v1379_v32  ;;  %v1399_v43 = vld [vmem:[#allocation9 + $0xc8] sm:$0xff]  ;;  %v1398_v51 = vld [vmem:[#allocation9 + $0xc0] sm:$0xff]  ;;  %v1397_v55 = vld [vmem:[#allocation9 + $0xb8] sm:$0xff] }
 0x25e   : > { %1408 = vmatpush.msra.mxu1 %v1403_v36  ;;  %2252 = vmatpush.msra.mxu3 %v1403_v36  ;;  %v1374_v49 = vld [vmem:[#allocation9 + $0x48] sm:$0xff]  ;;  %v1373_v53 = vld [vmem:[#allocation9 + $0x40] sm:$0xff]  ;;  %v1372_v57 = vld [vmem:[#allocation9 + $0x38] sm:$0xff] }
 0x25f   : > { %1449 = vmatpush.msra.mxu2 %v1378_v30  ;;  %v1396_v59 = vld [vmem:[#allocation9 + $0xb0] sm:$0xff]  ;;  %v1395_v60 = vld [vmem:[#allocation9 + $0xa8] sm:$0xff]  ;;  %v1810_v6 = vld [vmem:[#allocation9 + $0x378] sm:$0xff] }
 0x260   : > { %1409 = vmatpush.msra.mxu1 %v1402_v41  ;;  %2253 = vmatpush.msra.mxu3 %v1402_v41  ;;  %v1371_v54 = vld [vmem:[#allocation9 + $0x30] sm:$0xff]  ;;  %v1370_v61 = vld [vmem:[#allocation9 + $0x28] sm:$0xff]  ;;  %v1394_v1 = vld [vmem:[#allocation9 + $0xa0] sm:$0xff] }
 0x261   : > { %1450 = vmatpush.msra.mxu2 %v1377_v45  ;;  %v1809_v63 = vld [vmem:[#allocation9 + $0x370] sm:$0xff]  ;;  %1811 = vmatpush.msrb.mxu0 %v1810_v6  ;;  %v1369_v5 = vld [vmem:[#allocation9 + $0x20] sm:$0xff]  ;;  %v1808_v4 = vld [vmem:[#allocation9 + $0x368] sm:$0xff]  ;;  %s2240_s23 = sshll.u32 %s3560_s18, 5 }
 0x262   : > { %1410 = vmatpush.msra.mxu1 %v1401_v46  ;;  %2254 = vmatpush.msra.mxu3 %v1401_v46  ;;  %v1393_v3 = vld [vmem:[#allocation9 + $0x98] sm:$0xff]  ;;  %v1807_v11 = vld [vmem:[#allocation9 + $0x360] sm:$0xff]  ;;  %v1392_v18 = vld [vmem:[#allocation9 + $0x90] sm:$0xff]  ;;  %s2077_s22 = sadd.s32 %s2249_s21, %s2240_s23 }
 0x263   : > { %1451 = vmatpush.msra.mxu2 %v1376_v47  ;;  %1812 = vmatpush.msrb.mxu0 %v1809_v63  ;;  %v1368_v10 = vld [vmem:[#allocation9 + $0x18] sm:$0xff]  ;;  %v1367_v12 = vld [vmem:[#allocation9 + $0x10] sm:$0xff]  ;;  %v1391_v31 = vld [vmem:[#allocation9 + $0x88] sm:$0xff]  ;;  %s2241_s30 = sshll.u32 %s2077_s22, 3 }
 0x264   : > { %1411 = vmatpush.msra.mxu1 %v1400_v48  ;;  %2255 = vmatpush.msra.mxu3 %v1400_v48  ;;  %v1806_v33 = vld [vmem:[#allocation9 + $0x358] sm:$0xff]  ;;  %v1366_v56 = vld [vmem:[#allocation9 + $0x8] sm:$0xff]  ;;  %v1805_v37 = vld [vmem:[#allocation9 + $0x350] sm:$0xff]  ;;  %s2079_s2 = scalar_lea.hbm %s3561_s19, %s2241_s30 }
 0x265   : > { %1452 = vmatpush.msra.mxu2 %v1375_v0  ;;  %1813 = vmatpush.msrb.mxu0 %v1808_v4  ;;  %v1390_v50 = vld [vmem:[#allocation9 + $0x80] sm:$0xff]  ;;  %v1381_v13 = vld [vmem:[#allocation3 + $0x1] sm:$0xff]  ;;  %v1804_v38 = vld [vmem:[#allocation9 + $0x348] sm:$0xff]  ;;  %s2082_s6 = sshll.u32 %s2079_s2, 4  ;;  %s2083_s6 = int_to_ptr.hbm [resolvable:$true] %s2082_s6 }
 0x266   : > { %1412 = vmatpush.msra.mxu1 %v1399_v43  ;;  %2256 = vmatpush.msra.mxu3 %v1399_v43  ;;  %v1365_v7 = vld [vmem:[#allocation9] sm:$0xff]  ;;  %v1357_v35 = vld [vmem:[#allocation3] sm:$0xff]  ;;  %v1512_v9 = vld [vmem:[#allocation9 + $0x178] sm:$0xff] }
 0x267   : > { %1453 = vmatpush.msra.mxu2 %v1374_v49  ;;  %1814 = vmatpush.msrb.mxu0 %v1807_v11  ;;  %v3190_v62 = vld [vmem:[#allocation3 + $0x31] sm:$0xff]  ;;  %v1587_v39 = vld [vmem:[#allocation9 + $0x1f8] sm:$0xff]  ;;  %v1511_v40 = vld [vmem:[#allocation9 + $0x170] sm:$0xff] }
 0x268   : > { %1413 = vmatpush.msra.mxu1 %v1398_v51  ;;  %2257 = vmatpush.msra.mxu3 %v1398_v51  ;;  %v1661_v34 = vld [vmem:[#allocation9 + $0x278] sm:$0xff]  ;;  %v1586_v42 = vld [vmem:[#allocation9 + $0x1f0] sm:$0xff]  ;;  %v1803_v52 = vld [vmem:[#allocation9 + $0x340] sm:$0xff] }
 0x269   : > { %1454 = vmatpush.msra.mxu2 %v1373_v53  ;;  %1815 = vmatpush.msrb.mxu0 %v1806_v33  ;;  %v1660_v44 = vld [vmem:[#allocation9 + $0x270] sm:$0xff]  ;;  %v1510_v14 = vld [vmem:[#allocation9 + $0x168] sm:$0xff]  ;;  %v1802_v58 = vld [vmem:[#allocation9 + $0x338] sm:$0xff] }
 0x26a   : > { %1414 = vmatpush.msra.mxu1 %v1397_v55  ;;  %2258 = vmatpush.msra.mxu3 %v1397_v55  ;;  %v1585_v16 = vld [vmem:[#allocation9 + $0x1e8] sm:$0xff]  ;;  %v1509_v2 = vld [vmem:[#allocation9 + $0x160] sm:$0xff]  ;;  %v1358_v23 = vld [vmem:[#allocation3 + $0x8] sm:$0xff] }
 0x26b   : > { %1455 = vmatpush.msra.mxu2 %v1372_v57  ;;  %1816 = vmatpush.msrb.mxu0 %v1805_v37  ;;  %v1659_v15 = vld [vmem:[#allocation9 + $0x268] sm:$0xff]  ;;  %v1584_v8 = vld [vmem:[#allocation9 + $0x1e0] sm:$0xff]  ;;  %v1508_v24 = vld [vmem:[#allocation9 + $0x158] sm:$0xff] }
 0x26c   : > { %1415 = vmatpush.msra.mxu1 %v1396_v59  ;;  %2259 = vmatpush.msra.mxu3 %v1396_v59  ;;  %v1382_v20 = vld [vmem:[#allocation3 + $0x9] sm:$0xff]  ;;  %v3193_v21 = vld [vmem:[#allocation3 + $0x39] sm:$0xff]  ;;  %v3207_v4 = vld [vmem:[#allocation3 + $0x51] sm:$0xff] }
 0x26d   : > { %1456 = vmatpush.msra.mxu2 %v1371_v54  ;;  %1817 = vmatpush.msrb.mxu0 %v1804_v38  ;;  %v1583_v17 = vld [vmem:[#allocation9 + $0x1d8] sm:$0xff]  ;;  %v1658_v22 = vld [vmem:[#allocation9 + $0x260] sm:$0xff]  ;;  %v1507_v25 = vld [vmem:[#allocation9 + $0x150] sm:$0xff] }
 0x26e   : > { %1416 = vmatpush.msra.mxu1 %v1395_v60  ;;  %2260 = vmatpush.msra.mxu3 %v1395_v60  ;;  %v1801_v19 = vld [vmem:[#allocation9 + $0x330] sm:$0xff]  ;;  %v1657_v26 = vld [vmem:[#allocation9 + $0x258] sm:$0xff]  ;;  %v1506_v29 = vld [vmem:[#allocation9 + $0x148] sm:$0xff] }
 0x26f   : > { %1457 = vmatpush.msra.mxu2 %v1370_v61  ;;  %1818 = vmatpush.msrb.mxu0 %v1803_v52  ;;  %v1582_v27 = vld [vmem:[#allocation9 + $0x1d0] sm:$0xff]  ;;  %v1800_v28 = vld [vmem:[#allocation9 + $0x328] sm:$0xff]  ;;  %v1505_v30 = vld [vmem:[#allocation9 + $0x140] sm:$0xff] }
 0x270   : > { %1417 = vmatpush.msra.mxu1 %v1394_v1  ;;  %2261 = vmatpush.msra.mxu3 %v1394_v1  ;;  %v1581_v32 = vld [vmem:[#allocation9 + $0x1c8] sm:$0xff]  ;;  %v1656_v36 = vld [vmem:[#allocation9 + $0x250] sm:$0xff]  ;;  %v1799_v41 = vld [vmem:[#allocation9 + $0x320] sm:$0xff] }
 0x271   : > { %1458 = vmatpush.msra.mxu2 %v1369_v5  ;;  %1819 = vmatpush.msrb.mxu0 %v1802_v58  ;;  %v1580_v45 = vld [vmem:[#allocation9 + $0x1c0] sm:$0xff]  ;;  %v3198_v47 = vld [vmem:[#allocation3 + $0x19] sm:$0xff]  ;;  %v1504_v0 = vld [vmem:[#allocation9 + $0x138] sm:$0xff] }
 0x272   : > { %1418 = vmatpush.msra.mxu1 %v1393_v3  ;;  %2262 = vmatpush.msra.mxu3 %v1393_v3  ;;  %v3196_v46 = vld [vmem:[#allocation3 + $0x49] sm:$0xff]  ;;  %v3200_v48 = vld [vmem:[#allocation3 + $0x18] sm:$0xff]  ;;  %v1503_v53 = vld [vmem:[#allocation9 + $0x130] sm:$0xff] }
 0x273   : > { %1459 = vmatpush.msra.mxu2 %v1368_v10  ;;  %1820 = vmatpush.msrb.mxu0 %v1801_v19  ;;  %v1579_v43 = vld [vmem:[#allocation9 + $0x1b8] sm:$0xff]  ;;  %v1655_v49 = vld [vmem:[#allocation9 + $0x248] sm:$0xff]  ;;  %v1578_v55 = vld [vmem:[#allocation9 + $0x1b0] sm:$0xff] }
 0x274   : > { %1419 = vmatpush.msra.mxu1 %v1392_v18  ;;  %2263 = vmatpush.msra.mxu3 %v1392_v18  ;;  %v1798_v51 = vld [vmem:[#allocation9 + $0x318] sm:$0xff]  ;;  %v1654_v57 = vld [vmem:[#allocation9 + $0x240] sm:$0xff]  ;;  %v1797_v59 = vld [vmem:[#allocation9 + $0x310] sm:$0xff] }
 0x275   : > { %1460 = vmatpush.msra.mxu2 %v1367_v12  ;;  %1821 = vmatpush.msrb.mxu0 %v1800_v28  ;;  %v1502_v54 = vld [vmem:[#allocation9 + $0x128] sm:$0xff]  ;;  %v1653_v6 = vld [vmem:[#allocation9 + $0x238] sm:$0xff]  ;;  %v1501_v63 = vld [vmem:[#allocation9 + $0x120] sm:$0xff] }
 0x276   : > { %1420 = vmatpush.msra.mxu1 %v1391_v31  ;;  %2264 = vmatpush.msra.mxu3 %v1391_v31  ;;  %v1577_v60 = vld [vmem:[#allocation9 + $0x1a8] sm:$0xff]  ;;  %v1576_v1 = vld [vmem:[#allocation9 + $0x1a0] sm:$0xff]  ;;  %v3205_v5 = vld [vmem:[#allocation3 + $0x21] sm:$0xff] }
 0x277   : > { %1461 = vmatpush.msra.mxu2 %v1366_v56  ;;  %1822 = vmatpush.msrb.mxu0 %v1799_v41  ;;  %v1796_v61 = vld [vmem:[#allocation9 + $0x308] sm:$0xff]  ;;  %v3209_v3 = vld [vmem:[#allocation3 + $0x20] sm:$0xff]  ;;  %v1500_v10 = vld [vmem:[#allocation9 + $0x118] sm:$0xff] }
 0x278   : > { %1421 = vmatpush.msra.mxu1 %v1390_v50  ;;  %2265 = vmatpush.msra.mxu3 %v1390_v50  ;;  %v1575_v11 = vld [vmem:[#allocation9 + $0x198] sm:$0xff]  ;;  %v1652_v18 = vld [vmem:[#allocation9 + $0x230] sm:$0xff]  ;;  %v1795_v33 = vld [vmem:[#allocation9 + $0x300] sm:$0xff] }
 0x279   : > { %1462 = vmatpush.msra.mxu2 %v1365_v7  ;;  %1422 = vmatmul.f32.vlgmr.msra.gmra.mxu1 %v1381_v13  ;;  %v1499_v12 = vld [vmem:[#allocation9 + $0x110] sm:$0xff]  ;;  %v1651_v56 = vld [vmem:[#allocation9 + $0x228] sm:$0xff]  ;;  %v1650_v7 = vld [vmem:[#allocation9 + $0x220] sm:$0xff] }
 0x27a   : > { %1434 = vmatmul.f32.vlgmr.msra.gmra.mxu3 %v3190_v62  ;;  %1463 = vmatmul.f32.vlgmr.msra.gmra.mxu2 %v1357_v35  ;;  %v1574_v31 = vld [vmem:[#allocation9 + $0x190] sm:$0xff]  ;;  %v1498_v37 = vld [vmem:[#allocation9 + $0x108] sm:$0xff]  ;;  %v1497_v13 = vld [vmem:[#allocation9 + $0x100] sm:$0xff] }
 0x27b   : > { %1513 = vmatpush.msrb.mxu3 %v1512_v9  ;;  %1588 = vmatpush.msrb.mxu1 %v1587_v39  ;;  %v1573_v50 = vld [vmem:[#allocation9 + $0x188] sm:$0xff]  ;;  %v3214_v35 = vld [vmem:[#allocation3 + $0x30] sm:$0xff]  ;;  %v1488_v39 = vld [vmem:[#allocation3 + $0x2] sm:$0xff] }
 0x27c   : > { %1662 = vmatpush.msrb.mxu2 %v1661_v34  ;;  %1823 = vmatpush.msrb.mxu0 %v1798_v51  ;;  %v1572_v9 = vld [vmem:[#allocation9 + $0x180] sm:$0xff]  ;;  %v1735_v34 = vld [vmem:[#allocation9 + $0x2f8] sm:$0xff]  ;;  %v3229_v58 = vld [vmem:[#allocation3 + $0x38] sm:$0xff] }
 0x27d   : > { %1514 = vmatpush.msrb.mxu3 %v1511_v40  ;;  %1589 = vmatpush.msrb.mxu1 %v1586_v42  ;;  %v3217_v38 = vld [vmem:[#allocation9 + $0x3f8] sm:$0xff]  ;;  %v1734_v42 = vld [vmem:[#allocation9 + $0x2f0] sm:$0xff]  ;;  %v1729_v41 = vld [vmem:[#allocation9 + $0x2c8] sm:$0xff] }
 0x27e   : > { %1663 = vmatpush.msrb.mxu2 %v1660_v44  ;;  %1824 = vmatpush.msrb.mxu0 %v1797_v59  ;;  %v1649_v40 = vld [vmem:[#allocation9 + $0x218] sm:$0xff]  ;;  %v3221_v44 = vld [vmem:[#allocation9 + $0x3f0] sm:$0xff]  ;;  %v3278_v51 = vld [vmem:[#allocation9 + $0x3a8] sm:$0xff] }
 0x27f   : > { %1515 = vmatpush.msrb.mxu3 %v1510_v14  ;;  %1590 = vmatpush.msrb.mxu1 %v1585_v16  ;;  %v3223_v52 = vld [vmem:[#allocation9 + $0x478] sm:$0xff]  ;;  %v1648_v14 = vld [vmem:[#allocation9 + $0x210] sm:$0xff]  ;;  %v1733_v16 = vld [vmem:[#allocation9 + $0x2e8] sm:$0xff] }
 0x280   : > { %1664 = vmatpush.msrb.mxu2 %v1659_v15  ;;  %1825 = vmatpush.msrb.mxu0 %v1796_v61  ;;  %v3226_v15 = vld [vmem:[#allocation9 + $0x3e8] sm:$0xff]  ;;  %v3244_v19 = vld [vmem:[#allocation9 + $0x3d0] sm:$0xff]  ;;  %v3252_v28 = vld [vmem:[#allocation3 + $0x48] sm:$0xff] }
 0x281   : > { %1516 = vmatpush.msrb.mxu3 %v1509_v2  ;;  %1591 = vmatpush.msrb.mxu1 %v1584_v8  ;;  %v1647_v2 = vld [vmem:[#allocation9 + $0x208] sm:$0xff]  ;;  %v3232_v8 = vld [vmem:[#allocation9 + $0x470] sm:$0xff]  ;;  %v3290_v59 = vld [vmem:[#allocation9 + $0x3a0] sm:$0xff] }
 0x282   : > { %1425 = vmatmul.f32.gmra.mxu1 %v1382_v20  ;;  %1437 = vmatmul.f32.gmra.mxu3 %v3193_v21  ;;  %v1489_v20 = vld [vmem:[#allocation3 + $0xa] sm:$0xff]  ;;  %v3301_v61 = vld [vmem:[#allocation9 + $0x448] sm:$0xff] }
 0x283   : > { %1466 = vmatmul.f32.gmra.mxu2 %v1358_v23  ;;  %1517 = vmatpush.msrb.mxu3 %v1508_v24  ;;  %v3235_v23 = vld [vmem:[#allocation9 + $0x3e0] sm:$0xff] }
 0x284   : > { %1592 = vmatpush.msrb.mxu1 %v1583_v17  ;;  %1665 = vmatpush.msrb.mxu2 %v1658_v22  ;;  %v1732_v24 = vld [vmem:[#allocation9 + $0x2e0] sm:$0xff]  ;;  %v3238_v17 = vld [vmem:[#allocation9 + $0x3d8] sm:$0xff] }
 0x285   : > { %1518 = vmatpush.msrb.mxu3 %v1507_v25  ;;  %1826 = vmatpush.msrb.mxu0 %v1795_v33  ;;  %v1646_v22 = vld [vmem:[#allocation9 + $0x200] sm:$0xff]  ;;  %v1731_v25 = vld [vmem:[#allocation9 + $0x2d8] sm:$0xff] }
 0x286   : > { %1593 = vmatpush.msrb.mxu1 %v1582_v27  ;;  %1666 = vmatpush.msrb.mxu2 %v1657_v26  ;;  %v3246_v27 = vld [vmem:[#allocation9 + $0x468] sm:$0xff]  ;;  %v1730_v26 = vld [vmem:[#allocation9 + $0x2d0] sm:$0xff]  ;;  %v1723_v33 = vld [vmem:[#allocation9 + $0x298] sm:$0xff] }
 0x287   : > { %1519 = vmatpush.msrb.mxu3 %v1506_v29  ;;  %1827 = vmatmul.f32.vlgmr.msrb.gmra.mxu0 %v3214_v35  ;;  %v3249_v29 = vld [vmem:[#allocation9 + $0x3c8] sm:$0xff] }
 0x288   : > { %1594 = vmatpush.msrb.mxu1 %v1581_v32  ;;  %1667 = vmatpush.msrb.mxu2 %v1656_v36  ;;  %v3255_v32 = vld [vmem:[#allocation9 + $0x460] sm:$0xff]  ;;  %v3257_v36 = vld [vmem:[#allocation3 + $0x1a] sm:$0xff] }
 0x289   : > { %1520 = vmatpush.msrb.mxu3 %v1505_v30  ;;  %1959 = vmatpush.msra.mxu0 %v3223_v52  ;;  %v3261_v30 = vld [vmem:[#allocation9 + $0x3c0] sm:$0xff] }
 0x28a   : > { %1595 = vmatpush.msrb.mxu1 %v1580_v45  ;;  %1440 = vmatmul.f32.gmra.mxu3 %v3196_v46  ;;  %v3265_v45 = vld [vmem:[#allocation9 + $0x3b8] sm:$0xff] }
 0x28b   : > { %1428 = vmatmul.f32.gmra.mxu1 %v3198_v47  ;;  %1469 = vmatmul.f32.gmra.mxu2 %v3200_v48 }
 0x28c   : > { %1521 = vmatpush.msrb.mxu3 %v1504_v0  ;;  %1596 = vmatpush.msrb.mxu1 %v1579_v43  ;;  %v3272_v0 = vld [vmem:[#allocation9 + $0x3b0] sm:$0xff]  ;;  %v3274_v43 = vld [vmem:[#allocation9 + $0x458] sm:$0xff] }
 0x28d   : > { %1668 = vmatpush.msrb.mxu2 %v1655_v49  ;;  %1960 = vmatpush.msra.mxu0 %v3232_v8  ;;  %v1727_v49 = vld [vmem:[#allocation9 + $0x2b8] sm:$0xff] }
 0x28e   : > { %1522 = vmatpush.msrb.mxu3 %v1503_v53  ;;  %1597 = vmatpush.msrb.mxu1 %v1578_v55  ;;  %v3281_v53 = vld [vmem:[#allocation3 + $0x50] sm:$0xff]  ;;  %v3284_v55 = vld [vmem:[#allocation9 + $0x450] sm:$0xff] }
 0x28f   : > { %1669 = vmatpush.msrb.mxu2 %v1654_v57  ;;  %1830 = vmatmul.f32.gmra.mxu0 %v3229_v58  ;;  %v3286_v57 = vld [vmem:[#allocation3 + $0x22] sm:$0xff] }
 0x290   : > { %1523 = vmatpush.msrb.mxu3 %v1502_v54  ;;  %1598 = vmatpush.msrb.mxu1 %v1577_v60  ;;  %v1726_v54 = vld [vmem:[#allocation9 + $0x2b0] sm:$0xff]  ;;  %v1725_v60 = vld [vmem:[#allocation9 + $0x2a8] sm:$0xff] }
 0x291   : > { %1670 = vmatpush.msrb.mxu2 %v1653_v6  ;;  %1961 = vmatpush.msra.mxu0 %v3246_v27  ;;  %v3299_v6 = vld [vmem:[#allocation9 + $0x398] sm:$0xff] }
 0x292   : > { %1524 = vmatpush.msrb.mxu3 %v1501_v63  ;;  %1599 = vmatpush.msrb.mxu1 %v1576_v1  ;;  %v3303_v63 = vld [vmem:[#allocation3 + $0x60] sm:$0xff] }
 0x293   : > { %1431 = vmatmul.f32.gmra.mxu1 %v3205_v5  ;;  %1443 = vmatmul.f32.gmra.mxu3 %v3207_v4  ;;  %v3306_v1 = vld [vmem:[#allocation9 + $0x390] sm:$0xff] }
 0x294   : > { %1472 = vmatmul.f32.gmra.mxu2 %v3209_v3  ;;  %1525 = vmatpush.msrb.mxu3 %v1500_v10  ;;  %v3310_v10 = vld [vmem:[#allocation9 + $0x440] sm:$0xff] }
 0x295   : > { %1600 = vmatpush.msrb.mxu1 %v1575_v11  ;;  %1671 = vmatpush.msrb.mxu2 %v1652_v18  ;;  %v3313_v11 = vld [vmem:[#allocation9 + $0x388] sm:$0xff] }
 0x296   : > { %1526 = vmatpush.msrb.mxu3 %v1499_v12  ;;  %1962 = vmatpush.msra.mxu0 %v3255_v32  ;;  %v3315_v18 = vld [vmem:[#allocation3 + $0x32] sm:$0xff]  ;;  %v3319_v12 = vld [vmem:[#allocation9 + $0x438] sm:$0xff] }
 0x297   : > { %1601 = vmatpush.msrb.mxu1 %v1574_v31  ;;  %1672 = vmatpush.msrb.mxu2 %v1651_v56  ;;  %v3324_v31 = vld [vmem:[#allocation9 + $0x380] sm:$0xff]  ;;  %v3328_v56 = vld [vmem:[#allocation9 + $0x430] sm:$0xff] }
 0x298   : > { %1527 = vmatpush.msrb.mxu3 %v1498_v37  ;;  %1833 = vmatmul.f32.gmra.mxu0 %v3252_v28  ;;  %v1722_v37 = vld [vmem:[#allocation9 + $0x290] sm:$0xff] }
 0x299   : > { %1602 = vmatpush.msrb.mxu1 %v1573_v50  ;;  %1673 = vmatpush.msrb.mxu2 %v1650_v7  ;;  %v1791_v50 = vld [vmem:[#allocation3 + $0x68] sm:$0xff]  ;;  %v1721_v7 = vld [vmem:[#allocation9 + $0x288] sm:$0xff] }
 0x29a   : > { %1528 = vmatpush.msrb.mxu3 %v1497_v13  ;;  %1963 = vmatpush.msra.mxu0 %v3274_v43  ;;  %v1948_v13 = vld [vmem:[#allocation9 + $0x428] sm:$0xff] }
 0x29b   : > { %1603 = vmatpush.msrb.mxu1 %v1572_v9  ;;  %1529 = vmatmul.f32.vlgmr.msrb.gmra.mxu3 %v1488_v39  ;;  %v1947_v9 = vld [vmem:[#allocation9 + $0x420] sm:$0xff]  ;;  %v1946_v39 = vld [vmem:[#allocation9 + $0x418] sm:$0xff] }
 0x29c   : > { %1475 = vmatmul.f32.gmra.mxu2 %v3214_v35  ;;  %1604 = vmatmul.f32.vlgmr.msrb.gmra.mxu1 %v3200_v48  ;;  %v1728_v48 = vld [vmem:[#allocation9 + $0x2c0] sm:$0xff] }
 0x29d   : > { %1736 = vmatpush.msra.mxu3 %v1735_v34  ;;  %1885 = vmatpush.msra.mxu1 %v3217_v38  ;;  %v1945_v34 = vld [vmem:[#allocation9 + $0x410] sm:$0xff] }
 0x29e   : > { %1674 = vmatpush.msrb.mxu2 %v1649_v40  ;;  %1964 = vmatpush.msra.mxu0 %v3284_v55  ;;  %v1792_v40 = vld [vmem:[#allocation3 + $0x78] sm:$0xff] }
 0x29f   : > { %1737 = vmatpush.msra.mxu3 %v1734_v42  ;;  %1886 = vmatpush.msra.mxu1 %v3221_v44  ;;  %v1944_v42 = vld [vmem:[#allocation9 + $0x408] sm:$0xff] }
 0x2a0   : > { %1675 = vmatpush.msrb.mxu2 %v1648_v14  ;;  %1836 = vmatmul.f32.gmra.mxu0 %v3281_v53  ;;  %v1943_v14 = vld [vmem:[#allocation9 + $0x400] sm:$0xff] }
 0x2a1   : > { %1738 = vmatpush.msra.mxu3 %v1733_v16  ;;  %1887 = vmatpush.msra.mxu1 %v3226_v15 }
 0x2a2   : > { %1676 = vmatpush.msrb.mxu2 %v1647_v2  ;;  %1965 = vmatpush.msra.mxu0 %v3301_v61 }
 0x2a3   : > { %1532 = vmatmul.f32.gmra.mxu3 %v1489_v20  ;;  %1888 = vmatpush.msra.mxu1 %v3235_v23 }
 0x2a4   : > { %1478 = vmatmul.f32.gmra.mxu2 %v3229_v58  ;;  %1607 = vmatmul.f32.gmra.mxu1 %v3209_v3  ;;  %v1724_v3 = vld [vmem:[#allocation9 + $0x2a0] sm:$0xff] }
 0x2a5   : > { %1739 = vmatpush.msra.mxu3 %v1732_v24  ;;  %1889 = vmatpush.msra.mxu1 %v3238_v17 }
 0x2a6   : > { %1677 = vmatpush.msrb.mxu2 %v1646_v22  ;;  %1966 = vmatpush.msra.mxu0 %v3310_v10  ;;  %v1939_v22 = vld [vmem:[#allocation3 + $0x6a] sm:$0xff] }
 0x2a7   : > { %1740 = vmatpush.msra.mxu3 %v1731_v25  ;;  %1890 = vmatpush.msra.mxu1 %v3244_v19 }
 0x2a8   : > { %2283 = vmatpush.msra.mxu2 %v3223_v52  ;;  %1839 = vmatmul.f32.gmra.mxu0 %v3303_v63 }
 0x2a9   : > { %1741 = vmatpush.msra.mxu3 %v1730_v26  ;;  %1891 = vmatpush.msra.mxu1 %v3249_v29  ;;  %v1940_v26 = vld [vmem:[#allocation3 + $0x7a] sm:$0xff] }
 0x2aa   : > { %2285 = vmatpush.msra.mxu2 %v3232_v8  ;;  %1967 = vmatpush.msra.mxu0 %v3319_v12 }
 0x2ab   : > { %1535 = vmatmul.f32.gmra.mxu3 %v3257_v36  ;;  %1892 = vmatpush.msra.mxu1 %v3261_v30 }
 0x2ac   : > { %1481 = vmatmul.f32.gmra.mxu2 %v3252_v28  ;;  %1610 = vmatmul.f32.gmra.mxu1 %v3214_v35  ;;  %v3336_v35 = vld [vmem:[#allocation3 + $0x3a] sm:$0xff] }
 0x2ad   : > { %1742 = vmatpush.msra.mxu3 %v1729_v41  ;;  %1893 = vmatpush.msra.mxu1 %v3265_v45 }
 0x2ae   : > { %2287 = vmatpush.msra.mxu2 %v3246_v27  ;;  %1968 = vmatpush.msra.mxu0 %v3328_v56 }
 0x2af   : > { %1743 = vmatpush.msra.mxu3 %v1728_v48  ;;  %1894 = vmatpush.msra.mxu1 %v3272_v0 }
 0x2b0   : > { %2289 = vmatpush.msra.mxu2 %v3255_v32  ;;  %1842 = vmatmul.f32.gmra.mxu0 %v1791_v50 }
 0x2b1   : > { %1744 = vmatpush.msra.mxu3 %v1727_v49  ;;  %1895 = vmatpush.msra.mxu1 %v3278_v51 }
 0x2b2   : > { %2291 = vmatpush.msra.mxu2 %v3274_v43  ;;  %1969 = vmatpush.msra.mxu0 %v1948_v13 }
 0x2b3   : > { %1538 = vmatmul.f32.gmra.mxu3 %v3286_v57  ;;  %1896 = vmatpush.msra.mxu1 %v3290_v59 }
 0x2b4   : > { %1484 = vmatmul.f32.gmra.mxu2 %v3281_v53  ;;  %1613 = vmatmul.f32.gmra.mxu1 %v3229_v58 }
 0x2b5   : > { %1745 = vmatpush.msra.mxu3 %v1726_v54  ;;  %2293 = vmatpush.msra.mxu2 %v3284_v55 }
 0x2b6   : > { %1897 = vmatpush.msra.mxu1 %v3299_v6  ;;  %1970 = vmatpush.msra.mxu0 %v1947_v9 }
 0x2b7   : > { %1746 = vmatpush.msra.mxu3 %v1725_v60  ;;  %2295 = vmatpush.msra.mxu2 %v3301_v61 }
 0x2b8   : > { %1898 = vmatpush.msra.mxu1 %v3306_v1  ;;  %1971 = vmatpush.msra.mxu0 %v1946_v39 }
 0x2b9   : > { %1747 = vmatpush.msra.mxu3 %v1724_v3  ;;  %2297 = vmatpush.msra.mxu2 %v3310_v10 }
 0x2ba   : > { %1899 = vmatpush.msra.mxu1 %v3313_v11  ;;  %1972 = vmatpush.msra.mxu0 %v1945_v34 }
 0x2bb   : > { %1541 = vmatmul.f32.gmra.mxu3 %v3315_v18  ;;  %2299 = vmatpush.msra.mxu2 %v3319_v12 }
 0x2bc   : > { %1616 = vmatmul.f32.gmra.mxu1 %v3252_v28  ;;  %1678 = vmatmul.f32.vlgmr.msrb.gmra.mxu2 %v3198_v47  ;;  %v1720_v47 = vld [vmem:[#allocation9 + $0x280] sm:$0xff] }
 0x2bd   : > { %1748 = vmatpush.msra.mxu3 %v1723_v33  ;;  %1900 = vmatpush.msra.mxu1 %v3324_v31 }
 0x2be   : > { %2301 = vmatpush.msra.mxu2 %v3328_v56  ;;  %1845 = vmatmul.f32.gmra.mxu0 %v1792_v40 }
 0x2bf   : > { %1749 = vmatpush.msra.mxu3 %v1722_v37  ;;  %2282 = vmatpush.msrb.mxu1 %v3223_v52  ;;  %v3345_v52 = vld [vmem:[#allocation3 + $0x4a] sm:$0xff] }
 0x2c0   : > { %2303 = vmatpush.msra.mxu2 %v1948_v13  ;;  %1973 = vmatpush.msra.mxu0 %v1944_v42 }
 0x2c1   : > { %1750 = vmatpush.msra.mxu3 %v1721_v7  ;;  %2284 = vmatpush.msrb.mxu1 %v3232_v8  ;;  %v1938_v8 = vld [vmem:[#allocation3 + $0x62] sm:$0xff] }
 0x2c2   : > { %2305 = vmatpush.msra.mxu2 %v1947_v9  ;;  %1974 = vmatpush.msra.mxu0 %v1943_v14 }
 0x2c3   : > { %1544 = vmatmul.f32.gmra.mxu3 %v3336_v35  ;;  %2286 = vmatpush.msrb.mxu1 %v3246_v27 }
 0x2c4   : > { %1619 = vmatmul.f32.gmra.mxu1 %v3281_v53  ;;  %1681 = vmatmul.f32.gmra.mxu2 %v3205_v5  ;;  %v1793_v5 = vld [vmem:[#allocation3 + $0x80] sm:$0xff] }
 0x2c5   : > { %1751 = vmatpush.msra.mxu3 %v1720_v47  ;;  %2307 = vmatpush.msra.mxu2 %v1946_v39 }
 0x2c6   : > { %2288 = vmatpush.msrb.mxu1 %v3255_v32  ;;  %1848 = vmatmul.f32.gmra.mxu0 %v1793_v5 }
 0x2c7   : > { %2266 = vmatpush.msrb.mxu3 %v3217_v38  ;;  %2309 = vmatpush.msra.mxu2 %v1945_v34  ;;  %v1495_v38 = vld [vmem:[#allocation3 + $0x52] sm:$0xff] }
 0x2c8   : > { %2290 = vmatpush.msrb.mxu1 %v3274_v43 }
 0x2c9   : > { %2267 = vmatpush.msrb.mxu3 %v3221_v44  ;;  %2311 = vmatpush.msra.mxu2 %v1944_v42  ;;  %v1644_v44 = vld [vmem:[#allocation3 + $0x69] sm:$0xff] }
 0x2ca   : > { %2292 = vmatpush.msrb.mxu1 %v3284_v55 }
 0x2cb   : > { %2268 = vmatpush.msrb.mxu3 %v3226_v15  ;;  %2313 = vmatpush.msra.mxu2 %v1943_v14 }
 0x2cc   : > { %1547 = vmatmul.f32.gmra.mxu3 %v3345_v52  ;;  %1622 = vmatmul.f32.gmra.mxu1 %v3303_v63 }
 0x2cd   : > { %1684 = vmatmul.f32.gmra.mxu2 %v3190_v62  ;;  %2269 = vmatpush.msrb.mxu3 %v3235_v23 }
 0x2ce   : > { %2294 = vmatpush.msrb.mxu1 %v3301_v61  ;;  %1975 = vmatmul.f32.vlgmr.msra.gmra.mxu0 %v3315_v18 }
 0x2cf   : > { %2270 = vmatpush.msrb.mxu3 %v3238_v17  ;;  %v1866_v17 = vld [vmem:[#allocation3 + $0x79] sm:$0xff] }
 0x2d0   : > { %2296 = vmatpush.msrb.mxu1 %v3310_v10 }
 0x2d1   : > { %2271 = vmatpush.msrb.mxu3 %v3244_v19 }
 0x2d2   : > { %2298 = vmatpush.msrb.mxu1 %v3319_v12 }
 0x2d3   : > { %2272 = vmatpush.msrb.mxu3 %v3249_v29 }
 0x2d4   : > { %1550 = vmatmul.f32.gmra.mxu3 %v1495_v38  ;;  %1625 = vmatmul.f32.gmra.mxu1 %v1791_v50 }
 0x2d5   : > { %1687 = vmatmul.f32.gmra.mxu2 %v3193_v21  ;;  %2273 = vmatpush.msrb.mxu3 %v3261_v30  ;;  %v1867_v30 = vld [vmem:[#allocation3 + $0x81] sm:$0xff] }
 0x2d6   : > { %2300 = vmatpush.msrb.mxu1 %v3328_v56 }
 0x2d7   : > { %2274 = vmatpush.msrb.mxu3 %v3265_v45  ;;  %v1941_v45 = vld [vmem:[#allocation3 + $0x82] sm:$0xff] }
 0x2d8   : > { %2302 = vmatpush.msrb.mxu1 %v1948_v13 }
 0x2d9   : > { %2275 = vmatpush.msrb.mxu3 %v3272_v0 }
 0x2da   : > { %2304 = vmatpush.msrb.mxu1 %v1947_v9 }
 0x2db   : > { %2276 = vmatpush.msrb.mxu3 %v3278_v51 }
 0x2dc   : > { %1752 = vmatmul.f32.vlgmr.msra.gmra.mxu3 %v3257_v36  ;;  %1901 = vmatmul.f32.vlgmr.msra.gmra.mxu1 %v3190_v62  ;;  %v1643_v62 = vld [vmem:[#allocation3 + $0x61] sm:$0xff] }
 0x2dd   : > { %1690 = vmatmul.f32.gmra.mxu2 %v3196_v46  ;;  %2306 = vmatpush.msrb.mxu1 %v1946_v39 }
 0x2de   : > { %2277 = vmatpush.msrb.mxu3 %v3290_v59 }
 0x2df   : > { %2308 = vmatpush.msrb.mxu1 %v1945_v34 }
 0x2e0   : > { %2278 = vmatpush.msrb.mxu3 %v3299_v6 }
 0x2e1   : > { %2310 = vmatpush.msrb.mxu1 %v1944_v42 }
 0x2e2   : > { %2279 = vmatpush.msrb.mxu3 %v3306_v1 }
 0x2e3   : > { %2312 = vmatpush.msrb.mxu1 %v1943_v14 }
 0x2e4   : > { %1755 = vmatmul.f32.gmra.mxu3 %v3286_v57  ;;  %1904 = vmatmul.f32.gmra.mxu1 %v3193_v21 }
 0x2e5   : > { %1693 = vmatmul.f32.gmra.mxu2 %v3207_v4  ;;  %2280 = vmatpush.msrb.mxu3 %v3313_v11 }
 0x2e7   : > { %2281 = vmatpush.msrb.mxu3 %v3324_v31 }
 0x2ec   : > { %1758 = vmatmul.f32.gmra.mxu3 %v3315_v18  ;;  %1907 = vmatmul.f32.gmra.mxu1 %v3196_v46 }
 0x2ed   : > { %1696 = vmatmul.f32.gmra.mxu2 %v1643_v62 }
 0x2f4   : > { %1761 = vmatmul.f32.gmra.mxu3 %v3336_v35  ;;  %1910 = vmatmul.f32.gmra.mxu1 %v3207_v4 }
 0x2f5   : > { %1699 = vmatmul.f32.gmra.mxu2 %v1644_v44 }
 0x2f6   : > { %v1423_v21 = vpop.f32.mrf.mxu1 }
 0x2fc   : > { %1764 = vmatmul.f32.gmra.mxu3 %v3345_v52  ;;  %1913 = vmatmul.f32.gmra.mxu1 %v1643_v62 }
 0x2fd   : > { %1984 = vmatmul.f32.vlgmr.msra.gmra.mxu2 %v1495_v38  ;;  %v1435_v16 = vpop.f32.mrf.mxu3  ;;  %v1464_v15 = vpop.f32.mrf.mxu2 }
 0x2fe   : > { %v1465_v58 = vadd.f32 %v1464_v15, %v1423_v21 }
 0x2ff   : > { %v1426_v2 = vpop.f32.mrf.mxu1 }
 0x304   : > { %1767 = vmatmul.f32.gmra.mxu3 %v1495_v38  ;;  %1916 = vmatmul.f32.gmra.mxu1 %v1644_v44  ;;  %v3386_v29 = vpop.f32.mrf.mxu0 }
 0x305   : > { %1987 = vmatmul.f32.gmra.mxu2 %v1938_v8  ;;  %v1438_v46 = vpop.f32.mrf.mxu3 }
 0x306   : > { %v1467_v20 = vpop.f32.mrf.mxu2 }
 0x307   : > { %v1468_v23 = vadd.f32 %v1467_v20, %v1426_v2 }
 0x308   : > { %v1429_v24 = vpop.f32.mrf.mxu1 }
 0x30c   : > { %1770 = vmatmul.f32.gmra.mxu3 %v1938_v8  ;;  %1919 = vmatmul.f32.gmra.mxu1 %v1866_v17  ;;  %v3389_v48 = vpop.f32.mrf.mxu0 }
 0x30d   : > { %1990 = vmatmul.f32.gmra.mxu2 %v1939_v22  ;;  %v1441_v4 = vpop.f32.mrf.mxu3 }
 0x30e   : > { %v1470_v25 = vpop.f32.mrf.mxu2 }
 0x30f   : > { %v1471_v19 = vadd.f32 %v1470_v25, %v1429_v24 }
 0x310   : > { %v1432_v27 = vpop.f32.mrf.mxu1 }
 0x314   : > { %1773 = vmatmul.f32.gmra.mxu3 %v1939_v22  ;;  %1978 = vmatmul.f32.vlgmr.msrb.gmra.mxu1 %v3336_v35 }
 0x315   : > { %1993 = vmatmul.f32.gmra.mxu2 %v1940_v26  ;;  %v3391_v59 = vpop.f32.mrf.mxu0 }
 0x316   : > { %v1444_v28 = vpop.f32.mrf.mxu3 }
 0x317   : > { %v1473_v32 = vpop.f32.mrf.mxu2 }
 0x318   : > { %v1474_v36 = vadd.f32 %v1473_v32, %v1432_v27 }
 0x319   : > { %v1605_v41 = vpop.f32.mrf.mxu1 }
 0x31c   : > { %1922 = vmatmul.f32.vlgmr.msrb.gmra.mxu3 %v1867_v30  ;;  %1981 = vmatmul.f32.gmra.mxu1 %v3345_v52 }
 0x31d   : > { %1996 = vmatmul.f32.gmra.mxu2 %v1941_v45  ;;  %v3393_v18 = vpop.f32.mrf.mxu0 }
 0x31e   : > { %v1530_v0 = vpop.f32.mrf.mxu3 }
 0x31f   : > { %v1476_v43 = vpop.f32.mrf.mxu2  ;;  %v1554_v49 = vadd.f32 %v1530_v0, %v1465_v58  ;;  %v3416_v0 = vld [vmem:[%s3559_s14] ss:$0 sm:$0xff]  ;;  %s2558_s14 = scalar_lea.hbm %s3561_s19, 512 }
 0x320   : > { %v1477_v51 = vadd.f32 %v1476_v43, %v1435_v16 }
 0x321   : > { %v1608_v53 = vpop.f32.mrf.mxu1  ;;  %v1629_v55 = vadd.f32 %v1605_v41, %v1554_v49  ;;  %v3411_v41 = vld [vmem:[%s3558_s8] ss:$0 sm:$0xff]  ;;  %s2552_s8 = sshra.s32 %s2083_s6, 4  ;;  %s2553_s8 = int_to_ptr.hbm [resolvable:$true] %s2552_s8 }
 0x322   : > { %s2554_s17 = scalar_lea.hbm %s2553_s8, 64  ;;  %p2559_p3 = scmp.lt.s32.totalorder %s2553_s8, %s3561_s19 }
 0x323   : > { %p2555_p11 = scmp.ne.s32.totalorder %s2553_s8, %s2554_s17  ;;  %p2560_p5 = scmp.lt.s32.totalorder %s2558_s14, %s2554_s17 }
 0x325   : > { %v1840_v35 = vpop.f32.mrf.mxu0  ;;  %p2556_p0 = pnand %p2555_p11, %p2785_p6  ;;  %p2561_p7 = por %p2560_p5, %p2559_p3 }
 0x326   : > { %v1533_v57 = vpop.f32.mrf.mxu3 }
 0x327   : > { %v1479_v54 = vpop.f32.mrf.mxu2  ;;  %v1555_v60 = vadd.f32 %v1533_v57, %v1468_v23  ;;  %p2557_p2 = pneg %p2556_p0 }
 0x328   : > { %v1480_v6 = vadd.f32 %v1479_v54, %v1438_v46 }
 0x329   : > { %v1611_v61 = vpop.f32.mrf.mxu1  ;;  %v1630_v63 = vadd.f32 %v1608_v53, %v1555_v60  ;;  %p2562_p8 = pnand %p2561_p7, %p2557_p2 }
 0x32d   : > { %v3395_v42 = vpop.f32.mrf.mxu0 }
 0x32e   : > { %v1536_v1 = vpop.f32.mrf.mxu3 }
 0x32f   : > { %v1482_v3 = vpop.f32.mrf.mxu2  ;;  %v1556_v10 = vadd.f32 %v1536_v1, %v1471_v19 }
 0x330   : > { %v1483_v11 = vadd.f32 %v1482_v3, %v1441_v4 }
 0x331   : > { %v1614_v12 = vpop.f32.mrf.mxu1  ;;  %v1631_v33 = vadd.f32 %v1611_v61, %v1556_v10 }
 0x336   : > { %v1539_v31 = vpop.f32.mrf.mxu3 }
 0x337   : > { %v1485_v56 = vpop.f32.mrf.mxu2  ;;  %v1557_v37 = vadd.f32 %v1539_v31, %v1474_v36 }
 0x338   : > { %v1486_v50 = vadd.f32 %v1485_v56, %v1444_v28 }
 0x339   : > { %v1617_v7 = vpop.f32.mrf.mxu1  ;;  %v1632_v13 = vadd.f32 %v1614_v12, %v1557_v37 }
 0x33b   : > { %v3397_v16 = vpop.f32.mrf.mxu0 }
 0x33e   : > { %v1542_v9 = vpop.f32.mrf.mxu3 }
 0x33f   : > { %v1558_v47 = vadd.f32 %v1542_v9, %v1477_v51  ;;  %v1679_v39 = vpop.f32.mrf.mxu2 }
 0x340   : > { %v1703_v25 = vadd.f32 %v1679_v39, %v1629_v55 }
 0x341   : > { %v1620_v34 = vpop.f32.mrf.mxu1  ;;  %v1633_v40 = vadd.f32 %v1617_v7, %v1558_v47 }
 0x343   : > { %v3403_v17 = vpop.f32.mrf.mxu0 }
 0x346   : > { %v1545_v52 = vpop.f32.mrf.mxu3 }
 0x347   : > { %v1559_v14 = vadd.f32 %v1545_v52, %v1480_v6  ;;  %v1682_v5 = vpop.f32.mrf.mxu2 }
 0x348   : > { %v1704_v38 = vadd.f32 %v1682_v5, %v1630_v63 }
 0x349   : > { %v1623_v62 = vpop.f32.mrf.mxu1  ;;  %v1634_v44 = vadd.f32 %v1620_v34, %v1559_v14  ;;  %v2011_v34 = vld [vmem:[%s2907_s20 + $0x18] sm:$0xff] }
 0x34b   : > { %v1976_v36 = vpop.f32.mrf.mxu0 }
 0x34f   : > { %v1548_v21 = vpop.f32.mrf.mxu3 }
 0x350   : > { %v1560_v15 = vadd.f32 %v1548_v21, %v1483_v11  ;;  %v1685_v58 = vpop.f32.mrf.mxu2 }
 0x351   : > { %v3399_v2 = vadd.f32 %v1685_v58, %v1631_v33  ;;  %v1626_v8 = vpop.f32.mrf.mxu1 }
 0x352   : > { %v3401_v46 = vadd.f32 %v1623_v62, %v1560_v15 }
 0x357   : > { %v1551_v20 = vpop.f32.mrf.mxu3 }
 0x358   : > { %v1561_v23 = vadd.f32 %v1551_v20, %v1486_v50  ;;  %v1688_v24 = vpop.f32.mrf.mxu2 }
 0x359   : > { %v1902_v22 = vpop.f32.mrf.mxu1  ;;  %v1706_v63 = vadd.f32 %v1688_v24, %v1632_v13 }
 0x35a   : > { %v3405_v4 = vadd.f32 %v1626_v8, %v1561_v23  ;;  %v2012_v23 = vld [vmem:[%s2907_s20 + $0x20] sm:$0xff] }
 0x35f   : > { %v1753_v19 = vpop.f32.mrf.mxu3 }
 0x360   : > { %v1691_v27 = vpop.f32.mrf.mxu2  ;;  %v1777_v26 = vadd.f32 %v1753_v19, %v1703_v25 }
 0x361   : > { %v1905_v32 = vpop.f32.mrf.mxu1  ;;  %v1707_v33 = vadd.f32 %v1691_v27, %v1633_v40 }
 0x362   : > { %v1852_v28 = vadd.f32 %v3386_v29, %v1777_v26  ;;  %v2008_v29 = vld [vmem:[%s2907_s20] sm:$0xff] }
 0x364   : > { %v1926_v30 = vadd.f32 %v1902_v22, %v1852_v28 }
 0x366   : > { %v2000_v45 = vadd.f32 %v1976_v36, %v1926_v30 }
 0x367   : > { %v1756_v43 = vpop.f32.mrf.mxu3 }
 0x368   : > { %v2020_v49 = vmul.f32 %v3411_v41, %v2000_v45  ;;  %v1694_v51 = vpop.f32.mrf.mxu2  ;;  %v1778_v21 = vadd.f32 %v1756_v43, %v1704_v38 }
 0x369   : > { %v3421_v55 = vpop.f32.mrf.mxu1  ;;  %v1708_v52 = vadd.f32 %v1694_v51, %v1634_v44  ;;  %v2013_v51 = vld [vmem:[%s2907_s20 + $0x28] sm:$0xff] }
 0x36a   : > { %v2032_v53 = vadd.f32 %v3416_v0, %v2020_v49  ;;  %v1853_v24 = vadd.f32 %v3389_v48, %v1778_v21 }
 0x36c   : > { %v2040_v57 = vadd.f32 %v2032_v53, %v2008_v29  ;;  %v1927_v30 = vadd.f32 %v1905_v32, %v1853_v24  ;;  %v2009_v32 = vld [vmem:[%s2907_s20 + $0x8] sm:$0xff] }
 0x36e   : > { %v2048_v54 = vmax.f32 %v2040_v57, 0.0 }
 0x36f   : > { %v1759_v60 = vpop.f32.mrf.mxu3 }
 0x370   : > { %2056 = vst [vmem:[%s2923_s12] sm:$0xff] %v2048_v54  ;;  %v1697_v6 = vpop.f32.mrf.mxu2  ;;  %v1779_v28 = vadd.f32 %v1759_v60, %v3399_v2 }
 0x371   : > { %v1911_v61 = vpop.f32.mrf.mxu1  ;;  %v1709_v22 = vadd.f32 %v1697_v6, %v3401_v46 }
 0x372   : > { %v1854_v46 = vadd.f32 %v3391_v59, %v1779_v28 }
 0x377   : > { %v1762_v1 = vpop.f32.mrf.mxu3 }
 0x378   : > { %v1700_v3 = vpop.f32.mrf.mxu2  ;;  %v1780_v10 = vadd.f32 %v1762_v1, %v1706_v63 }
 0x379   : > { %v1914_v11 = vpop.f32.mrf.mxu1  ;;  %v1710_v2 = vadd.f32 %v1700_v3, %v3405_v4 }
 0x37a   : > { %v1855_v12 = vadd.f32 %v3393_v18, %v1780_v10  ;;  %v1928_v10 = vadd.f32 %v3421_v55, %v1854_v46  ;;  %v2010_v55 = vld [vmem:[%s2907_s20 + $0x10] sm:$0xff] }
 0x37c   : > { %v1929_v56 = vadd.f32 %v1911_v61, %v1855_v12 }
 0x37f   : > { %v1765_v31 = vpop.f32.mrf.mxu3 }
 0x380   : > { %v1781_v37 = vadd.f32 %v1765_v31, %v1707_v33  ;;  %v1985_v50 = vpop.f32.mrf.mxu2  ;;  %v2014_v31 = vld [vmem:[%s2907_s20 + $0x30] sm:$0xff] }
 0x381   : > { %v2003_v7 = vadd.f32 %v1985_v50, %v1929_v56  ;;  %v1917_v9 = vpop.f32.mrf.mxu1 }
 0x382   : > { %v1856_v47 = vadd.f32 %v1840_v35, %v1781_v37 }
 0x383   : > { %v2023_v39 = vmul.f32 %v3411_v41, %v2003_v7 }
 0x384   : > { %v1930_v62 = vadd.f32 %v1914_v11, %v1856_v47 }
 0x385   : > { %v2035_v13 = vadd.f32 %v3416_v0, %v2023_v39 }
 0x387   : > { %v2043_v14 = vadd.f32 %v2035_v13, %v2011_v34  ;;  %v1768_v5 = vpop.f32.mrf.mxu3 }
 0x388   : > { %v1782_v18 = vadd.f32 %v1768_v5, %v1708_v52  ;;  %v1988_v40 = vpop.f32.mrf.mxu2  ;;  %v2015_v5 = vld [vmem:[%s2907_s20 + $0x38] sm:$0xff] }
 0x389   : > { %v2051_v15 = vmax.f32 %v2043_v14, 0.0  ;;  %v2004_v58 = vadd.f32 %v1988_v40, %v1930_v62  ;;  %v1920_v8 = vpop.f32.mrf.mxu1 }
 0x38a   : > { %v1857_v20 = vadd.f32 %v3395_v42, %v1782_v18 }
 0x38b   : > { %2059 = vst [vmem:[%s2923_s12 + $0x18] sm:$0xff] %v2051_v15  ;;  %v2024_v35 = vmul.f32 %v3411_v41, %v2004_v58 }
 0x38c   : > { %v1931_v38 = vadd.f32 %v1917_v9, %v1857_v20 }
 0x38d   : > { %v2036_v44 = vadd.f32 %v3416_v0, %v2024_v35 }
 0x38f   : > { %v2044_v25 = vadd.f32 %v2036_v44, %v2012_v23  ;;  %v1771_v19 = vpop.f32.mrf.mxu3 }
 0x390   : > { %v1783_v27 = vadd.f32 %v1771_v19, %v1709_v22  ;;  %v1991_v26 = vpop.f32.mrf.mxu2 }
 0x391   : > { %v2052_v42 = vmax.f32 %v2044_v25, 0.0  ;;  %v2005_v36 = vadd.f32 %v1991_v26, %v1931_v38  ;;  %v1979_v45 = vpop.f32.mrf.mxu1 }
 0x392   : > { %v1858_v48 = vadd.f32 %v3397_v16, %v1783_v27  ;;  %v2001_v49 = vadd.f32 %v1979_v45, %v1927_v30 }
 0x393   : > { %2060 = vst [vmem:[%s2923_s12 + $0x20] sm:$0xff] %v2052_v42  ;;  %v2025_v43 = vmul.f32 %v3411_v41, %v2005_v36 }
 0x394   : > { %v2021_v53 = vmul.f32 %v3411_v41, %v2001_v49  ;;  %v1932_v60 = vadd.f32 %v1920_v8, %v1858_v48 }
 0x395   : > { %v2037_v29 = vadd.f32 %v3416_v0, %v2025_v43 }
 0x396   : > { %v2033_v54 = vadd.f32 %v3416_v0, %v2021_v53 }
 0x397   : > { %v2045_v57 = vadd.f32 %v2037_v29, %v2013_v51  ;;  %v1774_v16 = vpop.f32.mrf.mxu3 }
 0x398   : > { %v1784_v6 = vadd.f32 %v1774_v16, %v1710_v2  ;;  %v1994_v61 = vpop.f32.mrf.mxu2  ;;  %v2041_v63 = vadd.f32 %v2033_v54, %v2009_v32 }
 0x399   : > { %v2053_v59 = vmax.f32 %v2045_v57, 0.0  ;;  %v2006_v1 = vadd.f32 %v1994_v61, %v1932_v60  ;;  %v1982_v11 = vpop.f32.mrf.mxu1 }
 0x39a   : > { %v1859_v4 = vadd.f32 %v3403_v17, %v1784_v6  ;;  %v2049_v3 = vmax.f32 %v2041_v63, 0.0  ;;  %v2002_v33 = vadd.f32 %v1982_v11, %v1928_v10 }
 0x39b   : > { %2061 = vst [vmem:[%s2923_s12 + $0x28] sm:$0xff] %v2053_v59  ;;  %v2026_v12 = vmul.f32 %v3411_v41, %v2006_v1 }
 0x39c   : > { %2057 = vst [vmem:[%s2923_s12 + $0x8] sm:$0xff] %v2049_v3  ;;  %v2022_v37 = vmul.f32 %v3411_v41, %v2002_v33 }
 0x39d   : > { %v2038_v56 = vadd.f32 %v3416_v0, %v2026_v12 }
 0x39e   : > { %v2034_v17 = vadd.f32 %v3416_v0, %v2022_v37 }
 0x39f   : > { %v2046_v50 = vadd.f32 %v2038_v56, %v2014_v31  ;;  %v1923_v7 = vpop.f32.mrf.mxu3 }
 0x3a0   : > { %v1933_v9 = vadd.f32 %v1923_v7, %v1859_v4  ;;  %v1997_v47 = vpop.f32.mrf.mxu2  ;;  %v2042_v34 = vadd.f32 %v2034_v17, %v2010_v55 }
 0x3a1   : > { %v2054_v39 = vmax.f32 %v2046_v50, 0.0 }
 0x3a2   : > { %v2007_v13 = vadd.f32 %v1997_v47, %v1933_v9  ;;  %v2050_v52 = vmax.f32 %v2042_v34, 0.0 }
 0x3a3   : > { %2062 = vst [vmem:[%s2923_s12 + $0x30] sm:$0xff] %v2054_v39 }
 0x3a4   : > { %v2027_v14 = vmul.f32 %v3411_v41, %v2007_v13  ;;  %2058 = vst [vmem:[%s2923_s12 + $0x10] sm:$0xff] %v2050_v52 }
 0x3a6   : > { %v2039_v62 = vadd.f32 %v3416_v0, %v2027_v14 }
 0x3a8   : > { %v2047_v18 = vadd.f32 %v2039_v62, %v2015_v5 }
 0x3aa   : > { %v2055_v40 = vmax.f32 %v2047_v18, 0.0 }
 0x3ac   : > { %2063 = vst [vmem:[%s2923_s12 + $0x38] sm:$0xff] %v2055_v40 }
 0x3ad   : > { %2565 = shalt.err (!%p2562_p8)
}
 0x3ae   : > { %s2673_s5 = smov 128   ;;  %s2674_s12 = smov 8  }
 0x3af   : > { %2324 = dma.vmem_to_hbm [thread:$0]  (%p2785_p6), %s2081_s16, 1024, %s2083_s6, %s2065_s7, %s2673_s5, %s2673_s5, %s2674_s12  }
 0x3b0 PF: > { %s3563_s23 = sld [smem:[#allocation14_spill]]  ;;  %p2346_p9 = scmp.ge.s32.totalorder %s2664_s11, 2 }
 0x3b2   : > { %p2338_p12 = pnand %p2346_p9, %p2791_p10 }
 0x3b4   : > { %p2339_p13 = pneg %p2338_p12 }
 0x3b6   : > { %s2097_s30 = sand.u32 1, %s3563_s23  }
 0x3b7   : > { %s2098_s1 = scalar_lea.sflag [#allocation6], %s2097_s30 }
 0x3b8   : > { %2619 = dma.done.wait (%p2339_p13), %s2098_s1, 1024  }
 0x3b9   : > { %2621 = vsyncadd (%p2339_p13), %s2098_s1, 4294966272  ;;  %s24_s11 = sadd.s32 1, %s2664_s11   ;;  %s3565_s13 = smov %s2839_s24 }
 0x3ba   : > { %p21_p1 = scmp.ge.s32.totalorder %s24_s11, 10   ;;  %s3566_s30 = sld [smem:[#allocation16_spill]] }
 0x3bb   : > { %s3567_s9 = sld [smem:[#allocation19_spill]]  ;;  %s3569_s24 = smov %s2628_s25 }
 0x3bc   : > { %s3568_s2 = sld [smem:[#allocation20_spill]]  ;;  %s3570_s25 = smov %s2632_s26 }
 0x3bd   : > { %s3571_s26 = smov %s2842_s27  ;;  %s3572_s27 = smov %s2640_s28 }
 0x3be   : > { %s3573_s28 = smov %s2644_s29  ;;  %s3574_s29 = smov %s3565_s13 }
 0x3bf   : > { %s3575_s8 = smov %s2660_s10  ;;  %23 = sbr.rel (!%p21_p1) target bundleno = 16 (0x10), region = 154 }
 0x3c2   : > { %s3576_s10 = smov %s3568_s2 }
 0x3c4   :  { %2104 = vsyncpa [#allocation5], 1 }
 0x3c5   :  { %2106 = vsyncpa [#allocation5 + $0x1], 1 }
 0x3c6   :  { %2107 = vsyncpa [#allocation8], 1 }
 0x3c7   :  { %2108 = vsyncpa [#allocation6], 1 }
 0x3c8   :  { %2110 = vsyncpa [#allocation6 + $0x1], 1 }

</bundles_post_ra>
